<compile_context>
chip_gen: v6e
topology: v6e:2x2x1
jax: 0.10.0
libtpu: 0.0.40
codegen_flags: <defaults>
</compile_context>

<pallas_src>
import functools
import math

import jax
import jax.numpy as jnp
from jax.experimental import pallas as pl
from jax.experimental.pallas import tpu as pltpu

_LOG2 = math.log(2.0)
_HALF_LOG_2PI = 0.5 * math.log(2.0 * math.pi)
_BN_EPS = 1e-5
_NEG_INF = float("-inf")

# indices into the packed SMEM scalar vector
_BC, _SB2, _TW, _TB, _VW, _VB = range(6)


# ----------------------------------------------------------------------------
# Fused kernel
# ----------------------------------------------------------------------------
def _fused_kernel(num_gaussians,
                  # inputs
                  x_ref, bond_ref, feat_ref, frame_ref,
                  wcp_ref, scal_ref,                       # SMEM scalars
                  wc_ref, w2_ref,
                  f1w1_ref, f1b1_ref, f1w2_ref, f1b2_ref,
                  g2w1_ref, g2b1_ref, g2w2_ref, g2b2_ref,
                  sw1_ref, sb1_ref, sw2_ref,
                  # output
                  out_ref,
                  # scratch
                  h1_s, h2t_s, s1_ref, q1_ref, s2_ref, q2_ref):
    p = pl.program_id(0)          # 0: compute + accumulate BN stats, 1: normalize + emit
    i = pl.program_id(1)          # batch index
    batch = h1_s.shape[0]
    ctd = bond_ref.shape[1]
    t, e = x_ref.shape[1], x_ref.shape[2]

    @pl.when(jnp.logical_and(p == 0, i == 0))
    def _init_stats():
        s1_ref[...] = jnp.zeros_like(s1_ref)
        q1_ref[...] = jnp.zeros_like(q1_ref)
        s2_ref[...] = jnp.zeros_like(s2_ref)
        q2_ref[...] = jnp.zeros_like(q2_ref)

    feat = feat_ref[pl.ds(i, 1), :]                       # (1, ftr) - used in both passes

    # ------------------------------------------------------------------ pass 0
    @pl.when(p == 0)
    def _compute():
        x = x_ref[0]                                      # (t, e)

        # Gaussian-mixture contact potential.  bond arrives as (ctd, t, e), so
        # the ctd contraction is a scalar-weighted accumulation of full (t, e)
        # slabs on the VPU (weights read as scalars from SMEM).
        v_c = jnp.zeros((t, e), jnp.float32)
        for g in range(num_gaussians):
            slab0 = bond_ref[0, 0]
            bg = wcp_ref[3 * g + 0, 0] * slab0
            cg = wcp_ref[3 * g + 1, 0] * slab0
            rg = wcp_ref[3 * g + 2, 0] * slab0
            for c in range(1, ctd):
                slab = bond_ref[0, c]
                bg = bg + wcp_ref[3 * g + 0, c] * slab
                cg = cg + wcp_ref[3 * g + 1, c] * slab
                rg = rg + wcp_ref[3 * g + 2, c] * slab
            v_c = v_c + bg * jnp.exp(-cg * jnp.square(x - rg))

        # env_effect_c: per-batch sigmoid scaler (einsum 'ijk,im->ijk', m = 1)
        scaler = jax.nn.sigmoid(
            jnp.sum(feat * wc_ref[...], axis=-1, keepdims=True) + scal_ref[_BC])   # (1,1)

        # V = V_c * sigmoid(scaler_c) + W_2 / (1/x)  ==  V_c * scaler + W_2 * x
        v = v_c * scaler + w2_ref[...] * x
        # TODO(synk): nn.Dropout(0.2) treated as eval-mode identity (deterministic kernel).

        # ff1(V) + V
        h = jnp.maximum(
            jnp.dot(v, f1w1_ref[...], preferred_element_type=jnp.float32) + f1b1_ref[...],
            0.0)
        h1 = jnp.dot(h, f1w2_ref[...], preferred_element_type=jnp.float32) + f1b2_ref[...] + v
        h1_s[i] = h1

        # ff2(V^T) + V^T computed directly in the transposed (t, e) layout via
        # left-multiplication with pre-transposed weights (no transpose op).
        hh = jnp.maximum(
            jnp.dot(g2w1_ref[...], v, preferred_element_type=jnp.float32) + g2b1_ref[...],
            0.0)
        h2t = jnp.dot(g2w2_ref[...], hh, preferred_element_type=jnp.float32) + g2b2_ref[...] + v
        h2t_s[i] = h2t

        # one-pass BatchNorm statistics (sum, sum of squares)
        s1_ref[...] += jnp.sum(h1, axis=1, keepdims=True)            # (t, 1)  norm1 channels
        q1_ref[...] += jnp.sum(h1 * h1, axis=1, keepdims=True)
        s2_ref[...] += jnp.sum(h2t, axis=0, keepdims=True)           # (1, e)  norm2 channels
        q2_ref[...] += jnp.sum(h2t * h2t, axis=0, keepdims=True)

    # ------------------------------------------------------------------ pass 1
    @pl.when(p == 1)
    def _finalize():
        inv_n1 = 1.0 / float(batch * e)      # norm1 count: batch * spatial(e)
        inv_n2 = 1.0 / float(batch * t)      # norm2 count: batch * spatial(t)
        m1 = s1_ref[...] * inv_n1
        r1 = jax.lax.rsqrt(q1_ref[...] * inv_n1 - m1 * m1 + _BN_EPS)
        m2 = s2_ref[...] * inv_n2
        r2 = jax.lax.rsqrt(q2_ref[...] * inv_n2 - m2 * m2 + _BN_EPS)

        h1 = h1_s[i]
        h2t = h2t_s[i]
        # V3 = norm1(ff1+V) + transpose(norm2(ff2+V^T)); h2t is already transposed,
        # so its normalization broadcasts along the lane axis -> no transpose here.
        v3 = (h1 - m1) * r1 + (h2t - m2) * r2

        # env heads (kept as (1,1) tiles; no scalar-unit transcendentals)
        hs = jax.nn.sigmoid(
            jnp.dot(feat, sw1_ref[...], preferred_element_type=jnp.float32) + sb1_ref[...])
        sigma = 10.0 * jax.nn.softplus(
            jnp.sum(hs * sw2_ref[...], axis=-1, keepdims=True) + scal_ref[_SB2])     # (1,1)
        frame_i = frame_ref[pl.ds(i, 1), :]                                          # (1,1)
        time_ff = jnp.log(frame_i) * scal_ref[_TW] + scal_ref[_TB]                   # (1,1)
        t_env = feat[:, 0:1] * scal_ref[_VW] + scal_ref[_VB]                         # (1,1)

        inv_t = 1.0 / t_env          # hoisted: 2 tiny divides instead of 2*(t*e) divides
        inv_sigma = 1.0 / sigma

        mean = time_ff - v3 * inv_t
        logp = (_LOG2 - _HALF_LOG_2PI) - 0.5 * mean * mean       # HalfNormal(1).log_prob, m >= 0
        log_kernel = jnp.where(mean >= 0.0, logp, _NEG_INF)
        out_ref[0] = 1.0 - jnp.exp(log_kernel * inv_sigma)


# ----------------------------------------------------------------------------
# Parameters (deterministic synthetic init; Linear weights stored pre-transposed
# as (in_features, out_features))
# ----------------------------------------------------------------------------
def init_params(key, ftr_dim, emb, contact_type_dim=10, num_gaussians=5, ff_hidden_mult=2):
    ks = jax.random.split(key, 9)
    s = 0.2
    p = {
        "wcp": jax.random.normal(ks[0], (3 * num_gaussians, contact_type_dim)) * s,
        "w2": jax.random.normal(ks[1], (emb, emb)),
        "wc": jax.random.normal(ks[2], (1, ftr_dim)) * s,
        "bc": jnp.array([[0.1]]),
        "f1w1": jax.random.normal(ks[3], (emb, ff_hidden_mult * emb)) * s,
        "f1b1": jnp.zeros((1, ff_hidden_mult * emb)),
        "f1w2": jax.random.normal(ks[4], (ff_hidden_mult * emb, emb)) * s,
        "f1b2": jnp.zeros((1, emb)),
        "f2w1": jax.random.normal(ks[5], (emb, ff_hidden_mult * emb)) * s,
        "f2b1": jnp.zeros((1, ff_hidden_mult * emb)),
        "f2w2": jax.random.normal(ks[6], (ff_hidden_mult * emb, emb)) * s,
        "f2b2": jnp.zeros((1, emb)),
        "sw1": jax.random.normal(ks[7], (ftr_dim, ff_hidden_mult * ftr_dim)) * s,
        "sb1": jnp.zeros((1, ff_hidden_mult * ftr_dim)),
        "sw2": jax.random.normal(ks[8], (1, ff_hidden_mult * ftr_dim)) * s,  # Linear(2*ftr, 1).weight
        "sb2": jnp.array([[0.05]]),
        "tw": jnp.array([[0.5]]),   # env_effect_time
        "tb": jnp.array([[0.1]]),
        "vw": jnp.array([[0.3]]),   # env_effect_v
        "vb": jnp.array([[1.5]]),
    }
    return jax.tree_util.tree_map(lambda a: a.astype(jnp.float32), p)


# ----------------------------------------------------------------------------
# Wrapper
# ----------------------------------------------------------------------------
@functools.partial(jax.jit, static_argnames=("num_gaussians",))
def degradation_forward(frame, x, bond, feature, params, num_gaussians=5):
    b, t, e = x.shape
    assert t == e, "W_2 / (1/x) broadcast in the reference model requires t == emb"
    ctd = bond.shape[-1]

    # ---- host-side layout prep (cheap, fused into the surrounding jit) ----
    bond_r = jnp.transpose(bond, (0, 3, 1, 2)).astype(jnp.float32)   # (b, ctd, t, e)
    frame2d = frame.reshape(b, 1).astype(jnp.float32)
    g2w1 = params["f2w1"].T                                           # (2e, e)
    g2b1 = params["f2b1"].T                                           # (2e, 1)
    g2w2 = params["f2w2"].T                                           # (e, 2e)
    g2b2 = params["f2b2"].T                                           # (e, 1)
    scal = jnp.concatenate([params["bc"].reshape(-1), params["sb2"].reshape(-1),
                            params["tw"].reshape(-1), params["tb"].reshape(-1),
                            params["vw"].reshape(-1), params["vb"].reshape(-1)])  # (6,)

    vmem_weights = [params["wc"], params["w2"],
                    params["f1w1"], params["f1b1"], params["f1w2"], params["f1b2"],
                    g2w1, g2b1, g2w2, g2b2,
                    params["sw1"], params["sb1"], params["sw2"]]

    def batch_idx(p_, i_):
        # pass 0: walk the batch; pass 1: hold the last block (no re-fetch of bond/x)
        return i_ * (1 - p_) + (b - 1) * p_

    def full(a):
        nd = a.ndim
        return pl.BlockSpec(a.shape, lambda p_, i_, nd=nd: (0,) * nd)

    def smem():
        return pl.BlockSpec(memory_space=pltpu.MemorySpace.SMEM)

    in_specs = [
        pl.BlockSpec((1, t, e), lambda p_, i_: (batch_idx(p_, i_), 0, 0)),        # x
        pl.BlockSpec((1, ctd, t, e), lambda p_, i_: (batch_idx(p_, i_), 0, 0, 0)),  # bond (ctd-major)
        full(feature),                                                            # feature (resident)
        full(frame2d),                                                            # frame (resident)
        smem(),                                                                   # wcp  -> SMEM scalars
        smem(),                                                                   # scal -> SMEM scalars
    ] + [full(a) for a in vmem_weights]

    # pass 0 keeps the output block index constant (0) -> never flushed with
    # uninitialized data; pass 1 writes block i and it flushes on index change.
    out_spec = pl.BlockSpec((1, t, e), lambda p_, i_: (p_ * i_, 0, 0))

    s_t = pl.pallas_call(
        functools.partial(_fused_kernel, num_gaussians),
        out_shape=jax.ShapeDtypeStruct((b, t, e), jnp.float32),
        grid=(2, b),
        in_specs=in_specs,
        out_specs=out_spec,
        scratch_shapes=[
            # TODO(synk): h1/h2 scratch scales as 2*b*t*e*4 bytes; for large b*emb^2
            # it should be spilled to HBM (pl.ANY + manual DMA) instead of VMEM.
            pltpu.VMEM((b, t, e), jnp.float32),   # h1 = ff1(V)+V
            pltpu.VMEM((b, t, e), jnp.float32),   # h2^T = (ff2(V^T)+V^T)^T
            pltpu.VMEM((t, 1), jnp.float32),      # BN1 sum   (per channel over t)
            pltpu.VMEM((t, 1), jnp.float32),      # BN1 sumsq
            pltpu.VMEM((1, e), jnp.float32),      # BN2 sum   (per channel over e)
            pltpu.VMEM((1, e), jnp.float32),      # BN2 sumsq
        ],
        compiler_params=pltpu.CompilerParams(
            # both axes must stay sequential: the pass axis orders stats vs. use,
            # and the batch axis accumulates cross-batch BatchNorm statistics
            # into shared scratch (so it cannot be sharded across TensorCores).
            dimension_semantics=("arbitrary", "arbitrary"),
            vmem_limit_bytes=32 * 1024 * 1024,
        ),
    )(x, bond_r, feature, frame2d, params["wcp"], scal, *vmem_weights)

    return s_t


if __name__ == "__main__":
    b, emb, ftr_dim, ctd, ng = 2, 16, 8, 10, 5
    t = emb  # the PyTorch module's `W_2 / (1/x)` broadcast requires t == emb

    key = jax.random.PRNGKey(0)
    k_frame, k_x, k_bond, k_feat, k_mask, k_w = jax.random.split(key, 6)

    frame = jax.random.uniform(k_frame, (b,), minval=1.0, maxval=10.0)
    x = jax.random.uniform(k_x, (b, t, emb), minval=0.5, maxval=2.0)
    bond = jax.random.normal(k_bond, (b, t, emb, ctd))
    feature = jax.random.normal(k_feat, (b, ftr_dim))
    mask = (jax.random.uniform(k_mask, (b, t, emb)) > 0.5).astype(jnp.int32)

    params = init_params(k_w, ftr_dim, emb, ctd, ng)

    s_t = degradation_forward(frame, x, bond, feature, params, num_gaussians=ng)
    s_t = jax.block_until_ready(s_t)
    assert s_t.shape == (b, t, emb)

    # Final `S_t[mask > 0]` boolean gather has a data-dependent output shape,
    # so it is applied on the concrete result outside the kernel.
    out = s_t[mask > 0]
    jax.block_until_ready(out)

    print("KERNEL_OK")
</pallas_src>

<mosaic_0001>
module attributes {stable_mosaic.version = 11 : i64} {
  func.func @_fused_kernel(%arg0: i32, %arg1: i32, %arg2: memref<1x16x16xf32, #tpu.memory_space<vmem>>, %arg3: memref<1x10x16x16xf32, #tpu.memory_space<vmem>>, %arg4: memref<2x8xf32, #tpu.memory_space<vmem>>, %arg5: memref<2x1xf32, #tpu.memory_space<vmem>>, %arg6: memref<15x10xf32, #tpu.memory_space<smem>>, %arg7: memref<6xf32, #tpu.memory_space<smem>>, %arg8: memref<1x8xf32, #tpu.memory_space<vmem>>, %arg9: memref<16x16xf32, #tpu.memory_space<vmem>>, %arg10: memref<16x32xf32, #tpu.memory_space<vmem>>, %arg11: memref<1x32xf32, #tpu.memory_space<vmem>>, %arg12: memref<32x16xf32, #tpu.memory_space<vmem>>, %arg13: memref<1x16xf32, #tpu.memory_space<vmem>>, %arg14: memref<32x16xf32, #tpu.memory_space<vmem>>, %arg15: memref<32x1xf32, #tpu.memory_space<vmem>>, %arg16: memref<16x32xf32, #tpu.memory_space<vmem>>, %arg17: memref<16x1xf32, #tpu.memory_space<vmem>>, %arg18: memref<8x16xf32, #tpu.memory_space<vmem>>, %arg19: memref<1x16xf32, #tpu.memory_space<vmem>>, %arg20: memref<1x16xf32, #tpu.memory_space<vmem>>, %arg21: memref<1x16x16xf32, #tpu.memory_space<vmem>>, %arg22: memref<2x16x16xf32, #tpu.memory_space<vmem>>, %arg23: memref<2x16x16xf32, #tpu.memory_space<vmem>>, %arg24: memref<16x1xf32, #tpu.memory_space<vmem>>, %arg25: memref<16x1xf32, #tpu.memory_space<vmem>>, %arg26: memref<1x16xf32, #tpu.memory_space<vmem>>, %arg27: memref<1x16xf32, #tpu.memory_space<vmem>>) attributes {dimension_semantics = [#tpu.dimension_semantics<arbitrary>, #tpu.dimension_semantics<arbitrary>], iteration_bounds = array<i64: 2, 2>, scalar_prefetch = 0 : i64, scratch_operands = 6 : i64, tpu.core_type = #tpu.core_type<tc>, window_params = [{transform_indices = @transform_0, window_bounds = array<i64: 1, 16, 16>}, {transform_indices = @transform_1, window_bounds = array<i64: 1, 10, 16, 16>}, {pipeline_mode = #tpu.pipeline_mode<synchronous>, transform_indices = @transform_2, window_bounds = array<i64: 2, 8>}, {pipeline_mode = #tpu.pipeline_mode<synchronous>, transform_indices = @transform_3, window_bounds = array<i64: 2, 1>}, {transform_indices = @transform_4, window_bounds = array<i64: 15, 10>}, {transform_indices = @transform_5, window_bounds = array<i64: 6>}, {pipeline_mode = #tpu.pipeline_mode<synchronous>, transform_indices = @transform_6, window_bounds = array<i64: 1, 8>}, {pipeline_mode = #tpu.pipeline_mode<synchronous>, transform_indices = @transform_7, window_bounds = array<i64: 16, 16>}, {pipeline_mode = #tpu.pipeline_mode<synchronous>, transform_indices = @transform_8, window_bounds = array<i64: 16, 32>}, {pipeline_mode = #tpu.pipeline_mode<synchronous>, transform_indices = @transform_9, window_bounds = array<i64: 1, 32>}, {pipeline_mode = #tpu.pipeline_mode<synchronous>, transform_indices = @transform_10, window_bounds = array<i64: 32, 16>}, {pipeline_mode = #tpu.pipeline_mode<synchronous>, transform_indices = @transform_11, window_bounds = array<i64: 1, 16>}, {pipeline_mode = #tpu.pipeline_mode<synchronous>, transform_indices = @transform_12, window_bounds = array<i64: 32, 16>}, {pipeline_mode = #tpu.pipeline_mode<synchronous>, transform_indices = @transform_13, window_bounds = array<i64: 32, 1>}, {pipeline_mode = #tpu.pipeline_mode<synchronous>, transform_indices = @transform_14, window_bounds = array<i64: 16, 32>}, {pipeline_mode = #tpu.pipeline_mode<synchronous>, transform_indices = @transform_15, window_bounds = array<i64: 16, 1>}, {pipeline_mode = #tpu.pipeline_mode<synchronous>, transform_indices = @transform_16, window_bounds = array<i64: 8, 16>}, {pipeline_mode = #tpu.pipeline_mode<synchronous>, transform_indices = @transform_17, window_bounds = array<i64: 1, 16>}, {pipeline_mode = #tpu.pipeline_mode<synchronous>, transform_indices = @transform_18, window_bounds = array<i64: 1, 16>}, {transform_indices = @transform_19, window_bounds = array<i64: 1, 16, 16>}]} {
    %c0_i32 = arith.constant 0 : i32
    %0 = arith.cmpi eq, %arg0, %c0_i32 : i32
    %c0_i32_0 = arith.constant 0 : i32
    %1 = arith.cmpi eq, %arg1, %c0_i32_0 : i32
    %2 = arith.andi %0, %1 : i1
    %3 = arith.extui %2 : i1 to i32
    %c0_i32_1 = arith.constant 0 : i32
    %4 = arith.cmpi ne, %3, %c0_i32_1 : i32
    scf.if %4 {
      %cst = arith.constant 0.000000e+00 : f32
      %13 = vector.broadcast %cst : f32 to vector<16x1xf32>
      %c0_5 = arith.constant 0 : index
      %c0_6 = arith.constant 0 : index
      %14 = vector.load %arg24[%c0_5, %c0_6] : memref<16x1xf32, #tpu.memory_space<vmem>>, vector<16x1xf32>
      tpu.vector_store %arg24[%c0_5, %c0_6], %13 {strides = array<i32>} : memref<16x1xf32, #tpu.memory_space<vmem>>, vector<16x1xf32>,
      %cst_7 = arith.constant 0.000000e+00 : f32
      %15 = vector.broadcast %cst_7 : f32 to vector<16x1xf32>
      %c0_8 = arith.constant 0 : index
      %c0_9 = arith.constant 0 : index
      %16 = vector.load %arg25[%c0_8, %c0_9] : memref<16x1xf32, #tpu.memory_space<vmem>>, vector<16x1xf32>
      tpu.vector_store %arg25[%c0_8, %c0_9], %15 {strides = array<i32>} : memref<16x1xf32, #tpu.memory_space<vmem>>, vector<16x1xf32>,
      %cst_10 = arith.constant 0.000000e+00 : f32
      %17 = vector.broadcast %cst_10 : f32 to vector<1x16xf32>
      %c0_11 = arith.constant 0 : index
      %c0_12 = arith.constant 0 : index
      %18 = vector.load %arg26[%c0_11, %c0_12] : memref<1x16xf32, #tpu.memory_space<vmem>>, vector<1x16xf32>
      tpu.vector_store %arg26[%c0_11, %c0_12], %17 {strides = array<i32>} : memref<1x16xf32, #tpu.memory_space<vmem>>, vector<1x16xf32>,
      %cst_13 = arith.constant 0.000000e+00 : f32
      %19 = vector.broadcast %cst_13 : f32 to vector<1x16xf32>
      %c0_14 = arith.constant 0 : index
      %c0_15 = arith.constant 0 : index
      %20 = vector.load %arg27[%c0_14, %c0_15] : memref<1x16xf32, #tpu.memory_space<vmem>>, vector<1x16xf32>
      tpu.vector_store %arg27[%c0_14, %c0_15], %19 {strides = array<i32>} : memref<1x16xf32, #tpu.memory_space<vmem>>, vector<1x16xf32>,
    } else {
    }
    %5 = arith.index_cast %arg1 : i32 to index
    %c0 = arith.constant 0 : index
    %6 = vector.load %arg4[%5, %c0] : memref<2x8xf32, #tpu.memory_space<vmem>>, vector<1x8xf32>
    %c0_i32_2 = arith.constant 0 : i32
    %7 = arith.cmpi eq, %arg0, %c0_i32_2 : i32
    %8 = arith.extui %7 : i1 to i32
    %c0_i32_3 = arith.constant 0 : i32
    %9 = arith.cmpi ne, %8, %c0_i32_3 : i32
    scf.if %9 {
      %c0_5 = arith.constant 0 : index
      %c0_6 = arith.constant 0 : index
      %c0_7 = arith.constant 0 : index
      %13 = vector.load %arg2[%c0_5, %c0_6, %c0_7] : memref<1x16x16xf32, #tpu.memory_space<vmem>>, vector<1x16x16xf32>
      %14 = vector.shape_cast %13 : vector<1x16x16xf32> to vector<16x16xf32>
      %cst = arith.constant 0.000000e+00 : f32
      %15 = vector.broadcast %cst : f32 to vector<16x16xf32>
      %c0_8 = arith.constant 0 : index
      %c0_9 = arith.constant 0 : index
      %c0_10 = arith.constant 0 : index
      %c0_11 = arith.constant 0 : index
      %16 = vector.load %arg3[%c0_8, %c0_9, %c0_10, %c0_11] : memref<1x10x16x16xf32, #tpu.memory_space<vmem>>, vector<1x1x16x16xf32>
      %17 = vector.shape_cast %16 : vector<1x1x16x16xf32> to vector<16x16xf32>
      %c0_12 = arith.constant 0 : index
      %c0_13 = arith.constant 0 : index
      %18 = memref.load %arg6[%c0_12, %c0_13] : memref<15x10xf32, #tpu.memory_space<smem>>
      %19 = vector.broadcast %18 : f32 to vector<16x16xf32>
      %20 = arith.mulf %19, %17 : vector<16x16xf32>
      %c1 = arith.constant 1 : index
      %c0_14 = arith.constant 0 : index
      %21 = memref.load %arg6[%c1, %c0_14] : memref<15x10xf32, #tpu.memory_space<smem>>
      %22 = vector.broadcast %21 : f32 to vector<16x16xf32>
      %23 = arith.mulf %22, %17 : vector<16x16xf32>
      %c2 = arith.constant 2 : index
      %c0_15 = arith.constant 0 : index
      %24 = memref.load %arg6[%c2, %c0_15] : memref<15x10xf32, #tpu.memory_space<smem>>
      %25 = vector.broadcast %24 : f32 to vector<16x16xf32>
      %26 = arith.mulf %25, %17 : vector<16x16xf32>
      %c0_16 = arith.constant 0 : index
      %c1_17 = arith.constant 1 : index
      %c0_18 = arith.constant 0 : index
      %c0_19 = arith.constant 0 : index
      %27 = vector.load %arg3[%c0_16, %c1_17, %c0_18, %c0_19] : memref<1x10x16x16xf32, #tpu.memory_space<vmem>>, vector<1x1x16x16xf32>
      %28 = vector.shape_cast %27 : vector<1x1x16x16xf32> to vector<16x16xf32>
      %c0_20 = arith.constant 0 : index
      %c1_21 = arith.constant 1 : index
      %29 = memref.load %arg6[%c0_20, %c1_21] : memref<15x10xf32, #tpu.memory_space<smem>>
      %30 = vector.broadcast %29 : f32 to vector<16x16xf32>
      %31 = arith.mulf %30, %28 : vector<16x16xf32>
      %32 = arith.addf %20, %31 : vector<16x16xf32>
      %c1_22 = arith.constant 1 : index
      %c1_23 = arith.constant 1 : index
      %33 = memref.load %arg6[%c1_22, %c1_23] : memref<15x10xf32, #tpu.memory_space<smem>>
      %34 = vector.broadcast %33 : f32 to vector<16x16xf32>
      %35 = arith.mulf %34, %28 : vector<16x16xf32>
      %36 = arith.addf %23, %35 : vector<16x16xf32>
      %c2_24 = arith.constant 2 : index
      %c1_25 = arith.constant 1 : index
      %37 = memref.load %arg6[%c2_24, %c1_25] : memref<15x10xf32, #tpu.memory_space<smem>>
      %38 = vector.broadcast %37 : f32 to vector<16x16xf32>
      %39 = arith.mulf %38, %28 : vector<16x16xf32>
      %40 = arith.addf %26, %39 : vector<16x16xf32>
      %c0_26 = arith.constant 0 : index
      %c2_27 = arith.constant 2 : index
      %c0_28 = arith.constant 0 : index
      %c0_29 = arith.constant 0 : index
      %41 = vector.load %arg3[%c0_26, %c2_27, %c0_28, %c0_29] : memref<1x10x16x16xf32, #tpu.memory_space<vmem>>, vector<1x1x16x16xf32>
      %42 = vector.shape_cast %41 : vector<1x1x16x16xf32> to vector<16x16xf32>
      %c0_30 = arith.constant 0 : index
      %c2_31 = arith.constant 2 : index
      %43 = memref.load %arg6[%c0_30, %c2_31] : memref<15x10xf32, #tpu.memory_space<smem>>
      %44 = vector.broadcast %43 : f32 to vector<16x16xf32>
      %45 = arith.mulf %44, %42 : vector<16x16xf32>
      %46 = arith.addf %32, %45 : vector<16x16xf32>
      %c1_32 = arith.constant 1 : index
      %c2_33 = arith.constant 2 : index
      %47 = memref.load %arg6[%c1_32, %c2_33] : memref<15x10xf32, #tpu.memory_space<smem>>
      %48 = vector.broadcast %47 : f32 to vector<16x16xf32>
      %49 = arith.mulf %48, %42 : vector<16x16xf32>
      %50 = arith.addf %36, %49 : vector<16x16xf32>
      %c2_34 = arith.constant 2 : index
      %c2_35 = arith.constant 2 : index
      %51 = memref.load %arg6[%c2_34, %c2_35] : memref<15x10xf32, #tpu.memory_space<smem>>
      %52 = vector.broadcast %51 : f32 to vector<16x16xf32>
      %53 = arith.mulf %52, %42 : vector<16x16xf32>
      %54 = arith.addf %40, %53 : vector<16x16xf32>
      %c0_36 = arith.constant 0 : index
      %c3 = arith.constant 3 : index
      %c0_37 = arith.constant 0 : index
      %c0_38 = arith.constant 0 : index
      %55 = vector.load %arg3[%c0_36, %c3, %c0_37, %c0_38] : memref<1x10x16x16xf32, #tpu.memory_space<vmem>>, vector<1x1x16x16xf32>
      %56 = vector.shape_cast %55 : vector<1x1x16x16xf32> to vector<16x16xf32>
      %c0_39 = arith.constant 0 : index
      %c3_40 = arith.constant 3 : index
      %57 = memref.load %arg6[%c0_39, %c3_40] : memref<15x10xf32, #tpu.memory_space<smem>>
      %58 = vector.broadcast %57 : f32 to vector<16x16xf32>
      %59 = arith.mulf %58, %56 : vector<16x16xf32>
      %60 = arith.addf %46, %59 : vector<16x16xf32>
      %c1_41 = arith.constant 1 : index
      %c3_42 = arith.constant 3 : index
      %61 = memref.load %arg6[%c1_41, %c3_42] : memref<15x10xf32, #tpu.memory_space<smem>>
      %62 = vector.broadcast %61 : f32 to vector<16x16xf32>
      %63 = arith.mulf %62, %56 : vector<16x16xf32>
      %64 = arith.addf %50, %63 : vector<16x16xf32>
      %c2_43 = arith.constant 2 : index
      %c3_44 = arith.constant 3 : index
      %65 = memref.load %arg6[%c2_43, %c3_44] : memref<15x10xf32, #tpu.memory_space<smem>>
      %66 = vector.broadcast %65 : f32 to vector<16x16xf32>
      %67 = arith.mulf %66, %56 : vector<16x16xf32>
      %68 = arith.addf %54, %67 : vector<16x16xf32>
      %c0_45 = arith.constant 0 : index
      %c4 = arith.constant 4 : index
      %c0_46 = arith.constant 0 : index
      %c0_47 = arith.constant 0 : index
      %69 = vector.load %arg3[%c0_45, %c4, %c0_46, %c0_47] : memref<1x10x16x16xf32, #tpu.memory_space<vmem>>, vector<1x1x16x16xf32>
      %70 = vector.shape_cast %69 : vector<1x1x16x16xf32> to vector<16x16xf32>
      %c0_48 = arith.constant 0 : index
      %c4_49 = arith.constant 4 : index
      %71 = memref.load %arg6[%c0_48, %c4_49] : memref<15x10xf32, #tpu.memory_space<smem>>
      %72 = vector.broadcast %71 : f32 to vector<16x16xf32>
      %73 = arith.mulf %72, %70 : vector<16x16xf32>
      %74 = arith.addf %60, %73 : vector<16x16xf32>
      %c1_50 = arith.constant 1 : index
      %c4_51 = arith.constant 4 : index
      %75 = memref.load %arg6[%c1_50, %c4_51] : memref<15x10xf32, #tpu.memory_space<smem>>
      %76 = vector.broadcast %75 : f32 to vector<16x16xf32>
      %77 = arith.mulf %76, %70 : vector<16x16xf32>
      %78 = arith.addf %64, %77 : vector<16x16xf32>
      %c2_52 = arith.constant 2 : index
      %c4_53 = arith.constant 4 : index
      %79 = memref.load %arg6[%c2_52, %c4_53] : memref<15x10xf32, #tpu.memory_space<smem>>
      %80 = vector.broadcast %79 : f32 to vector<16x16xf32>
      %81 = arith.mulf %80, %70 : vector<16x16xf32>
      %82 = arith.addf %68, %81 : vector<16x16xf32>
      %c0_54 = arith.constant 0 : index
      %c5 = arith.constant 5 : index
      %c0_55 = arith.constant 0 : index
      %c0_56 = arith.constant 0 : index
      %83 = vector.load %arg3[%c0_54, %c5, %c0_55, %c0_56] : memref<1x10x16x16xf32, #tpu.memory_space<vmem>>, vector<1x1x16x16xf32>
      %84 = vector.shape_cast %83 : vector<1x1x16x16xf32> to vector<16x16xf32>
      %c0_57 = arith.constant 0 : index
      %c5_58 = arith.constant 5 : index
      %85 = memref.load %arg6[%c0_57, %c5_58] : memref<15x10xf32, #tpu.memory_space<smem>>
      %86 = vector.broadcast %85 : f32 to vector<16x16xf32>
      %87 = arith.mulf %86, %84 : vector<16x16xf32>
      %88 = arith.addf %74, %87 : vector<16x16xf32>
      %c1_59 = arith.constant 1 : index
      %c5_60 = arith.constant 5 : index
      %89 = memref.load %arg6[%c1_59, %c5_60] : memref<15x10xf32, #tpu.memory_space<smem>>
      %90 = vector.broadcast %89 : f32 to vector<16x16xf32>
      %91 = arith.mulf %90, %84 : vector<16x16xf32>
      %92 = arith.addf %78, %91 : vector<16x16xf32>
      %c2_61 = arith.constant 2 : index
      %c5_62 = arith.constant 5 : index
      %93 = memref.load %arg6[%c2_61, %c5_62] : memref<15x10xf32, #tpu.memory_space<smem>>
      %94 = vector.broadcast %93 : f32 to vector<16x16xf32>
      %95 = arith.mulf %94, %84 : vector<16x16xf32>
      %96 = arith.addf %82, %95 : vector<16x16xf32>
      %c0_63 = arith.constant 0 : index
      %c6 = arith.constant 6 : index
      %c0_64 = arith.constant 0 : index
      %c0_65 = arith.constant 0 : index
      %97 = vector.load %arg3[%c0_63, %c6, %c0_64, %c0_65] : memref<1x10x16x16xf32, #tpu.memory_space<vmem>>, vector<1x1x16x16xf32>
      %98 = vector.shape_cast %97 : vector<1x1x16x16xf32> to vector<16x16xf32>
      %c0_66 = arith.constant 0 : index
      %c6_67 = arith.constant 6 : index
      %99 = memref.load %arg6[%c0_66, %c6_67] : memref<15x10xf32, #tpu.memory_space<smem>>
      %100 = vector.broadcast %99 : f32 to vector<16x16xf32>
      %101 = arith.mulf %100, %98 : vector<16x16xf32>
      %102 = arith.addf %88, %101 : vector<16x16xf32>
      %c1_68 = arith.constant 1 : index
      %c6_69 = arith.constant 6 : index
      %103 = memref.load %arg6[%c1_68, %c6_69] : memref<15x10xf32, #tpu.memory_space<smem>>
      %104 = vector.broadcast %103 : f32 to vector<16x16xf32>
      %105 = arith.mulf %104, %98 : vector<16x16xf32>
      %106 = arith.addf %92, %105 : vector<16x16xf32>
      %c2_70 = arith.constant 2 : index
      %c6_71 = arith.constant 6 : index
      %107 = memref.load %arg6[%c2_70, %c6_71] : memref<15x10xf32, #tpu.memory_space<smem>>
      %108 = vector.broadcast %107 : f32 to vector<16x16xf32>
      %109 = arith.mulf %108, %98 : vector<16x16xf32>
      %110 = arith.addf %96, %109 : vector<16x16xf32>
      %c0_72 = arith.constant 0 : index
      %c7 = arith.constant 7 : index
      %c0_73 = arith.constant 0 : index
      %c0_74 = arith.constant 0 : index
      %111 = vector.load %arg3[%c0_72, %c7, %c0_73, %c0_74] : memref<1x10x16x16xf32, #tpu.memory_space<vmem>>, vector<1x1x16x16xf32>
      %112 = vector.shape_cast %111 : vector<1x1x16x16xf32> to vector<16x16xf32>
      %c0_75 = arith.constant 0 : index
      %c7_76 = arith.constant 7 : index
      %113 = memref.load %arg6[%c0_75, %c7_76] : memref<15x10xf32, #tpu.memory_space<smem>>
      %114 = vector.broadcast %113 : f32 to vector<16x16xf32>
      %115 = arith.mulf %114, %112 : vector<16x16xf32>
      %116 = arith.addf %102, %115 : vector<16x16xf32>
      %c1_77 = arith.constant 1 : index
      %c7_78 = arith.constant 7 : index
      %117 = memref.load %arg6[%c1_77, %c7_78] : memref<15x10xf32, #tpu.memory_space<smem>>
      %118 = vector.broadcast %117 : f32 to vector<16x16xf32>
      %119 = arith.mulf %118, %112 : vector<16x16xf32>
      %120 = arith.addf %106, %119 : vector<16x16xf32>
      %c2_79 = arith.constant 2 : index
      %c7_80 = arith.constant 7 : index
      %121 = memref.load %arg6[%c2_79, %c7_80] : memref<15x10xf32, #tpu.memory_space<smem>>
      %122 = vector.broadcast %121 : f32 to vector<16x16xf32>
      %123 = arith.mulf %122, %112 : vector<16x16xf32>
      %124 = arith.addf %110, %123 : vector<16x16xf32>
      %c0_81 = arith.constant 0 : index
      %c8 = arith.constant 8 : index
      %c0_82 = arith.constant 0 : index
      %c0_83 = arith.constant 0 : index
      %125 = vector.load %arg3[%c0_81, %c8, %c0_82, %c0_83] : memref<1x10x16x16xf32, #tpu.memory_space<vmem>>, vector<1x1x16x16xf32>
      %126 = vector.shape_cast %125 : vector<1x1x16x16xf32> to vector<16x16xf32>
      %c0_84 = arith.constant 0 : index
      %c8_85 = arith.constant 8 : index
      %127 = memref.load %arg6[%c0_84, %c8_85] : memref<15x10xf32, #tpu.memory_space<smem>>
      %128 = vector.broadcast %127 : f32 to vector<16x16xf32>
      %129 = arith.mulf %128, %126 : vector<16x16xf32>
      %130 = arith.addf %116, %129 : vector<16x16xf32>
      %c1_86 = arith.constant 1 : index
      %c8_87 = arith.constant 8 : index
      %131 = memref.load %arg6[%c1_86, %c8_87] : memref<15x10xf32, #tpu.memory_space<smem>>
      %132 = vector.broadcast %131 : f32 to vector<16x16xf32>
      %133 = arith.mulf %132, %126 : vector<16x16xf32>
      %134 = arith.addf %120, %133 : vector<16x16xf32>
      %c2_88 = arith.constant 2 : index
      %c8_89 = arith.constant 8 : index
      %135 = memref.load %arg6[%c2_88, %c8_89] : memref<15x10xf32, #tpu.memory_space<smem>>
      %136 = vector.broadcast %135 : f32 to vector<16x16xf32>
      %137 = arith.mulf %136, %126 : vector<16x16xf32>
      %138 = arith.addf %124, %137 : vector<16x16xf32>
      %c0_90 = arith.constant 0 : index
      %c9 = arith.constant 9 : index
      %c0_91 = arith.constant 0 : index
      %c0_92 = arith.constant 0 : index
      %139 = vector.load %arg3[%c0_90, %c9, %c0_91, %c0_92] : memref<1x10x16x16xf32, #tpu.memory_space<vmem>>, vector<1x1x16x16xf32>
      %140 = vector.shape_cast %139 : vector<1x1x16x16xf32> to vector<16x16xf32>
      %c0_93 = arith.constant 0 : index
      %c9_94 = arith.constant 9 : index
      %141 = memref.load %arg6[%c0_93, %c9_94] : memref<15x10xf32, #tpu.memory_space<smem>>
      %142 = vector.broadcast %141 : f32 to vector<16x16xf32>
      %143 = arith.mulf %142, %140 : vector<16x16xf32>
      %144 = arith.addf %130, %143 : vector<16x16xf32>
      %c1_95 = arith.constant 1 : index
      %c9_96 = arith.constant 9 : index
      %145 = memref.load %arg6[%c1_95, %c9_96] : memref<15x10xf32, #tpu.memory_space<smem>>
      %146 = vector.broadcast %145 : f32 to vector<16x16xf32>
      %147 = arith.mulf %146, %140 : vector<16x16xf32>
      %148 = arith.addf %134, %147 : vector<16x16xf32>
      %c2_97 = arith.constant 2 : index
      %c9_98 = arith.constant 9 : index
      %149 = memref.load %arg6[%c2_97, %c9_98] : memref<15x10xf32, #tpu.memory_space<smem>>
      %150 = vector.broadcast %149 : f32 to vector<16x16xf32>
      %151 = arith.mulf %150, %140 : vector<16x16xf32>
      %152 = arith.addf %138, %151 : vector<16x16xf32>
      %cst_99 = arith.constant 0.000000e+00 : f32
      %153 = vector.broadcast %cst_99 : f32 to vector<16x16xf32>
      %154 = arith.subf %153, %148 : vector<16x16xf32>
      %155 = arith.subf %14, %152 : vector<16x16xf32>
      %156 = arith.mulf %155, %155 : vector<16x16xf32>
      %157 = arith.mulf %154, %156 : vector<16x16xf32>
      %158 = math.exp %157 : vector<16x16xf32>
      %159 = arith.mulf %144, %158 : vector<16x16xf32>
      %160 = arith.addf %15, %159 : vector<16x16xf32>
      %c0_100 = arith.constant 0 : index
      %c0_101 = arith.constant 0 : index
      %c0_102 = arith.constant 0 : index
      %c0_103 = arith.constant 0 : index
      %161 = vector.load %arg3[%c0_100, %c0_101, %c0_102, %c0_103] : memref<1x10x16x16xf32, #tpu.memory_space<vmem>>, vector<1x1x16x16xf32>
      %162 = vector.shape_cast %161 : vector<1x1x16x16xf32> to vector<16x16xf32>
      %c3_104 = arith.constant 3 : index
      %c0_105 = arith.constant 0 : index
      %163 = memref.load %arg6[%c3_104, %c0_105] : memref<15x10xf32, #tpu.memory_space<smem>>
      %164 = vector.broadcast %163 : f32 to vector<16x16xf32>
      %165 = arith.mulf %164, %162 : vector<16x16xf32>
      %c4_106 = arith.constant 4 : index
      %c0_107 = arith.constant 0 : index
      %166 = memref.load %arg6[%c4_106, %c0_107] : memref<15x10xf32, #tpu.memory_space<smem>>
      %167 = vector.broadcast %166 : f32 to vector<16x16xf32>
      %168 = arith.mulf %167, %162 : vector<16x16xf32>
      %c5_108 = arith.constant 5 : index
      %c0_109 = arith.constant 0 : index
      %169 = memref.load %arg6[%c5_108, %c0_109] : memref<15x10xf32, #tpu.memory_space<smem>>
      %170 = vector.broadcast %169 : f32 to vector<16x16xf32>
      %171 = arith.mulf %170, %162 : vector<16x16xf32>
      %c0_110 = arith.constant 0 : index
      %c1_111 = arith.constant 1 : index
      %c0_112 = arith.constant 0 : index
      %c0_113 = arith.constant 0 : index
      %172 = vector.load %arg3[%c0_110, %c1_111, %c0_112, %c0_113] : memref<1x10x16x16xf32, #tpu.memory_space<vmem>>, vector<1x1x16x16xf32>
      %173 = vector.shape_cast %172 : vector<1x1x16x16xf32> to vector<16x16xf32>
      %c3_114 = arith.constant 3 : index
      %c1_115 = arith.constant 1 : index
      %174 = memref.load %arg6[%c3_114, %c1_115] : memref<15x10xf32, #tpu.memory_space<smem>>
      %175 = vector.broadcast %174 : f32 to vector<16x16xf32>
      %176 = arith.mulf %175, %173 : vector<16x16xf32>
      %177 = arith.addf %165, %176 : vector<16x16xf32>
      %c4_116 = arith.constant 4 : index
      %c1_117 = arith.constant 1 : index
      %178 = memref.load %arg6[%c4_116, %c1_117] : memref<15x10xf32, #tpu.memory_space<smem>>
      %179 = vector.broadcast %178 : f32 to vector<16x16xf32>
      %180 = arith.mulf %179, %173 : vector<16x16xf32>
      %181 = arith.addf %168, %180 : vector<16x16xf32>
      %c5_118 = arith.constant 5 : index
      %c1_119 = arith.constant 1 : index
      %182 = memref.load %arg6[%c5_118, %c1_119] : memref<15x10xf32, #tpu.memory_space<smem>>
      %183 = vector.broadcast %182 : f32 to vector<16x16xf32>
      %184 = arith.mulf %183, %173 : vector<16x16xf32>
      %185 = arith.addf %171, %184 : vector<16x16xf32>
      %c0_120 = arith.constant 0 : index
      %c2_121 = arith.constant 2 : index
      %c0_122 = arith.constant 0 : index
      %c0_123 = arith.constant 0 : index
      %186 = vector.load %arg3[%c0_120, %c2_121, %c0_122, %c0_123] : memref<1x10x16x16xf32, #tpu.memory_space<vmem>>, vector<1x1x16x16xf32>
      %187 = vector.shape_cast %186 : vector<1x1x16x16xf32> to vector<16x16xf32>
      %c3_124 = arith.constant 3 : index
      %c2_125 = arith.constant 2 : index
      %188 = memref.load %arg6[%c3_124, %c2_125] : memref<15x10xf32, #tpu.memory_space<smem>>
      %189 = vector.broadcast %188 : f32 to vector<16x16xf32>
      %190 = arith.mulf %189, %187 : vector<16x16xf32>
      %191 = arith.addf %177, %190 : vector<16x16xf32>
      %c4_126 = arith.constant 4 : index
      %c2_127 = arith.constant 2 : index
      %192 = memref.load %arg6[%c4_126, %c2_127] : memref<15x10xf32, #tpu.memory_space<smem>>
      %193 = vector.broadcast %192 : f32 to vector<16x16xf32>
      %194 = arith.mulf %193, %187 : vector<16x16xf32>
      %195 = arith.addf %181, %194 : vector<16x16xf32>
      %c5_128 = arith.constant 5 : index
      %c2_129 = arith.constant 2 : index
      %196 = memref.load %arg6[%c5_128, %c2_129] : memref<15x10xf32, #tpu.memory_space<smem>>
      %197 = vector.broadcast %196 : f32 to vector<16x16xf32>
      %198 = arith.mulf %197, %187 : vector<16x16xf32>
      %199 = arith.addf %185, %198 : vector<16x16xf32>
      %c0_130 = arith.constant 0 : index
      %c3_131 = arith.constant 3 : index
      %c0_132 = arith.constant 0 : index
      %c0_133 = arith.constant 0 : index
      %200 = vector.load %arg3[%c0_130, %c3_131, %c0_132, %c0_133] : memref<1x10x16x16xf32, #tpu.memory_space<vmem>>, vector<1x1x16x16xf32>
      %201 = vector.shape_cast %200 : vector<1x1x16x16xf32> to vector<16x16xf32>
      %c3_134 = arith.constant 3 : index
      %c3_135 = arith.constant 3 : index
      %202 = memref.load %arg6[%c3_134, %c3_135] : memref<15x10xf32, #tpu.memory_space<smem>>
      %203 = vector.broadcast %202 : f32 to vector<16x16xf32>
      %204 = arith.mulf %203, %201 : vector<16x16xf32>
      %205 = arith.addf %191, %204 : vector<16x16xf32>
      %c4_136 = arith.constant 4 : index
      %c3_137 = arith.constant 3 : index
      %206 = memref.load %arg6[%c4_136, %c3_137] : memref<15x10xf32, #tpu.memory_space<smem>>
      %207 = vector.broadcast %206 : f32 to vector<16x16xf32>
      %208 = arith.mulf %207, %201 : vector<16x16xf32>
      %209 = arith.addf %195, %208 : vector<16x16xf32>
      %c5_138 = arith.constant 5 : index
      %c3_139 = arith.constant 3 : index
      %210 = memref.load %arg6[%c5_138, %c3_139] : memref<15x10xf32, #tpu.memory_space<smem>>
      %211 = vector.broadcast %210 : f32 to vector<16x16xf32>
      %212 = arith.mulf %211, %201 : vector<16x16xf32>
      %213 = arith.addf %199, %212 : vector<16x16xf32>
      %c0_140 = arith.constant 0 : index
      %c4_141 = arith.constant 4 : index
      %c0_142 = arith.constant 0 : index
      %c0_143 = arith.constant 0 : index
      %214 = vector.load %arg3[%c0_140, %c4_141, %c0_142, %c0_143] : memref<1x10x16x16xf32, #tpu.memory_space<vmem>>, vector<1x1x16x16xf32>
      %215 = vector.shape_cast %214 : vector<1x1x16x16xf32> to vector<16x16xf32>
      %c3_144 = arith.constant 3 : index
      %c4_145 = arith.constant 4 : index
      %216 = memref.load %arg6[%c3_144, %c4_145] : memref<15x10xf32, #tpu.memory_space<smem>>
      %217 = vector.broadcast %216 : f32 to vector<16x16xf32>
      %218 = arith.mulf %217, %215 : vector<16x16xf32>
      %219 = arith.addf %205, %218 : vector<16x16xf32>
      %c4_146 = arith.constant 4 : index
      %c4_147 = arith.constant 4 : index
      %220 = memref.load %arg6[%c4_146, %c4_147] : memref<15x10xf32, #tpu.memory_space<smem>>
      %221 = vector.broadcast %220 : f32 to vector<16x16xf32>
      %222 = arith.mulf %221, %215 : vector<16x16xf32>
      %223 = arith.addf %209, %222 : vector<16x16xf32>
      %c5_148 = arith.constant 5 : index
      %c4_149 = arith.constant 4 : index
      %224 = memref.load %arg6[%c5_148, %c4_149] : memref<15x10xf32, #tpu.memory_space<smem>>
      %225 = vector.broadcast %224 : f32 to vector<16x16xf32>
      %226 = arith.mulf %225, %215 : vector<16x16xf32>
      %227 = arith.addf %213, %226 : vector<16x16xf32>
      %c0_150 = arith.constant 0 : index
      %c5_151 = arith.constant 5 : index
      %c0_152 = arith.constant 0 : index
      %c0_153 = arith.constant 0 : index
      %228 = vector.load %arg3[%c0_150, %c5_151, %c0_152, %c0_153] : memref<1x10x16x16xf32, #tpu.memory_space<vmem>>, vector<1x1x16x16xf32>
      %229 = vector.shape_cast %228 : vector<1x1x16x16xf32> to vector<16x16xf32>
      %c3_154 = arith.constant 3 : index
      %c5_155 = arith.constant 5 : index
      %230 = memref.load %arg6[%c3_154, %c5_155] : memref<15x10xf32, #tpu.memory_space<smem>>
      %231 = vector.broadcast %230 : f32 to vector<16x16xf32>
      %232 = arith.mulf %231, %229 : vector<16x16xf32>
      %233 = arith.addf %219, %232 : vector<16x16xf32>
      %c4_156 = arith.constant 4 : index
      %c5_157 = arith.constant 5 : index
      %234 = memref.load %arg6[%c4_156, %c5_157] : memref<15x10xf32, #tpu.memory_space<smem>>
      %235 = vector.broadcast %234 : f32 to vector<16x16xf32>
      %236 = arith.mulf %235, %229 : vector<16x16xf32>
      %237 = arith.addf %223, %236 : vector<16x16xf32>
      %c5_158 = arith.constant 5 : index
      %c5_159 = arith.constant 5 : index
      %238 = memref.load %arg6[%c5_158, %c5_159] : memref<15x10xf32, #tpu.memory_space<smem>>
      %239 = vector.broadcast %238 : f32 to vector<16x16xf32>
      %240 = arith.mulf %239, %229 : vector<16x16xf32>
      %241 = arith.addf %227, %240 : vector<16x16xf32>
      %c0_160 = arith.constant 0 : index
      %c6_161 = arith.constant 6 : index
      %c0_162 = arith.constant 0 : index
      %c0_163 = arith.constant 0 : index
      %242 = vector.load %arg3[%c0_160, %c6_161, %c0_162, %c0_163] : memref<1x10x16x16xf32, #tpu.memory_space<vmem>>, vector<1x1x16x16xf32>
      %243 = vector.shape_cast %242 : vector<1x1x16x16xf32> to vector<16x16xf32>
      %c3_164 = arith.constant 3 : index
      %c6_165 = arith.constant 6 : index
      %244 = memref.load %arg6[%c3_164, %c6_165] : memref<15x10xf32, #tpu.memory_space<smem>>
      %245 = vector.broadcast %244 : f32 to vector<16x16xf32>
      %246 = arith.mulf %245, %243 : vector<16x16xf32>
      %247 = arith.addf %233, %246 : vector<16x16xf32>
      %c4_166 = arith.constant 4 : index
      %c6_167 = arith.constant 6 : index
      %248 = memref.load %arg6[%c4_166, %c6_167] : memref<15x10xf32, #tpu.memory_space<smem>>
      %249 = vector.broadcast %248 : f32 to vector<16x16xf32>
      %250 = arith.mulf %249, %243 : vector<16x16xf32>
      %251 = arith.addf %237, %250 : vector<16x16xf32>
      %c5_168 = arith.constant 5 : index
      %c6_169 = arith.constant 6 : index
      %252 = memref.load %arg6[%c5_168, %c6_169] : memref<15x10xf32, #tpu.memory_space<smem>>
      %253 = vector.broadcast %252 : f32 to vector<16x16xf32>
      %254 = arith.mulf %253, %243 : vector<16x16xf32>
      %255 = arith.addf %241, %254 : vector<16x16xf32>
      %c0_170 = arith.constant 0 : index
      %c7_171 = arith.constant 7 : index
      %c0_172 = arith.constant 0 : index
      %c0_173 = arith.constant 0 : index
      %256 = vector.load %arg3[%c0_170, %c7_171, %c0_172, %c0_173] : memref<1x10x16x16xf32, #tpu.memory_space<vmem>>, vector<1x1x16x16xf32>
      %257 = vector.shape_cast %256 : vector<1x1x16x16xf32> to vector<16x16xf32>
      %c3_174 = arith.constant 3 : index
      %c7_175 = arith.constant 7 : index
      %258 = memref.load %arg6[%c3_174, %c7_175] : memref<15x10xf32, #tpu.memory_space<smem>>
      %259 = vector.broadcast %258 : f32 to vector<16x16xf32>
      %260 = arith.mulf %259, %257 : vector<16x16xf32>
      %261 = arith.addf %247, %260 : vector<16x16xf32>
      %c4_176 = arith.constant 4 : index
      %c7_177 = arith.constant 7 : index
      %262 = memref.load %arg6[%c4_176, %c7_177] : memref<15x10xf32, #tpu.memory_space<smem>>
      %263 = vector.broadcast %262 : f32 to vector<16x16xf32>
      %264 = arith.mulf %263, %257 : vector<16x16xf32>
      %265 = arith.addf %251, %264 : vector<16x16xf32>
      %c5_178 = arith.constant 5 : index
      %c7_179 = arith.constant 7 : index
      %266 = memref.load %arg6[%c5_178, %c7_179] : memref<15x10xf32, #tpu.memory_space<smem>>
      %267 = vector.broadcast %266 : f32 to vector<16x16xf32>
      %268 = arith.mulf %267, %257 : vector<16x16xf32>
      %269 = arith.addf %255, %268 : vector<16x16xf32>
      %c0_180 = arith.constant 0 : index
      %c8_181 = arith.constant 8 : index
      %c0_182 = arith.constant 0 : index
      %c0_183 = arith.constant 0 : index
      %270 = vector.load %arg3[%c0_180, %c8_181, %c0_182, %c0_183] : memref<1x10x16x16xf32, #tpu.memory_space<vmem>>, vector<1x1x16x16xf32>
      %271 = vector.shape_cast %270 : vector<1x1x16x16xf32> to vector<16x16xf32>
      %c3_184 = arith.constant 3 : index
      %c8_185 = arith.constant 8 : index
      %272 = memref.load %arg6[%c3_184, %c8_185] : memref<15x10xf32, #tpu.memory_space<smem>>
      %273 = vector.broadcast %272 : f32 to vector<16x16xf32>
      %274 = arith.mulf %273, %271 : vector<16x16xf32>
      %275 = arith.addf %261, %274 : vector<16x16xf32>
      %c4_186 = arith.constant 4 : index
      %c8_187 = arith.constant 8 : index
      %276 = memref.load %arg6[%c4_186, %c8_187] : memref<15x10xf32, #tpu.memory_space<smem>>
      %277 = vector.broadcast %276 : f32 to vector<16x16xf32>
      %278 = arith.mulf %277, %271 : vector<16x16xf32>
      %279 = arith.addf %265, %278 : vector<16x16xf32>
      %c5_188 = arith.constant 5 : index
      %c8_189 = arith.constant 8 : index
      %280 = memref.load %arg6[%c5_188, %c8_189] : memref<15x10xf32, #tpu.memory_space<smem>>
      %281 = vector.broadcast %280 : f32 to vector<16x16xf32>
      %282 = arith.mulf %281, %271 : vector<16x16xf32>
      %283 = arith.addf %269, %282 : vector<16x16xf32>
      %c0_190 = arith.constant 0 : index
      %c9_191 = arith.constant 9 : index
      %c0_192 = arith.constant 0 : index
      %c0_193 = arith.constant 0 : index
      %284 = vector.load %arg3[%c0_190, %c9_191, %c0_192, %c0_193] : memref<1x10x16x16xf32, #tpu.memory_space<vmem>>, vector<1x1x16x16xf32>
      %285 = vector.shape_cast %284 : vector<1x1x16x16xf32> to vector<16x16xf32>
      %c3_194 = arith.constant 3 : index
      %c9_195 = arith.constant 9 : index
      %286 = memref.load %arg6[%c3_194, %c9_195] : memref<15x10xf32, #tpu.memory_space<smem>>
      %287 = vector.broadcast %286 : f32 to vector<16x16xf32>
      %288 = arith.mulf %287, %285 : vector<16x16xf32>
      %289 = arith.addf %275, %288 : vector<16x16xf32>
      %c4_196 = arith.constant 4 : index
      %c9_197 = arith.constant 9 : index
      %290 = memref.load %arg6[%c4_196, %c9_197] : memref<15x10xf32, #tpu.memory_space<smem>>
      %291 = vector.broadcast %290 : f32 to vector<16x16xf32>
      %292 = arith.mulf %291, %285 : vector<16x16xf32>
      %293 = arith.addf %279, %292 : vector<16x16xf32>
      %c5_198 = arith.constant 5 : index
      %c9_199 = arith.constant 9 : index
      %294 = memref.load %arg6[%c5_198, %c9_199] : memref<15x10xf32, #tpu.memory_space<smem>>
      %295 = vector.broadcast %294 : f32 to vector<16x16xf32>
      %296 = arith.mulf %295, %285 : vector<16x16xf32>
      %297 = arith.addf %283, %296 : vector<16x16xf32>
      %cst_200 = arith.constant 0.000000e+00 : f32
      %298 = vector.broadcast %cst_200 : f32 to vector<16x16xf32>
      %299 = arith.subf %298, %293 : vector<16x16xf32>
      %300 = arith.subf %14, %297 : vector<16x16xf32>
      %301 = arith.mulf %300, %300 : vector<16x16xf32>
      %302 = arith.mulf %299, %301 : vector<16x16xf32>
      %303 = math.exp %302 : vector<16x16xf32>
      %304 = arith.mulf %289, %303 : vector<16x16xf32>
      %305 = arith.addf %160, %304 : vector<16x16xf32>
      %c0_201 = arith.constant 0 : index
      %c0_202 = arith.constant 0 : index
      %c0_203 = arith.constant 0 : index
      %c0_204 = arith.constant 0 : index
      %306 = vector.load %arg3[%c0_201, %c0_202, %c0_203, %c0_204] : memref<1x10x16x16xf32, #tpu.memory_space<vmem>>, vector<1x1x16x16xf32>
      %307 = vector.shape_cast %306 : vector<1x1x16x16xf32> to vector<16x16xf32>
      %c6_205 = arith.constant 6 : index
      %c0_206 = arith.constant 0 : index
      %308 = memref.load %arg6[%c6_205, %c0_206] : memref<15x10xf32, #tpu.memory_space<smem>>
      %309 = vector.broadcast %308 : f32 to vector<16x16xf32>
      %310 = arith.mulf %309, %307 : vector<16x16xf32>
      %c7_207 = arith.constant 7 : index
      %c0_208 = arith.constant 0 : index
      %311 = memref.load %arg6[%c7_207, %c0_208] : memref<15x10xf32, #tpu.memory_space<smem>>
      %312 = vector.broadcast %311 : f32 to vector<16x16xf32>
      %313 = arith.mulf %312, %307 : vector<16x16xf32>
      %c8_209 = arith.constant 8 : index
      %c0_210 = arith.constant 0 : index
      %314 = memref.load %arg6[%c8_209, %c0_210] : memref<15x10xf32, #tpu.memory_space<smem>>
      %315 = vector.broadcast %314 : f32 to vector<16x16xf32>
      %316 = arith.mulf %315, %307 : vector<16x16xf32>
      %c0_211 = arith.constant 0 : index
      %c1_212 = arith.constant 1 : index
      %c0_213 = arith.constant 0 : index
      %c0_214 = arith.constant 0 : index
      %317 = vector.load %arg3[%c0_211, %c1_212, %c0_213, %c0_214] : memref<1x10x16x16xf32, #tpu.memory_space<vmem>>, vector<1x1x16x16xf32>
      %318 = vector.shape_cast %317 : vector<1x1x16x16xf32> to vector<16x16xf32>
      %c6_215 = arith.constant 6 : index
      %c1_216 = arith.constant 1 : index
      %319 = memref.load %arg6[%c6_215, %c1_216] : memref<15x10xf32, #tpu.memory_space<smem>>
      %320 = vector.broadcast %319 : f32 to vector<16x16xf32>
      %321 = arith.mulf %320, %318 : vector<16x16xf32>
      %322 = arith.addf %310, %321 : vector<16x16xf32>
      %c7_217 = arith.constant 7 : index
      %c1_218 = arith.constant 1 : index
      %323 = memref.load %arg6[%c7_217, %c1_218] : memref<15x10xf32, #tpu.memory_space<smem>>
      %324 = vector.broadcast %323 : f32 to vector<16x16xf32>
      %325 = arith.mulf %324, %318 : vector<16x16xf32>
      %326 = arith.addf %313, %325 : vector<16x16xf32>
      %c8_219 = arith.constant 8 : index
      %c1_220 = arith.constant 1 : index
      %327 = memref.load %arg6[%c8_219, %c1_220] : memref<15x10xf32, #tpu.memory_space<smem>>
      %328 = vector.broadcast %327 : f32 to vector<16x16xf32>
      %329 = arith.mulf %328, %318 : vector<16x16xf32>
      %330 = arith.addf %316, %329 : vector<16x16xf32>
      %c0_221 = arith.constant 0 : index
      %c2_222 = arith.constant 2 : index
      %c0_223 = arith.constant 0 : index
      %c0_224 = arith.constant 0 : index
      %331 = vector.load %arg3[%c0_221, %c2_222, %c0_223, %c0_224] : memref<1x10x16x16xf32, #tpu.memory_space<vmem>>, vector<1x1x16x16xf32>
      %332 = vector.shape_cast %331 : vector<1x1x16x16xf32> to vector<16x16xf32>
      %c6_225 = arith.constant 6 : index
      %c2_226 = arith.constant 2 : index
      %333 = memref.load %arg6[%c6_225, %c2_226] : memref<15x10xf32, #tpu.memory_space<smem>>
      %334 = vector.broadcast %333 : f32 to vector<16x16xf32>
      %335 = arith.mulf %334, %332 : vector<16x16xf32>
      %336 = arith.addf %322, %335 : vector<16x16xf32>
      %c7_227 = arith.constant 7 : index
      %c2_228 = arith.constant 2 : index
      %337 = memref.load %arg6[%c7_227, %c2_228] : memref<15x10xf32, #tpu.memory_space<smem>>
      %338 = vector.broadcast %337 : f32 to vector<16x16xf32>
      %339 = arith.mulf %338, %332 : vector<16x16xf32>
      %340 = arith.addf %326, %339 : vector<16x16xf32>
      %c8_229 = arith.constant 8 : index
      %c2_230 = arith.constant 2 : index
      %341 = memref.load %arg6[%c8_229, %c2_230] : memref<15x10xf32, #tpu.memory_space<smem>>
      %342 = vector.broadcast %341 : f32 to vector<16x16xf32>
      %343 = arith.mulf %342, %332 : vector<16x16xf32>
      %344 = arith.addf %330, %343 : vector<16x16xf32>
      %c0_231 = arith.constant 0 : index
      %c3_232 = arith.constant 3 : index
      %c0_233 = arith.constant 0 : index
      %c0_234 = arith.constant 0 : index
      %345 = vector.load %arg3[%c0_231, %c3_232, %c0_233, %c0_234] : memref<1x10x16x16xf32, #tpu.memory_space<vmem>>, vector<1x1x16x16xf32>
      %346 = vector.shape_cast %345 : vector<1x1x16x16xf32> to vector<16x16xf32>
      %c6_235 = arith.constant 6 : index
      %c3_236 = arith.constant 3 : index
      %347 = memref.load %arg6[%c6_235, %c3_236] : memref<15x10xf32, #tpu.memory_space<smem>>
      %348 = vector.broadcast %347 : f32 to vector<16x16xf32>
      %349 = arith.mulf %348, %346 : vector<16x16xf32>
      %350 = arith.addf %336, %349 : vector<16x16xf32>
      %c7_237 = arith.constant 7 : index
      %c3_238 = arith.constant 3 : index
      %351 = memref.load %arg6[%c7_237, %c3_238] : memref<15x10xf32, #tpu.memory_space<smem>>
      %352 = vector.broadcast %351 : f32 to vector<16x16xf32>
      %353 = arith.mulf %352, %346 : vector<16x16xf32>
      %354 = arith.addf %340, %353 : vector<16x16xf32>
      %c8_239 = arith.constant 8 : index
      %c3_240 = arith.constant 3 : index
      %355 = memref.load %arg6[%c8_239, %c3_240] : memref<15x10xf32, #tpu.memory_space<smem>>
      %356 = vector.broadcast %355 : f32 to vector<16x16xf32>
      %357 = arith.mulf %356, %346 : vector<16x16xf32>
      %358 = arith.addf %344, %357 : vector<16x16xf32>
      %c0_241 = arith.constant 0 : index
      %c4_242 = arith.constant 4 : index
      %c0_243 = arith.constant 0 : index
      %c0_244 = arith.constant 0 : index
      %359 = vector.load %arg3[%c0_241, %c4_242, %c0_243, %c0_244] : memref<1x10x16x16xf32, #tpu.memory_space<vmem>>, vector<1x1x16x16xf32>
      %360 = vector.shape_cast %359 : vector<1x1x16x16xf32> to vector<16x16xf32>
      %c6_245 = arith.constant 6 : index
      %c4_246 = arith.constant 4 : index
      %361 = memref.load %arg6[%c6_245, %c4_246] : memref<15x10xf32, #tpu.memory_space<smem>>
      %362 = vector.broadcast %361 : f32 to vector<16x16xf32>
      %363 = arith.mulf %362, %360 : vector<16x16xf32>
      %364 = arith.addf %350, %363 : vector<16x16xf32>
      %c7_247 = arith.constant 7 : index
      %c4_248 = arith.constant 4 : index
      %365 = memref.load %arg6[%c7_247, %c4_248] : memref<15x10xf32, #tpu.memory_space<smem>>
      %366 = vector.broadcast %365 : f32 to vector<16x16xf32>
      %367 = arith.mulf %366, %360 : vector<16x16xf32>
      %368 = arith.addf %354, %367 : vector<16x16xf32>
      %c8_249 = arith.constant 8 : index
      %c4_250 = arith.constant 4 : index
      %369 = memref.load %arg6[%c8_249, %c4_250] : memref<15x10xf32, #tpu.memory_space<smem>>
      %370 = vector.broadcast %369 : f32 to vector<16x16xf32>
      %371 = arith.mulf %370, %360 : vector<16x16xf32>
      %372 = arith.addf %358, %371 : vector<16x16xf32>
      %c0_251 = arith.constant 0 : index
      %c5_252 = arith.constant 5 : index
      %c0_253 = arith.constant 0 : index
      %c0_254 = arith.constant 0 : index
      %373 = vector.load %arg3[%c0_251, %c5_252, %c0_253, %c0_254] : memref<1x10x16x16xf32, #tpu.memory_space<vmem>>, vector<1x1x16x16xf32>
      %374 = vector.shape_cast %373 : vector<1x1x16x16xf32> to vector<16x16xf32>
      %c6_255 = arith.constant 6 : index
      %c5_256 = arith.constant 5 : index
      %375 = memref.load %arg6[%c6_255, %c5_256] : memref<15x10xf32, #tpu.memory_space<smem>>
      %376 = vector.broadcast %375 : f32 to vector<16x16xf32>
      %377 = arith.mulf %376, %374 : vector<16x16xf32>
      %378 = arith.addf %364, %377 : vector<16x16xf32>
      %c7_257 = arith.constant 7 : index
      %c5_258 = arith.constant 5 : index
      %379 = memref.load %arg6[%c7_257, %c5_258] : memref<15x10xf32, #tpu.memory_space<smem>>
      %380 = vector.broadcast %379 : f32 to vector<16x16xf32>
      %381 = arith.mulf %380, %374 : vector<16x16xf32>
      %382 = arith.addf %368, %381 : vector<16x16xf32>
      %c8_259 = arith.constant 8 : index
      %c5_260 = arith.constant 5 : index
      %383 = memref.load %arg6[%c8_259, %c5_260] : memref<15x10xf32, #tpu.memory_space<smem>>
      %384 = vector.broadcast %383 : f32 to vector<16x16xf32>
      %385 = arith.mulf %384, %374 : vector<16x16xf32>
      %386 = arith.addf %372, %385 : vector<16x16xf32>
      %c0_261 = arith.constant 0 : index
      %c6_262 = arith.constant 6 : index
      %c0_263 = arith.constant 0 : index
      %c0_264 = arith.constant 0 : index
      %387 = vector.load %arg3[%c0_261, %c6_262, %c0_263, %c0_264] : memref<1x10x16x16xf32, #tpu.memory_space<vmem>>, vector<1x1x16x16xf32>
      %388 = vector.shape_cast %387 : vector<1x1x16x16xf32> to vector<16x16xf32>
      %c6_265 = arith.constant 6 : index
      %c6_266 = arith.constant 6 : index
      %389 = memref.load %arg6[%c6_265, %c6_266] : memref<15x10xf32, #tpu.memory_space<smem>>
      %390 = vector.broadcast %389 : f32 to vector<16x16xf32>
      %391 = arith.mulf %390, %388 : vector<16x16xf32>
      %392 = arith.addf %378, %391 : vector<16x16xf32>
      %c7_267 = arith.constant 7 : index
      %c6_268 = arith.constant 6 : index
      %393 = memref.load %arg6[%c7_267, %c6_268] : memref<15x10xf32, #tpu.memory_space<smem>>
      %394 = vector.broadcast %393 : f32 to vector<16x16xf32>
      %395 = arith.mulf %394, %388 : vector<16x16xf32>
      %396 = arith.addf %382, %395 : vector<16x16xf32>
      %c8_269 = arith.constant 8 : index
      %c6_270 = arith.constant 6 : index
      %397 = memref.load %arg6[%c8_269, %c6_270] : memref<15x10xf32, #tpu.memory_space<smem>>
      %398 = vector.broadcast %397 : f32 to vector<16x16xf32>
      %399 = arith.mulf %398, %388 : vector<16x16xf32>
      %400 = arith.addf %386, %399 : vector<16x16xf32>
      %c0_271 = arith.constant 0 : index
      %c7_272 = arith.constant 7 : index
      %c0_273 = arith.constant 0 : index
      %c0_274 = arith.constant 0 : index
      %401 = vector.load %arg3[%c0_271, %c7_272, %c0_273, %c0_274] : memref<1x10x16x16xf32, #tpu.memory_space<vmem>>, vector<1x1x16x16xf32>
      %402 = vector.shape_cast %401 : vector<1x1x16x16xf32> to vector<16x16xf32>
      %c6_275 = arith.constant 6 : index
      %c7_276 = arith.constant 7 : index
      %403 = memref.load %arg6[%c6_275, %c7_276] : memref<15x10xf32, #tpu.memory_space<smem>>
      %404 = vector.broadcast %403 : f32 to vector<16x16xf32>
      %405 = arith.mulf %404, %402 : vector<16x16xf32>
      %406 = arith.addf %392, %405 : vector<16x16xf32>
      %c7_277 = arith.constant 7 : index
      %c7_278 = arith.constant 7 : index
      %407 = memref.load %arg6[%c7_277, %c7_278] : memref<15x10xf32, #tpu.memory_space<smem>>
      %408 = vector.broadcast %407 : f32 to vector<16x16xf32>
      %409 = arith.mulf %408, %402 : vector<16x16xf32>
      %410 = arith.addf %396, %409 : vector<16x16xf32>
      %c8_279 = arith.constant 8 : index
      %c7_280 = arith.constant 7 : index
      %411 = memref.load %arg6[%c8_279, %c7_280] : memref<15x10xf32, #tpu.memory_space<smem>>
      %412 = vector.broadcast %411 : f32 to vector<16x16xf32>
      %413 = arith.mulf %412, %402 : vector<16x16xf32>
      %414 = arith.addf %400, %413 : vector<16x16xf32>
      %c0_281 = arith.constant 0 : index
      %c8_282 = arith.constant 8 : index
      %c0_283 = arith.constant 0 : index
      %c0_284 = arith.constant 0 : index
      %415 = vector.load %arg3[%c0_281, %c8_282, %c0_283, %c0_284] : memref<1x10x16x16xf32, #tpu.memory_space<vmem>>, vector<1x1x16x16xf32>
      %416 = vector.shape_cast %415 : vector<1x1x16x16xf32> to vector<16x16xf32>
      %c6_285 = arith.constant 6 : index
      %c8_286 = arith.constant 8 : index
      %417 = memref.load %arg6[%c6_285, %c8_286] : memref<15x10xf32, #tpu.memory_space<smem>>
      %418 = vector.broadcast %417 : f32 to vector<16x16xf32>
      %419 = arith.mulf %418, %416 : vector<16x16xf32>
      %420 = arith.addf %406, %419 : vector<16x16xf32>
      %c7_287 = arith.constant 7 : index
      %c8_288 = arith.constant 8 : index
      %421 = memref.load %arg6[%c7_287, %c8_288] : memref<15x10xf32, #tpu.memory_space<smem>>
      %422 = vector.broadcast %421 : f32 to vector<16x16xf32>
      %423 = arith.mulf %422, %416 : vector<16x16xf32>
      %424 = arith.addf %410, %423 : vector<16x16xf32>
      %c8_289 = arith.constant 8 : index
      %c8_290 = arith.constant 8 : index
      %425 = memref.load %arg6[%c8_289, %c8_290] : memref<15x10xf32, #tpu.memory_space<smem>>
      %426 = vector.broadcast %425 : f32 to vector<16x16xf32>
      %427 = arith.mulf %426, %416 : vector<16x16xf32>
      %428 = arith.addf %414, %427 : vector<16x16xf32>
      %c0_291 = arith.constant 0 : index
      %c9_292 = arith.constant 9 : index
      %c0_293 = arith.constant 0 : index
      %c0_294 = arith.constant 0 : index
      %429 = vector.load %arg3[%c0_291, %c9_292, %c0_293, %c0_294] : memref<1x10x16x16xf32, #tpu.memory_space<vmem>>, vector<1x1x16x16xf32>
      %430 = vector.shape_cast %429 : vector<1x1x16x16xf32> to vector<16x16xf32>
      %c6_295 = arith.constant 6 : index
      %c9_296 = arith.constant 9 : index
      %431 = memref.load %arg6[%c6_295, %c9_296] : memref<15x10xf32, #tpu.memory_space<smem>>
      %432 = vector.broadcast %431 : f32 to vector<16x16xf32>
      %433 = arith.mulf %432, %430 : vector<16x16xf32>
      %434 = arith.addf %420, %433 : vector<16x16xf32>
      %c7_297 = arith.constant 7 : index
      %c9_298 = arith.constant 9 : index
      %435 = memref.load %arg6[%c7_297, %c9_298] : memref<15x10xf32, #tpu.memory_space<smem>>
      %436 = vector.broadcast %435 : f32 to vector<16x16xf32>
      %437 = arith.mulf %436, %430 : vector<16x16xf32>
      %438 = arith.addf %424, %437 : vector<16x16xf32>
      %c8_299 = arith.constant 8 : index
      %c9_300 = arith.constant 9 : index
      %439 = memref.load %arg6[%c8_299, %c9_300] : memref<15x10xf32, #tpu.memory_space<smem>>
      %440 = vector.broadcast %439 : f32 to vector<16x16xf32>
      %441 = arith.mulf %440, %430 : vector<16x16xf32>
      %442 = arith.addf %428, %441 : vector<16x16xf32>
      %cst_301 = arith.constant 0.000000e+00 : f32
      %443 = vector.broadcast %cst_301 : f32 to vector<16x16xf32>
      %444 = arith.subf %443, %438 : vector<16x16xf32>
      %445 = arith.subf %14, %442 : vector<16x16xf32>
      %446 = arith.mulf %445, %445 : vector<16x16xf32>
      %447 = arith.mulf %444, %446 : vector<16x16xf32>
      %448 = math.exp %447 : vector<16x16xf32>
      %449 = arith.mulf %434, %448 : vector<16x16xf32>
      %450 = arith.addf %305, %449 : vector<16x16xf32>
      %c0_302 = arith.constant 0 : index
      %c0_303 = arith.constant 0 : index
      %c0_304 = arith.constant 0 : index
      %c0_305 = arith.constant 0 : index
      %451 = vector.load %arg3[%c0_302, %c0_303, %c0_304, %c0_305] : memref<1x10x16x16xf32, #tpu.memory_space<vmem>>, vector<1x1x16x16xf32>
      %452 = vector.shape_cast %451 : vector<1x1x16x16xf32> to vector<16x16xf32>
      %c9_306 = arith.constant 9 : index
      %c0_307 = arith.constant 0 : index
      %453 = memref.load %arg6[%c9_306, %c0_307] : memref<15x10xf32, #tpu.memory_space<smem>>
      %454 = vector.broadcast %453 : f32 to vector<16x16xf32>
      %455 = arith.mulf %454, %452 : vector<16x16xf32>
      %c10 = arith.constant 10 : index
      %c0_308 = arith.constant 0 : index
      %456 = memref.load %arg6[%c10, %c0_308] : memref<15x10xf32, #tpu.memory_space<smem>>
      %457 = vector.broadcast %456 : f32 to vector<16x16xf32>
      %458 = arith.mulf %457, %452 : vector<16x16xf32>
      %c11 = arith.constant 11 : index
      %c0_309 = arith.constant 0 : index
      %459 = memref.load %arg6[%c11, %c0_309] : memref<15x10xf32, #tpu.memory_space<smem>>
      %460 = vector.broadcast %459 : f32 to vector<16x16xf32>
      %461 = arith.mulf %460, %452 : vector<16x16xf32>
      %c0_310 = arith.constant 0 : index
      %c1_311 = arith.constant 1 : index
      %c0_312 = arith.constant 0 : index
      %c0_313 = arith.constant 0 : index
      %462 = vector.load %arg3[%c0_310, %c1_311, %c0_312, %c0_313] : memref<1x10x16x16xf32, #tpu.memory_space<vmem>>, vector<1x1x16x16xf32>
      %463 = vector.shape_cast %462 : vector<1x1x16x16xf32> to vector<16x16xf32>
      %c9_314 = arith.constant 9 : index
      %c1_315 = arith.constant 1 : index
      %464 = memref.load %arg6[%c9_314, %c1_315] : memref<15x10xf32, #tpu.memory_space<smem>>
      %465 = vector.broadcast %464 : f32 to vector<16x16xf32>
      %466 = arith.mulf %465, %463 : vector<16x16xf32>
      %467 = arith.addf %455, %466 : vector<16x16xf32>
      %c10_316 = arith.constant 10 : index
      %c1_317 = arith.constant 1 : index
      %468 = memref.load %arg6[%c10_316, %c1_317] : memref<15x10xf32, #tpu.memory_space<smem>>
      %469 = vector.broadcast %468 : f32 to vector<16x16xf32>
      %470 = arith.mulf %469, %463 : vector<16x16xf32>
      %471 = arith.addf %458, %470 : vector<16x16xf32>
      %c11_318 = arith.constant 11 : index
      %c1_319 = arith.constant 1 : index
      %472 = memref.load %arg6[%c11_318, %c1_319] : memref<15x10xf32, #tpu.memory_space<smem>>
      %473 = vector.broadcast %472 : f32 to vector<16x16xf32>
      %474 = arith.mulf %473, %463 : vector<16x16xf32>
      %475 = arith.addf %461, %474 : vector<16x16xf32>
      %c0_320 = arith.constant 0 : index
      %c2_321 = arith.constant 2 : index
      %c0_322 = arith.constant 0 : index
      %c0_323 = arith.constant 0 : index
      %476 = vector.load %arg3[%c0_320, %c2_321, %c0_322, %c0_323] : memref<1x10x16x16xf32, #tpu.memory_space<vmem>>, vector<1x1x16x16xf32>
      %477 = vector.shape_cast %476 : vector<1x1x16x16xf32> to vector<16x16xf32>
      %c9_324 = arith.constant 9 : index
      %c2_325 = arith.constant 2 : index
      %478 = memref.load %arg6[%c9_324, %c2_325] : memref<15x10xf32, #tpu.memory_space<smem>>
      %479 = vector.broadcast %478 : f32 to vector<16x16xf32>
      %480 = arith.mulf %479, %477 : vector<16x16xf32>
      %481 = arith.addf %467, %480 : vector<16x16xf32>
      %c10_326 = arith.constant 10 : index
      %c2_327 = arith.constant 2 : index
      %482 = memref.load %arg6[%c10_326, %c2_327] : memref<15x10xf32, #tpu.memory_space<smem>>
      %483 = vector.broadcast %482 : f32 to vector<16x16xf32>
      %484 = arith.mulf %483, %477 : vector<16x16xf32>
      %485 = arith.addf %471, %484 : vector<16x16xf32>
      %c11_328 = arith.constant 11 : index
      %c2_329 = arith.constant 2 : index
      %486 = memref.load %arg6[%c11_328, %c2_329] : memref<15x10xf32, #tpu.memory_space<smem>>
      %487 = vector.broadcast %486 : f32 to vector<16x16xf32>
      %488 = arith.mulf %487, %477 : vector<16x16xf32>
      %489 = arith.addf %475, %488 : vector<16x16xf32>
      %c0_330 = arith.constant 0 : index
      %c3_331 = arith.constant 3 : index
      %c0_332 = arith.constant 0 : index
      %c0_333 = arith.constant 0 : index
      %490 = vector.load %arg3[%c0_330, %c3_331, %c0_332, %c0_333] : memref<1x10x16x16xf32, #tpu.memory_space<vmem>>, vector<1x1x16x16xf32>
      %491 = vector.shape_cast %490 : vector<1x1x16x16xf32> to vector<16x16xf32>
      %c9_334 = arith.constant 9 : index
      %c3_335 = arith.constant 3 : index
      %492 = memref.load %arg6[%c9_334, %c3_335] : memref<15x10xf32, #tpu.memory_space<smem>>
      %493 = vector.broadcast %492 : f32 to vector<16x16xf32>
      %494 = arith.mulf %493, %491 : vector<16x16xf32>
      %495 = arith.addf %481, %494 : vector<16x16xf32>
      %c10_336 = arith.constant 10 : index
      %c3_337 = arith.constant 3 : index
      %496 = memref.load %arg6[%c10_336, %c3_337] : memref<15x10xf32, #tpu.memory_space<smem>>
      %497 = vector.broadcast %496 : f32 to vector<16x16xf32>
      %498 = arith.mulf %497, %491 : vector<16x16xf32>
      %499 = arith.addf %485, %498 : vector<16x16xf32>
      %c11_338 = arith.constant 11 : index
      %c3_339 = arith.constant 3 : index
      %500 = memref.load %arg6[%c11_338, %c3_339] : memref<15x10xf32, #tpu.memory_space<smem>>
      %501 = vector.broadcast %500 : f32 to vector<16x16xf32>
      %502 = arith.mulf %501, %491 : vector<16x16xf32>
      %503 = arith.addf %489, %502 : vector<16x16xf32>
      %c0_340 = arith.constant 0 : index
      %c4_341 = arith.constant 4 : index
      %c0_342 = arith.constant 0 : index
      %c0_343 = arith.constant 0 : index
      %504 = vector.load %arg3[%c0_340, %c4_341, %c0_342, %c0_343] : memref<1x10x16x16xf32, #tpu.memory_space<vmem>>, vector<1x1x16x16xf32>
      %505 = vector.shape_cast %504 : vector<1x1x16x16xf32> to vector<16x16xf32>
      %c9_344 = arith.constant 9 : index
      %c4_345 = arith.constant 4 : index
      %506 = memref.load %arg6[%c9_344, %c4_345] : memref<15x10xf32, #tpu.memory_space<smem>>
      %507 = vector.broadcast %506 : f32 to vector<16x16xf32>
      %508 = arith.mulf %507, %505 : vector<16x16xf32>
      %509 = arith.addf %495, %508 : vector<16x16xf32>
      %c10_346 = arith.constant 10 : index
      %c4_347 = arith.constant 4 : index
      %510 = memref.load %arg6[%c10_346, %c4_347] : memref<15x10xf32, #tpu.memory_space<smem>>
      %511 = vector.broadcast %510 : f32 to vector<16x16xf32>
      %512 = arith.mulf %511, %505 : vector<16x16xf32>
      %513 = arith.addf %499, %512 : vector<16x16xf32>
      %c11_348 = arith.constant 11 : index
      %c4_349 = arith.constant 4 : index
      %514 = memref.load %arg6[%c11_348, %c4_349] : memref<15x10xf32, #tpu.memory_space<smem>>
      %515 = vector.broadcast %514 : f32 to vector<16x16xf32>
      %516 = arith.mulf %515, %505 : vector<16x16xf32>
      %517 = arith.addf %503, %516 : vector<16x16xf32>
      %c0_350 = arith.constant 0 : index
      %c5_351 = arith.constant 5 : index
      %c0_352 = arith.constant 0 : index
      %c0_353 = arith.constant 0 : index
      %518 = vector.load %arg3[%c0_350, %c5_351, %c0_352, %c0_353] : memref<1x10x16x16xf32, #tpu.memory_space<vmem>>, vector<1x1x16x16xf32>
      %519 = vector.shape_cast %518 : vector<1x1x16x16xf32> to vector<16x16xf32>
      %c9_354 = arith.constant 9 : index
      %c5_355 = arith.constant 5 : index
      %520 = memref.load %arg6[%c9_354, %c5_355] : memref<15x10xf32, #tpu.memory_space<smem>>
      %521 = vector.broadcast %520 : f32 to vector<16x16xf32>
      %522 = arith.mulf %521, %519 : vector<16x16xf32>
      %523 = arith.addf %509, %522 : vector<16x16xf32>
      %c10_356 = arith.constant 10 : index
      %c5_357 = arith.constant 5 : index
      %524 = memref.load %arg6[%c10_356, %c5_357] : memref<15x10xf32, #tpu.memory_space<smem>>
      %525 = vector.broadcast %524 : f32 to vector<16x16xf32>
      %526 = arith.mulf %525, %519 : vector<16x16xf32>
      %527 = arith.addf %513, %526 : vector<16x16xf32>
      %c11_358 = arith.constant 11 : index
      %c5_359 = arith.constant 5 : index
      %528 = memref.load %arg6[%c11_358, %c5_359] : memref<15x10xf32, #tpu.memory_space<smem>>
      %529 = vector.broadcast %528 : f32 to vector<16x16xf32>
      %530 = arith.mulf %529, %519 : vector<16x16xf32>
      %531 = arith.addf %517, %530 : vector<16x16xf32>
      %c0_360 = arith.constant 0 : index
      %c6_361 = arith.constant 6 : index
      %c0_362 = arith.constant 0 : index
      %c0_363 = arith.constant 0 : index
      %532 = vector.load %arg3[%c0_360, %c6_361, %c0_362, %c0_363] : memref<1x10x16x16xf32, #tpu.memory_space<vmem>>, vector<1x1x16x16xf32>
      %533 = vector.shape_cast %532 : vector<1x1x16x16xf32> to vector<16x16xf32>
      %c9_364 = arith.constant 9 : index
      %c6_365 = arith.constant 6 : index
      %534 = memref.load %arg6[%c9_364, %c6_365] : memref<15x10xf32, #tpu.memory_space<smem>>
      %535 = vector.broadcast %534 : f32 to vector<16x16xf32>
      %536 = arith.mulf %535, %533 : vector<16x16xf32>
      %537 = arith.addf %523, %536 : vector<16x16xf32>
      %c10_366 = arith.constant 10 : index
      %c6_367 = arith.constant 6 : index
      %538 = memref.load %arg6[%c10_366, %c6_367] : memref<15x10xf32, #tpu.memory_space<smem>>
      %539 = vector.broadcast %538 : f32 to vector<16x16xf32>
      %540 = arith.mulf %539, %533 : vector<16x16xf32>
      %541 = arith.addf %527, %540 : vector<16x16xf32>
      %c11_368 = arith.constant 11 : index
      %c6_369 = arith.constant 6 : index
      %542 = memref.load %arg6[%c11_368, %c6_369] : memref<15x10xf32, #tpu.memory_space<smem>>
      %543 = vector.broadcast %542 : f32 to vector<16x16xf32>
      %544 = arith.mulf %543, %533 : vector<16x16xf32>
      %545 = arith.addf %531, %544 : vector<16x16xf32>
      %c0_370 = arith.constant 0 : index
      %c7_371 = arith.constant 7 : index
      %c0_372 = arith.constant 0 : index
      %c0_373 = arith.constant 0 : index
      %546 = vector.load %arg3[%c0_370, %c7_371, %c0_372, %c0_373] : memref<1x10x16x16xf32, #tpu.memory_space<vmem>>, vector<1x1x16x16xf32>
      %547 = vector.shape_cast %546 : vector<1x1x16x16xf32> to vector<16x16xf32>
      %c9_374 = arith.constant 9 : index
      %c7_375 = arith.constant 7 : index
      %548 = memref.load %arg6[%c9_374, %c7_375] : memref<15x10xf32, #tpu.memory_space<smem>>
      %549 = vector.broadcast %548 : f32 to vector<16x16xf32>
      %550 = arith.mulf %549, %547 : vector<16x16xf32>
      %551 = arith.addf %537, %550 : vector<16x16xf32>
      %c10_376 = arith.constant 10 : index
      %c7_377 = arith.constant 7 : index
      %552 = memref.load %arg6[%c10_376, %c7_377] : memref<15x10xf32, #tpu.memory_space<smem>>
      %553 = vector.broadcast %552 : f32 to vector<16x16xf32>
      %554 = arith.mulf %553, %547 : vector<16x16xf32>
      %555 = arith.addf %541, %554 : vector<16x16xf32>
      %c11_378 = arith.constant 11 : index
      %c7_379 = arith.constant 7 : index
      %556 = memref.load %arg6[%c11_378, %c7_379] : memref<15x10xf32, #tpu.memory_space<smem>>
      %557 = vector.broadcast %556 : f32 to vector<16x16xf32>
      %558 = arith.mulf %557, %547 : vector<16x16xf32>
      %559 = arith.addf %545, %558 : vector<16x16xf32>
      %c0_380 = arith.constant 0 : index
      %c8_381 = arith.constant 8 : index
      %c0_382 = arith.constant 0 : index
      %c0_383 = arith.constant 0 : index
      %560 = vector.load %arg3[%c0_380, %c8_381, %c0_382, %c0_383] : memref<1x10x16x16xf32, #tpu.memory_space<vmem>>, vector<1x1x16x16xf32>
      %561 = vector.shape_cast %560 : vector<1x1x16x16xf32> to vector<16x16xf32>
      %c9_384 = arith.constant 9 : index
      %c8_385 = arith.constant 8 : index
      %562 = memref.load %arg6[%c9_384, %c8_385] : memref<15x10xf32, #tpu.memory_space<smem>>
      %563 = vector.broadcast %562 : f32 to vector<16x16xf32>
      %564 = arith.mulf %563, %561 : vector<16x16xf32>
      %565 = arith.addf %551, %564 : vector<16x16xf32>
      %c10_386 = arith.constant 10 : index
      %c8_387 = arith.constant 8 : index
      %566 = memref.load %arg6[%c10_386, %c8_387] : memref<15x10xf32, #tpu.memory_space<smem>>
      %567 = vector.broadcast %566 : f32 to vector<16x16xf32>
      %568 = arith.mulf %567, %561 : vector<16x16xf32>
      %569 = arith.addf %555, %568 : vector<16x16xf32>
      %c11_388 = arith.constant 11 : index
      %c8_389 = arith.constant 8 : index
      %570 = memref.load %arg6[%c11_388, %c8_389] : memref<15x10xf32, #tpu.memory_space<smem>>
      %571 = vector.broadcast %570 : f32 to vector<16x16xf32>
      %572 = arith.mulf %571, %561 : vector<16x16xf32>
      %573 = arith.addf %559, %572 : vector<16x16xf32>
      %c0_390 = arith.constant 0 : index
      %c9_391 = arith.constant 9 : index
      %c0_392 = arith.constant 0 : index
      %c0_393 = arith.constant 0 : index
      %574 = vector.load %arg3[%c0_390, %c9_391, %c0_392, %c0_393] : memref<1x10x16x16xf32, #tpu.memory_space<vmem>>, vector<1x1x16x16xf32>
      %575 = vector.shape_cast %574 : vector<1x1x16x16xf32> to vector<16x16xf32>
      %c9_394 = arith.constant 9 : index
      %c9_395 = arith.constant 9 : index
      %576 = memref.load %arg6[%c9_394, %c9_395] : memref<15x10xf32, #tpu.memory_space<smem>>
      %577 = vector.broadcast %576 : f32 to vector<16x16xf32>
      %578 = arith.mulf %577, %575 : vector<16x16xf32>
      %579 = arith.addf %565, %578 : vector<16x16xf32>
      %c10_396 = arith.constant 10 : index
      %c9_397 = arith.constant 9 : index
      %580 = memref.load %arg6[%c10_396, %c9_397] : memref<15x10xf32, #tpu.memory_space<smem>>
      %581 = vector.broadcast %580 : f32 to vector<16x16xf32>
      %582 = arith.mulf %581, %575 : vector<16x16xf32>
      %583 = arith.addf %569, %582 : vector<16x16xf32>
      %c11_398 = arith.constant 11 : index
      %c9_399 = arith.constant 9 : index
      %584 = memref.load %arg6[%c11_398, %c9_399] : memref<15x10xf32, #tpu.memory_space<smem>>
      %585 = vector.broadcast %584 : f32 to vector<16x16xf32>
      %586 = arith.mulf %585, %575 : vector<16x16xf32>
      %587 = arith.addf %573, %586 : vector<16x16xf32>
      %cst_400 = arith.constant 0.000000e+00 : f32
      %588 = vector.broadcast %cst_400 : f32 to vector<16x16xf32>
      %589 = arith.subf %588, %583 : vector<16x16xf32>
      %590 = arith.subf %14, %587 : vector<16x16xf32>
      %591 = arith.mulf %590, %590 : vector<16x16xf32>
      %592 = arith.mulf %589, %591 : vector<16x16xf32>
      %593 = math.exp %592 : vector<16x16xf32>
      %594 = arith.mulf %579, %593 : vector<16x16xf32>
      %595 = arith.addf %450, %594 : vector<16x16xf32>
      %c0_401 = arith.constant 0 : index
      %c0_402 = arith.constant 0 : index
      %c0_403 = arith.constant 0 : index
      %c0_404 = arith.constant 0 : index
      %596 = vector.load %arg3[%c0_401, %c0_402, %c0_403, %c0_404] : memref<1x10x16x16xf32, #tpu.memory_space<vmem>>, vector<1x1x16x16xf32>
      %597 = vector.shape_cast %596 : vector<1x1x16x16xf32> to vector<16x16xf32>
      %c12 = arith.constant 12 : index
      %c0_405 = arith.constant 0 : index
      %598 = memref.load %arg6[%c12, %c0_405] : memref<15x10xf32, #tpu.memory_space<smem>>
      %599 = vector.broadcast %598 : f32 to vector<16x16xf32>
      %600 = arith.mulf %599, %597 : vector<16x16xf32>
      %c13 = arith.constant 13 : index
      %c0_406 = arith.constant 0 : index
      %601 = memref.load %arg6[%c13, %c0_406] : memref<15x10xf32, #tpu.memory_space<smem>>
      %602 = vector.broadcast %601 : f32 to vector<16x16xf32>
      %603 = arith.mulf %602, %597 : vector<16x16xf32>
      %c14 = arith.constant 14 : index
      %c0_407 = arith.constant 0 : index
      %604 = memref.load %arg6[%c14, %c0_407] : memref<15x10xf32, #tpu.memory_space<smem>>
      %605 = vector.broadcast %604 : f32 to vector<16x16xf32>
      %606 = arith.mulf %605, %597 : vector<16x16xf32>
      %c0_408 = arith.constant 0 : index
      %c1_409 = arith.constant 1 : index
      %c0_410 = arith.constant 0 : index
      %c0_411 = arith.constant 0 : index
      %607 = vector.load %arg3[%c0_408, %c1_409, %c0_410, %c0_411] : memref<1x10x16x16xf32, #tpu.memory_space<vmem>>, vector<1x1x16x16xf32>
      %608 = vector.shape_cast %607 : vector<1x1x16x16xf32> to vector<16x16xf32>
      %c12_412 = arith.constant 12 : index
      %c1_413 = arith.constant 1 : index
      %609 = memref.load %arg6[%c12_412, %c1_413] : memref<15x10xf32, #tpu.memory_space<smem>>
      %610 = vector.broadcast %609 : f32 to vector<16x16xf32>
      %611 = arith.mulf %610, %608 : vector<16x16xf32>
      %612 = arith.addf %600, %611 : vector<16x16xf32>
      %c13_414 = arith.constant 13 : index
      %c1_415 = arith.constant 1 : index
      %613 = memref.load %arg6[%c13_414, %c1_415] : memref<15x10xf32, #tpu.memory_space<smem>>
      %614 = vector.broadcast %613 : f32 to vector<16x16xf32>
      %615 = arith.mulf %614, %608 : vector<16x16xf32>
      %616 = arith.addf %603, %615 : vector<16x16xf32>
      %c14_416 = arith.constant 14 : index
      %c1_417 = arith.constant 1 : index
      %617 = memref.load %arg6[%c14_416, %c1_417] : memref<15x10xf32, #tpu.memory_space<smem>>
      %618 = vector.broadcast %617 : f32 to vector<16x16xf32>
      %619 = arith.mulf %618, %608 : vector<16x16xf32>
      %620 = arith.addf %606, %619 : vector<16x16xf32>
      %c0_418 = arith.constant 0 : index
      %c2_419 = arith.constant 2 : index
      %c0_420 = arith.constant 0 : index
      %c0_421 = arith.constant 0 : index
      %621 = vector.load %arg3[%c0_418, %c2_419, %c0_420, %c0_421] : memref<1x10x16x16xf32, #tpu.memory_space<vmem>>, vector<1x1x16x16xf32>
      %622 = vector.shape_cast %621 : vector<1x1x16x16xf32> to vector<16x16xf32>
      %c12_422 = arith.constant 12 : index
      %c2_423 = arith.constant 2 : index
      %623 = memref.load %arg6[%c12_422, %c2_423] : memref<15x10xf32, #tpu.memory_space<smem>>
      %624 = vector.broadcast %623 : f32 to vector<16x16xf32>
      %625 = arith.mulf %624, %622 : vector<16x16xf32>
      %626 = arith.addf %612, %625 : vector<16x16xf32>
      %c13_424 = arith.constant 13 : index
      %c2_425 = arith.constant 2 : index
      %627 = memref.load %arg6[%c13_424, %c2_425] : memref<15x10xf32, #tpu.memory_space<smem>>
      %628 = vector.broadcast %627 : f32 to vector<16x16xf32>
      %629 = arith.mulf %628, %622 : vector<16x16xf32>
      %630 = arith.addf %616, %629 : vector<16x16xf32>
      %c14_426 = arith.constant 14 : index
      %c2_427 = arith.constant 2 : index
      %631 = memref.load %arg6[%c14_426, %c2_427] : memref<15x10xf32, #tpu.memory_space<smem>>
      %632 = vector.broadcast %631 : f32 to vector<16x16xf32>
      %633 = arith.mulf %632, %622 : vector<16x16xf32>
      %634 = arith.addf %620, %633 : vector<16x16xf32>
      %c0_428 = arith.constant 0 : index
      %c3_429 = arith.constant 3 : index
      %c0_430 = arith.constant 0 : index
      %c0_431 = arith.constant 0 : index
      %635 = vector.load %arg3[%c0_428, %c3_429, %c0_430, %c0_431] : memref<1x10x16x16xf32, #tpu.memory_space<vmem>>, vector<1x1x16x16xf32>
      %636 = vector.shape_cast %635 : vector<1x1x16x16xf32> to vector<16x16xf32>
      %c12_432 = arith.constant 12 : index
      %c3_433 = arith.constant 3 : index
      %637 = memref.load %arg6[%c12_432, %c3_433] : memref<15x10xf32, #tpu.memory_space<smem>>
      %638 = vector.broadcast %637 : f32 to vector<16x16xf32>
      %639 = arith.mulf %638, %636 : vector<16x16xf32>
      %640 = arith.addf %626, %639 : vector<16x16xf32>
      %c13_434 = arith.constant 13 : index
      %c3_435 = arith.constant 3 : index
      %641 = memref.load %arg6[%c13_434, %c3_435] : memref<15x10xf32, #tpu.memory_space<smem>>
      %642 = vector.broadcast %641 : f32 to vector<16x16xf32>
      %643 = arith.mulf %642, %636 : vector<16x16xf32>
      %644 = arith.addf %630, %643 : vector<16x16xf32>
      %c14_436 = arith.constant 14 : index
      %c3_437 = arith.constant 3 : index
      %645 = memref.load %arg6[%c14_436, %c3_437] : memref<15x10xf32, #tpu.memory_space<smem>>
      %646 = vector.broadcast %645 : f32 to vector<16x16xf32>
      %647 = arith.mulf %646, %636 : vector<16x16xf32>
      %648 = arith.addf %634, %647 : vector<16x16xf32>
      %c0_438 = arith.constant 0 : index
      %c4_439 = arith.constant 4 : index
      %c0_440 = arith.constant 0 : index
      %c0_441 = arith.constant 0 : index
      %649 = vector.load %arg3[%c0_438, %c4_439, %c0_440, %c0_441] : memref<1x10x16x16xf32, #tpu.memory_space<vmem>>, vector<1x1x16x16xf32>
      %650 = vector.shape_cast %649 : vector<1x1x16x16xf32> to vector<16x16xf32>
      %c12_442 = arith.constant 12 : index
      %c4_443 = arith.constant 4 : index
      %651 = memref.load %arg6[%c12_442, %c4_443] : memref<15x10xf32, #tpu.memory_space<smem>>
      %652 = vector.broadcast %651 : f32 to vector<16x16xf32>
      %653 = arith.mulf %652, %650 : vector<16x16xf32>
      %654 = arith.addf %640, %653 : vector<16x16xf32>
      %c13_444 = arith.constant 13 : index
      %c4_445 = arith.constant 4 : index
      %655 = memref.load %arg6[%c13_444, %c4_445] : memref<15x10xf32, #tpu.memory_space<smem>>
      %656 = vector.broadcast %655 : f32 to vector<16x16xf32>
      %657 = arith.mulf %656, %650 : vector<16x16xf32>
      %658 = arith.addf %644, %657 : vector<16x16xf32>
      %c14_446 = arith.constant 14 : index
      %c4_447 = arith.constant 4 : index
      %659 = memref.load %arg6[%c14_446, %c4_447] : memref<15x10xf32, #tpu.memory_space<smem>>
      %660 = vector.broadcast %659 : f32 to vector<16x16xf32>
      %661 = arith.mulf %660, %650 : vector<16x16xf32>
      %662 = arith.addf %648, %661 : vector<16x16xf32>
      %c0_448 = arith.constant 0 : index
      %c5_449 = arith.constant 5 : index
      %c0_450 = arith.constant 0 : index
      %c0_451 = arith.constant 0 : index
      %663 = vector.load %arg3[%c0_448, %c5_449, %c0_450, %c0_451] : memref<1x10x16x16xf32, #tpu.memory_space<vmem>>, vector<1x1x16x16xf32>
      %664 = vector.shape_cast %663 : vector<1x1x16x16xf32> to vector<16x16xf32>
      %c12_452 = arith.constant 12 : index
      %c5_453 = arith.constant 5 : index
      %665 = memref.load %arg6[%c12_452, %c5_453] : memref<15x10xf32, #tpu.memory_space<smem>>
      %666 = vector.broadcast %665 : f32 to vector<16x16xf32>
      %667 = arith.mulf %666, %664 : vector<16x16xf32>
      %668 = arith.addf %654, %667 : vector<16x16xf32>
      %c13_454 = arith.constant 13 : index
      %c5_455 = arith.constant 5 : index
      %669 = memref.load %arg6[%c13_454, %c5_455] : memref<15x10xf32, #tpu.memory_space<smem>>
      %670 = vector.broadcast %669 : f32 to vector<16x16xf32>
      %671 = arith.mulf %670, %664 : vector<16x16xf32>
      %672 = arith.addf %658, %671 : vector<16x16xf32>
      %c14_456 = arith.constant 14 : index
      %c5_457 = arith.constant 5 : index
      %673 = memref.load %arg6[%c14_456, %c5_457] : memref<15x10xf32, #tpu.memory_space<smem>>
      %674 = vector.broadcast %673 : f32 to vector<16x16xf32>
      %675 = arith.mulf %674, %664 : vector<16x16xf32>
      %676 = arith.addf %662, %675 : vector<16x16xf32>
      %c0_458 = arith.constant 0 : index
      %c6_459 = arith.constant 6 : index
      %c0_460 = arith.constant 0 : index
      %c0_461 = arith.constant 0 : index
      %677 = vector.load %arg3[%c0_458, %c6_459, %c0_460, %c0_461] : memref<1x10x16x16xf32, #tpu.memory_space<vmem>>, vector<1x1x16x16xf32>
      %678 = vector.shape_cast %677 : vector<1x1x16x16xf32> to vector<16x16xf32>
      %c12_462 = arith.constant 12 : index
      %c6_463 = arith.constant 6 : index
      %679 = memref.load %arg6[%c12_462, %c6_463] : memref<15x10xf32, #tpu.memory_space<smem>>
      %680 = vector.broadcast %679 : f32 to vector<16x16xf32>
      %681 = arith.mulf %680, %678 : vector<16x16xf32>
      %682 = arith.addf %668, %681 : vector<16x16xf32>
      %c13_464 = arith.constant 13 : index
      %c6_465 = arith.constant 6 : index
      %683 = memref.load %arg6[%c13_464, %c6_465] : memref<15x10xf32, #tpu.memory_space<smem>>
      %684 = vector.broadcast %683 : f32 to vector<16x16xf32>
      %685 = arith.mulf %684, %678 : vector<16x16xf32>
      %686 = arith.addf %672, %685 : vector<16x16xf32>
      %c14_466 = arith.constant 14 : index
      %c6_467 = arith.constant 6 : index
      %687 = memref.load %arg6[%c14_466, %c6_467] : memref<15x10xf32, #tpu.memory_space<smem>>
      %688 = vector.broadcast %687 : f32 to vector<16x16xf32>
      %689 = arith.mulf %688, %678 : vector<16x16xf32>
      %690 = arith.addf %676, %689 : vector<16x16xf32>
      %c0_468 = arith.constant 0 : index
      %c7_469 = arith.constant 7 : index
      %c0_470 = arith.constant 0 : index
      %c0_471 = arith.constant 0 : index
      %691 = vector.load %arg3[%c0_468, %c7_469, %c0_470, %c0_471] : memref<1x10x16x16xf32, #tpu.memory_space<vmem>>, vector<1x1x16x16xf32>
      %692 = vector.shape_cast %691 : vector<1x1x16x16xf32> to vector<16x16xf32>
      %c12_472 = arith.constant 12 : index
      %c7_473 = arith.constant 7 : index
      %693 = memref.load %arg6[%c12_472, %c7_473] : memref<15x10xf32, #tpu.memory_space<smem>>
      %694 = vector.broadcast %693 : f32 to vector<16x16xf32>
      %695 = arith.mulf %694, %692 : vector<16x16xf32>
      %696 = arith.addf %682, %695 : vector<16x16xf32>
      %c13_474 = arith.constant 13 : index
      %c7_475 = arith.constant 7 : index
      %697 = memref.load %arg6[%c13_474, %c7_475] : memref<15x10xf32, #tpu.memory_space<smem>>
      %698 = vector.broadcast %697 : f32 to vector<16x16xf32>
      %699 = arith.mulf %698, %692 : vector<16x16xf32>
      %700 = arith.addf %686, %699 : vector<16x16xf32>
      %c14_476 = arith.constant 14 : index
      %c7_477 = arith.constant 7 : index
      %701 = memref.load %arg6[%c14_476, %c7_477] : memref<15x10xf32, #tpu.memory_space<smem>>
      %702 = vector.broadcast %701 : f32 to vector<16x16xf32>
      %703 = arith.mulf %702, %692 : vector<16x16xf32>
      %704 = arith.addf %690, %703 : vector<16x16xf32>
      %c0_478 = arith.constant 0 : index
      %c8_479 = arith.constant 8 : index
      %c0_480 = arith.constant 0 : index
      %c0_481 = arith.constant 0 : index
      %705 = vector.load %arg3[%c0_478, %c8_479, %c0_480, %c0_481] : memref<1x10x16x16xf32, #tpu.memory_space<vmem>>, vector<1x1x16x16xf32>
      %706 = vector.shape_cast %705 : vector<1x1x16x16xf32> to vector<16x16xf32>
      %c12_482 = arith.constant 12 : index
      %c8_483 = arith.constant 8 : index
      %707 = memref.load %arg6[%c12_482, %c8_483] : memref<15x10xf32, #tpu.memory_space<smem>>
      %708 = vector.broadcast %707 : f32 to vector<16x16xf32>
      %709 = arith.mulf %708, %706 : vector<16x16xf32>
      %710 = arith.addf %696, %709 : vector<16x16xf32>
      %c13_484 = arith.constant 13 : index
      %c8_485 = arith.constant 8 : index
      %711 = memref.load %arg6[%c13_484, %c8_485] : memref<15x10xf32, #tpu.memory_space<smem>>
      %712 = vector.broadcast %711 : f32 to vector<16x16xf32>
      %713 = arith.mulf %712, %706 : vector<16x16xf32>
      %714 = arith.addf %700, %713 : vector<16x16xf32>
      %c14_486 = arith.constant 14 : index
      %c8_487 = arith.constant 8 : index
      %715 = memref.load %arg6[%c14_486, %c8_487] : memref<15x10xf32, #tpu.memory_space<smem>>
      %716 = vector.broadcast %715 : f32 to vector<16x16xf32>
      %717 = arith.mulf %716, %706 : vector<16x16xf32>
      %718 = arith.addf %704, %717 : vector<16x16xf32>
      %c0_488 = arith.constant 0 : index
      %c9_489 = arith.constant 9 : index
      %c0_490 = arith.constant 0 : index
      %c0_491 = arith.constant 0 : index
      %719 = vector.load %arg3[%c0_488, %c9_489, %c0_490, %c0_491] : memref<1x10x16x16xf32, #tpu.memory_space<vmem>>, vector<1x1x16x16xf32>
      %720 = vector.shape_cast %719 : vector<1x1x16x16xf32> to vector<16x16xf32>
      %c12_492 = arith.constant 12 : index
      %c9_493 = arith.constant 9 : index
      %721 = memref.load %arg6[%c12_492, %c9_493] : memref<15x10xf32, #tpu.memory_space<smem>>
      %722 = vector.broadcast %721 : f32 to vector<16x16xf32>
      %723 = arith.mulf %722, %720 : vector<16x16xf32>
      %724 = arith.addf %710, %723 : vector<16x16xf32>
      %c13_494 = arith.constant 13 : index
      %c9_495 = arith.constant 9 : index
      %725 = memref.load %arg6[%c13_494, %c9_495] : memref<15x10xf32, #tpu.memory_space<smem>>
      %726 = vector.broadcast %725 : f32 to vector<16x16xf32>
      %727 = arith.mulf %726, %720 : vector<16x16xf32>
      %728 = arith.addf %714, %727 : vector<16x16xf32>
      %c14_496 = arith.constant 14 : index
      %c9_497 = arith.constant 9 : index
      %729 = memref.load %arg6[%c14_496, %c9_497] : memref<15x10xf32, #tpu.memory_space<smem>>
      %730 = vector.broadcast %729 : f32 to vector<16x16xf32>
      %731 = arith.mulf %730, %720 : vector<16x16xf32>
      %732 = arith.addf %718, %731 : vector<16x16xf32>
      %cst_498 = arith.constant 0.000000e+00 : f32
      %733 = vector.broadcast %cst_498 : f32 to vector<16x16xf32>
      %734 = arith.subf %733, %728 : vector<16x16xf32>
      %735 = arith.subf %14, %732 : vector<16x16xf32>
      %736 = arith.mulf %735, %735 : vector<16x16xf32>
      %737 = arith.mulf %734, %736 : vector<16x16xf32>
      %738 = math.exp %737 : vector<16x16xf32>
      %739 = arith.mulf %724, %738 : vector<16x16xf32>
      %740 = arith.addf %595, %739 : vector<16x16xf32>
      %c0_499 = arith.constant 0 : index
      %c0_500 = arith.constant 0 : index
      %741 = vector.load %arg8[%c0_499, %c0_500] : memref<1x8xf32, #tpu.memory_space<vmem>>, vector<1x8xf32>
      %742 = arith.mulf %6, %741 : vector<1x8xf32>
      %cst_501 = arith.constant dense<0.000000e+00> : vector<1xf32>
      %743 = vector.multi_reduction <add>, %742, %cst_501 [1] : vector<1x8xf32> to vector<1xf32>
      %744 = vector.shape_cast %743 : vector<1xf32> to vector<1x1xf32>
      %c0_502 = arith.constant 0 : index
      %745 = memref.load %arg7[%c0_502] : memref<6xf32, #tpu.memory_space<smem>>
      %746 = vector.broadcast %745 : f32 to vector<1x1xf32>
      %747 = arith.addf %744, %746 : vector<1x1xf32>
      %748 = arith.negf %747 : vector<1x1xf32>
      %749 = math.exp %748 : vector<1x1xf32>
      %cst_503 = arith.constant 1.000000e+00 : f32
      %750 = vector.broadcast %cst_503 : f32 to vector<1x1xf32>
      %751 = arith.addf %750, %749 : vector<1x1xf32>
      %752 = arith.divf %750, %751 : vector<1x1xf32>
      %753 = vector.broadcast %752 : vector<1x1xf32> to vector<16x16xf32>
      %754 = arith.mulf %740, %753 : vector<16x16xf32>
      %c0_504 = arith.constant 0 : index
      %c0_505 = arith.constant 0 : index
      %755 = vector.load %arg9[%c0_504, %c0_505] : memref<16x16xf32, #tpu.memory_space<vmem>>, vector<16x16xf32>
      %756 = arith.mulf %755, %14 : vector<16x16xf32>
      %757 = arith.addf %754, %756 : vector<16x16xf32>
      %c0_506 = arith.constant 0 : index
      %c0_507 = arith.constant 0 : index
      %758 = vector.load %arg10[%c0_506, %c0_507] : memref<16x32xf32, #tpu.memory_space<vmem>>, vector<16x32xf32>
      %cst_508 = arith.constant dense<0.000000e+00> : vector<16x32xf32>
      %759 = tpu.matmul %757, %758, %cst_508 {dimension_numbers = #tpu.dot_dimension_numbers<[1], [0], [0], [1], [0, 0, 1, 1], [], []>} : vector<16x16xf32>, vector<16x32xf32>, vector<16x32xf32> -> vector<16x32xf32>
      %c0_509 = arith.constant 0 : index
      %c0_510 = arith.constant 0 : index
      %760 = vector.load %arg11[%c0_509, %c0_510] : memref<1x32xf32, #tpu.memory_space<vmem>>, vector<1x32xf32>
      %761 = vector.broadcast %760 : vector<1x32xf32> to vector<16x32xf32>
      %762 = arith.addf %759, %761 : vector<16x32xf32>
      %cst_511 = arith.constant 0.000000e+00 : f32
      %763 = vector.broadcast %cst_511 : f32 to vector<16x32xf32>
      %764 = arith.maximumf %762, %763 : vector<16x32xf32>
      %c0_512 = arith.constant 0 : index
      %c0_513 = arith.constant 0 : index
      %765 = vector.load %arg12[%c0_512, %c0_513] : memref<32x16xf32, #tpu.memory_space<vmem>>, vector<32x16xf32>
      %cst_514 = arith.constant dense<0.000000e+00> : vector<16x16xf32>
      %766 = tpu.matmul %764, %765, %cst_514 {dimension_numbers = #tpu.dot_dimension_numbers<[1], [0], [0], [1], [0, 0, 1, 1], [], []>} : vector<16x32xf32>, vector<32x16xf32>, vector<16x16xf32> -> vector<16x16xf32>
      %c0_515 = arith.constant 0 : index
      %c0_516 = arith.constant 0 : index
      %767 = vector.load %arg13[%c0_515, %c0_516] : memref<1x16xf32, #tpu.memory_space<vmem>>, vector<1x16xf32>
      %768 = vector.broadcast %767 : vector<1x16xf32> to vector<16x16xf32>
      %769 = arith.addf %766, %768 : vector<16x16xf32>
      %770 = arith.addf %769, %757 : vector<16x16xf32>
      %771 = arith.index_cast %arg1 : i32 to index
      %c0_517 = arith.constant 0 : index
      %c0_518 = arith.constant 0 : index
      %772 = vector.load %arg22[%771, %c0_517, %c0_518] : memref<2x16x16xf32, #tpu.memory_space<vmem>>, vector<1x16x16xf32>
      %773 = vector.shape_cast %772 : vector<1x16x16xf32> to vector<16x16xf32>
      %774 = vector.shape_cast %770 : vector<16x16xf32> to vector<1x16x16xf32>
      tpu.vector_store %arg22[%771, %c0_517, %c0_518], %774 {strides = array<i32>} : memref<2x16x16xf32, #tpu.memory_space<vmem>>, vector<1x16x16xf32>,
      %c0_519 = arith.constant 0 : index
      %c0_520 = arith.constant 0 : index
      %775 = vector.load %arg14[%c0_519, %c0_520] : memref<32x16xf32, #tpu.memory_space<vmem>>, vector<32x16xf32>
      %cst_521 = arith.constant dense<0.000000e+00> : vector<32x16xf32>
      %776 = tpu.matmul %775, %757, %cst_521 {dimension_numbers = #tpu.dot_dimension_numbers<[1], [0], [0], [1], [0, 0, 1, 1], [], []>} : vector<32x16xf32>, vector<16x16xf32>, vector<32x16xf32> -> vector<32x16xf32>
      %c0_522 = arith.constant 0 : index
      %c0_523 = arith.constant 0 : index
      %777 = vector.load %arg15[%c0_522, %c0_523] : memref<32x1xf32, #tpu.memory_space<vmem>>, vector<32x1xf32>
      %778 = vector.broadcast %777 : vector<32x1xf32> to vector<32x16xf32>
      %779 = arith.addf %776, %778 : vector<32x16xf32>
      %cst_524 = arith.constant 0.000000e+00 : f32
      %780 = vector.broadcast %cst_524 : f32 to vector<32x16xf32>
      %781 = arith.maximumf %779, %780 : vector<32x16xf32>
      %c0_525 = arith.constant 0 : index
      %c0_526 = arith.constant 0 : index
      %782 = vector.load %arg16[%c0_525, %c0_526] : memref<16x32xf32, #tpu.memory_space<vmem>>, vector<16x32xf32>
      %cst_527 = arith.constant dense<0.000000e+00> : vector<16x16xf32>
      %783 = tpu.matmul %782, %781, %cst_527 {dimension_numbers = #tpu.dot_dimension_numbers<[1], [0], [0], [1], [0, 0, 1, 1], [], []>} : vector<16x32xf32>, vector<32x16xf32>, vector<16x16xf32> -> vector<16x16xf32>
      %c0_528 = arith.constant 0 : index
      %c0_529 = arith.constant 0 : index
      %784 = vector.load %arg17[%c0_528, %c0_529] : memref<16x1xf32, #tpu.memory_space<vmem>>, vector<16x1xf32>
      %785 = vector.broadcast %784 : vector<16x1xf32> to vector<16x16xf32>
      %786 = arith.addf %783, %785 : vector<16x16xf32>
      %787 = arith.addf %786, %757 : vector<16x16xf32>
      %788 = arith.index_cast %arg1 : i32 to index
      %c0_530 = arith.constant 0 : index
      %c0_531 = arith.constant 0 : index
      %789 = vector.load %arg23[%788, %c0_530, %c0_531] : memref<2x16x16xf32, #tpu.memory_space<vmem>>, vector<1x16x16xf32>
      %790 = vector.shape_cast %789 : vector<1x16x16xf32> to vector<16x16xf32>
      %791 = vector.shape_cast %787 : vector<16x16xf32> to vector<1x16x16xf32>
      tpu.vector_store %arg23[%788, %c0_530, %c0_531], %791 {strides = array<i32>} : memref<2x16x16xf32, #tpu.memory_space<vmem>>, vector<1x16x16xf32>,
      %c0_532 = arith.constant 0 : index
      %c0_533 = arith.constant 0 : index
      %792 = vector.load %arg24[%c0_532, %c0_533] : memref<16x1xf32, #tpu.memory_space<vmem>>, vector<16x1xf32>
      %cst_534 = arith.constant dense<0.000000e+00> : vector<16xf32>
      %793 = vector.multi_reduction <add>, %770, %cst_534 [1] : vector<16x16xf32> to vector<16xf32>
      %794 = vector.shape_cast %793 : vector<16xf32> to vector<16x1xf32>
      %795 = arith.addf %792, %794 : vector<16x1xf32>
      %c0_535 = arith.constant 0 : index
      %c0_536 = arith.constant 0 : index
      %796 = vector.load %arg24[%c0_535, %c0_536] : memref<16x1xf32, #tpu.memory_space<vmem>>, vector<16x1xf32>
      tpu.vector_store %arg24[%c0_535, %c0_536], %795 {strides = array<i32>} : memref<16x1xf32, #tpu.memory_space<vmem>>, vector<16x1xf32>,
      %c0_537 = arith.constant 0 : index
      %c0_538 = arith.constant 0 : index
      %797 = vector.load %arg25[%c0_537, %c0_538] : memref<16x1xf32, #tpu.memory_space<vmem>>, vector<16x1xf32>
      %798 = arith.mulf %770, %770 : vector<16x16xf32>
      %cst_539 = arith.constant dense<0.000000e+00> : vector<16xf32>
      %799 = vector.multi_reduction <add>, %798, %cst_539 [1] : vector<16x16xf32> to vector<16xf32>
      %800 = vector.shape_cast %799 : vector<16xf32> to vector<16x1xf32>
      %801 = arith.addf %797, %800 : vector<16x1xf32>
      %c0_540 = arith.constant 0 : index
      %c0_541 = arith.constant 0 : index
      %802 = vector.load %arg25[%c0_540, %c0_541] : memref<16x1xf32, #tpu.memory_space<vmem>>, vector<16x1xf32>
      tpu.vector_store %arg25[%c0_540, %c0_541], %801 {strides = array<i32>} : memref<16x1xf32, #tpu.memory_space<vmem>>, vector<16x1xf32>,
      %c0_542 = arith.constant 0 : index
      %c0_543 = arith.constant 0 : index
      %803 = vector.load %arg26[%c0_542, %c0_543] : memref<1x16xf32, #tpu.memory_space<vmem>>, vector<1x16xf32>
      %cst_544 = arith.constant dense<0.000000e+00> : vector<16xf32>
      %804 = vector.multi_reduction <add>, %787, %cst_544 [0] : vector<16x16xf32> to vector<16xf32>
      %805 = vector.shape_cast %804 : vector<16xf32> to vector<1x16xf32>
      %806 = arith.addf %803, %805 : vector<1x16xf32>
      %c0_545 = arith.constant 0 : index
      %c0_546 = arith.constant 0 : index
      %807 = vector.load %arg26[%c0_545, %c0_546] : memref<1x16xf32, #tpu.memory_space<vmem>>, vector<1x16xf32>
      tpu.vector_store %arg26[%c0_545, %c0_546], %806 {strides = array<i32>} : memref<1x16xf32, #tpu.memory_space<vmem>>, vector<1x16xf32>,
      %c0_547 = arith.constant 0 : index
      %c0_548 = arith.constant 0 : index
      %808 = vector.load %arg27[%c0_547, %c0_548] : memref<1x16xf32, #tpu.memory_space<vmem>>, vector<1x16xf32>
      %809 = arith.mulf %787, %787 : vector<16x16xf32>
      %cst_549 = arith.constant dense<0.000000e+00> : vector<16xf32>
      %810 = vector.multi_reduction <add>, %809, %cst_549 [0] : vector<16x16xf32> to vector<16xf32>
      %811 = vector.shape_cast %810 : vector<16xf32> to vector<1x16xf32>
      %812 = arith.addf %808, %811 : vector<1x16xf32>
      %c0_550 = arith.constant 0 : index
      %c0_551 = arith.constant 0 : index
      %813 = vector.load %arg27[%c0_550, %c0_551] : memref<1x16xf32, #tpu.memory_space<vmem>>, vector<1x16xf32>
      tpu.vector_store %arg27[%c0_550, %c0_551], %812 {strides = array<i32>} : memref<1x16xf32, #tpu.memory_space<vmem>>, vector<1x16xf32>,
    } else {
    }
    %c1_i32 = arith.constant 1 : i32
    %10 = arith.cmpi eq, %arg0, %c1_i32 : i32
    %11 = arith.extui %10 : i1 to i32
    %c0_i32_4 = arith.constant 0 : i32
    %12 = arith.cmpi ne, %11, %c0_i32_4 : i32
    scf.if %12 {
      %c0_5 = arith.constant 0 : index
      %c0_6 = arith.constant 0 : index
      %13 = vector.load %arg24[%c0_5, %c0_6] : memref<16x1xf32, #tpu.memory_space<vmem>>, vector<16x1xf32>
      %cst = arith.constant 3.125000e-02 : f32
      %14 = vector.broadcast %cst : f32 to vector<16x1xf32>
      %15 = arith.mulf %13, %14 : vector<16x1xf32>
      %c0_7 = arith.constant 0 : index
      %c0_8 = arith.constant 0 : index
      %16 = vector.load %arg25[%c0_7, %c0_8] : memref<16x1xf32, #tpu.memory_space<vmem>>, vector<16x1xf32>
      %cst_9 = arith.constant 3.125000e-02 : f32
      %17 = vector.broadcast %cst_9 : f32 to vector<16x1xf32>
      %18 = arith.mulf %16, %17 : vector<16x1xf32>
      %19 = arith.mulf %15, %15 : vector<16x1xf32>
      %20 = arith.subf %18, %19 : vector<16x1xf32>
      %cst_10 = arith.constant 9.99999974E-6 : f32
      %21 = vector.broadcast %cst_10 : f32 to vector<16x1xf32>
      %22 = arith.addf %20, %21 : vector<16x1xf32>
      %23 = math.rsqrt %22 : vector<16x1xf32>
      %c0_11 = arith.constant 0 : index
      %c0_12 = arith.constant 0 : index
      %24 = vector.load %arg26[%c0_11, %c0_12] : memref<1x16xf32, #tpu.memory_space<vmem>>, vector<1x16xf32>
      %cst_13 = arith.constant 3.125000e-02 : f32
      %25 = vector.broadcast %cst_13 : f32 to vector<1x16xf32>
      %26 = arith.mulf %24, %25 : vector<1x16xf32>
      %c0_14 = arith.constant 0 : index
      %c0_15 = arith.constant 0 : index
      %27 = vector.load %arg27[%c0_14, %c0_15] : memref<1x16xf32, #tpu.memory_space<vmem>>, vector<1x16xf32>
      %cst_16 = arith.constant 3.125000e-02 : f32
      %28 = vector.broadcast %cst_16 : f32 to vector<1x16xf32>
      %29 = arith.mulf %27, %28 : vector<1x16xf32>
      %30 = arith.mulf %26, %26 : vector<1x16xf32>
      %31 = arith.subf %29, %30 : vector<1x16xf32>
      %cst_17 = arith.constant 9.99999974E-6 : f32
      %32 = vector.broadcast %cst_17 : f32 to vector<1x16xf32>
      %33 = arith.addf %31, %32 : vector<1x16xf32>
      %34 = math.rsqrt %33 : vector<1x16xf32>
      %35 = arith.index_cast %arg1 : i32 to index
      %c0_18 = arith.constant 0 : index
      %c0_19 = arith.constant 0 : index
      %36 = vector.load %arg22[%35, %c0_18, %c0_19] : memref<2x16x16xf32, #tpu.memory_space<vmem>>, vector<1x16x16xf32>
      %37 = vector.shape_cast %36 : vector<1x16x16xf32> to vector<16x16xf32>
      %38 = arith.index_cast %arg1 : i32 to index
      %c0_20 = arith.constant 0 : index
      %c0_21 = arith.constant 0 : index
      %39 = vector.load %arg23[%38, %c0_20, %c0_21] : memref<2x16x16xf32, #tpu.memory_space<vmem>>, vector<1x16x16xf32>
      %40 = vector.shape_cast %39 : vector<1x16x16xf32> to vector<16x16xf32>
      %41 = vector.broadcast %15 : vector<16x1xf32> to vector<16x16xf32>
      %42 = arith.subf %37, %41 : vector<16x16xf32>
      %43 = vector.broadcast %23 : vector<16x1xf32> to vector<16x16xf32>
      %44 = arith.mulf %42, %43 : vector<16x16xf32>
      %45 = vector.broadcast %26 : vector<1x16xf32> to vector<16x16xf32>
      %46 = arith.subf %40, %45 : vector<16x16xf32>
      %47 = vector.broadcast %34 : vector<1x16xf32> to vector<16x16xf32>
      %48 = arith.mulf %46, %47 : vector<16x16xf32>
      %49 = arith.addf %44, %48 : vector<16x16xf32>
      %c0_22 = arith.constant 0 : index
      %c0_23 = arith.constant 0 : index
      %50 = vector.load %arg18[%c0_22, %c0_23] : memref<8x16xf32, #tpu.memory_space<vmem>>, vector<8x16xf32>
      %cst_24 = arith.constant dense<0.000000e+00> : vector<1x16xf32>
      %51 = tpu.matmul %6, %50, %cst_24 {dimension_numbers = #tpu.dot_dimension_numbers<[1], [0], [0], [1], [0, 0, 1, 1], [], []>} : vector<1x8xf32>, vector<8x16xf32>, vector<1x16xf32> -> vector<1x16xf32>
      %c0_25 = arith.constant 0 : index
      %c0_26 = arith.constant 0 : index
      %52 = vector.load %arg19[%c0_25, %c0_26] : memref<1x16xf32, #tpu.memory_space<vmem>>, vector<1x16xf32>
      %53 = arith.addf %51, %52 : vector<1x16xf32>
      %54 = arith.negf %53 : vector<1x16xf32>
      %55 = math.exp %54 : vector<1x16xf32>
      %cst_27 = arith.constant 1.000000e+00 : f32
      %56 = vector.broadcast %cst_27 : f32 to vector<1x16xf32>
      %57 = arith.addf %56, %55 : vector<1x16xf32>
      %58 = arith.divf %56, %57 : vector<1x16xf32>
      %c0_28 = arith.constant 0 : index
      %c0_29 = arith.constant 0 : index
      %59 = vector.load %arg20[%c0_28, %c0_29] : memref<1x16xf32, #tpu.memory_space<vmem>>, vector<1x16xf32>
      %60 = arith.mulf %58, %59 : vector<1x16xf32>
      %cst_30 = arith.constant dense<0.000000e+00> : vector<1xf32>
      %61 = vector.multi_reduction <add>, %60, %cst_30 [1] : vector<1x16xf32> to vector<1xf32>
      %62 = vector.shape_cast %61 : vector<1xf32> to vector<1x1xf32>
      %c1 = arith.constant 1 : index
      %63 = memref.load %arg7[%c1] : memref<6xf32, #tpu.memory_space<smem>>
      %64 = vector.broadcast %63 : f32 to vector<1x1xf32>
      %65 = arith.addf %62, %64 : vector<1x1xf32>
      %cst_31 = arith.constant 0.000000e+00 : f32
      %66 = vector.broadcast %cst_31 : f32 to vector<1x1xf32>
      %67 = arith.maximumf %65, %66 : vector<1x1xf32>
      %68 = vector.broadcast %cst_31 : f32 to vector<1x1xf32>
      %69 = arith.subf %65, %68 : vector<1x1xf32>
      %70 = arith.cmpf one, %69, %69 : vector<1x1xf32>
      %71 = vector.broadcast %cst_31 : f32 to vector<1x1xf32>
      %72 = arith.addf %65, %71 : vector<1x1xf32>
      %73 = math.absf %69 : vector<1x1xf32>
      %cst_32 = arith.constant 0.000000e+00 : f32
      %74 = vector.broadcast %cst_32 : f32 to vector<1x1xf32>
      %75 = arith.subf %74, %73 : vector<1x1xf32>
      %76 = math.exp %75 : vector<1x1xf32>
      %77 = math.log1p %76 : vector<1x1xf32>
      %78 = arith.addf %67, %77 : vector<1x1xf32>
      %79 = arith.select %70, %72, %78 : vector<1x1xi1>, vector<1x1xf32>
      %cst_33 = arith.constant 1.000000e+01 : f32
      %80 = vector.broadcast %cst_33 : f32 to vector<1x1xf32>
      %81 = arith.mulf %80, %79 : vector<1x1xf32>
      %82 = arith.index_cast %arg1 : i32 to index
      %c0_34 = arith.constant 0 : index
      %83 = vector.load %arg5[%82, %c0_34] : memref<2x1xf32, #tpu.memory_space<vmem>>, vector<1x1xf32>
      %84 = math.log %83 : vector<1x1xf32>
      %c2 = arith.constant 2 : index
      %85 = memref.load %arg7[%c2] : memref<6xf32, #tpu.memory_space<smem>>
      %86 = vector.broadcast %85 : f32 to vector<1x1xf32>
      %87 = arith.mulf %84, %86 : vector<1x1xf32>
      %c3 = arith.constant 3 : index
      %88 = memref.load %arg7[%c3] : memref<6xf32, #tpu.memory_space<smem>>
      %89 = vector.broadcast %88 : f32 to vector<1x1xf32>
      %90 = arith.addf %87, %89 : vector<1x1xf32>
      %91 = vector.extract_strided_slice %6 {offsets = [0, 0], sizes = [1, 1], strides = [1, 1]} : vector<1x8xf32> to vector<1x1xf32>
      %c4 = arith.constant 4 : index
      %92 = memref.load %arg7[%c4] : memref<6xf32, #tpu.memory_space<smem>>
      %93 = vector.broadcast %92 : f32 to vector<1x1xf32>
      %94 = arith.mulf %91, %93 : vector<1x1xf32>
      %c5 = arith.constant 5 : index
      %95 = memref.load %arg7[%c5] : memref<6xf32, #tpu.memory_space<smem>>
      %96 = vector.broadcast %95 : f32 to vector<1x1xf32>
      %97 = arith.addf %94, %96 : vector<1x1xf32>
      %cst_35 = arith.constant 1.000000e+00 : f32
      %98 = vector.broadcast %cst_35 : f32 to vector<1x1xf32>
      %99 = arith.divf %98, %97 : vector<1x1xf32>
      %cst_36 = arith.constant 1.000000e+00 : f32
      %100 = vector.broadcast %cst_36 : f32 to vector<1x1xf32>
      %101 = arith.divf %100, %81 : vector<1x1xf32>
      %102 = vector.broadcast %99 : vector<1x1xf32> to vector<16x16xf32>
      %103 = arith.mulf %49, %102 : vector<16x16xf32>
      %104 = vector.broadcast %90 : vector<1x1xf32> to vector<16x16xf32>
      %105 = arith.subf %104, %103 : vector<16x16xf32>
      %cst_37 = arith.constant 5.000000e-01 : f32
      %106 = vector.broadcast %cst_37 : f32 to vector<16x16xf32>
      %107 = arith.mulf %106, %105 : vector<16x16xf32>
      %108 = arith.mulf %107, %105 : vector<16x16xf32>
      %cst_38 = arith.constant -0.22579135 : f32
      %109 = vector.broadcast %cst_38 : f32 to vector<16x16xf32>
      %110 = arith.subf %109, %108 : vector<16x16xf32>
      %cst_39 = arith.constant 0.000000e+00 : f32
      %111 = vector.broadcast %cst_39 : f32 to vector<16x16xf32>
      %112 = arith.cmpf oge, %105, %111 : vector<16x16xf32>
      %cst_40 = arith.constant 0xFF800000 : f32
      %113 = vector.broadcast %cst_40 : f32 to vector<16x16xf32>
      %114 = arith.select %112, %110, %113 : vector<16x16xi1>, vector<16x16xf32>
      %115 = vector.broadcast %101 : vector<1x1xf32> to vector<16x16xf32>
      %116 = arith.mulf %114, %115 : vector<16x16xf32>
      %117 = math.exp %116 : vector<16x16xf32>
      %cst_41 = arith.constant 1.000000e+00 : f32
      %118 = vector.broadcast %cst_41 : f32 to vector<16x16xf32>
      %119 = arith.subf %118, %117 : vector<16x16xf32>
      %c0_42 = arith.constant 0 : index
      %c0_43 = arith.constant 0 : index
      %c0_44 = arith.constant 0 : index
      %120 = vector.load %arg21[%c0_42, %c0_43, %c0_44] : memref<1x16x16xf32, #tpu.memory_space<vmem>>, vector<1x16x16xf32>
      %121 = vector.shape_cast %120 : vector<1x16x16xf32> to vector<16x16xf32>
      %122 = vector.shape_cast %119 : vector<16x16xf32> to vector<1x16x16xf32>
      tpu.vector_store %arg21[%c0_42, %c0_43, %c0_44], %122 {strides = array<i32>} : memref<1x16x16xf32, #tpu.memory_space<vmem>>, vector<1x16x16xf32>,
    } else {
    }
    return
  }
  func.func @transform_0(%arg0: i32, %arg1: i32) -> (i32, i32, i32) {
    %c1_i32 = arith.constant 1 : i32
    %0 = arith.subi %c1_i32, %arg0 : i32
    %1 = arith.muli %arg1, %0 : i32
    %c1_i32_0 = arith.constant 1 : i32
    %2 = arith.muli %c1_i32_0, %arg0 : i32
    %3 = arith.addi %1, %2 : i32
    %c0_i32 = arith.constant 0 : i32
    %c0_i32_1 = arith.constant 0 : i32
    %c0_i32_2 = arith.constant 0 : i32
    return %3, %c0_i32, %c0_i32_1 : i32, i32, i32
  }
  func.func @transform_1(%arg0: i32, %arg1: i32) -> (i32, i32, i32, i32) {
    %c1_i32 = arith.constant 1 : i32
    %0 = arith.subi %c1_i32, %arg0 : i32
    %1 = arith.muli %arg1, %0 : i32
    %c1_i32_0 = arith.constant 1 : i32
    %2 = arith.muli %c1_i32_0, %arg0 : i32
    %3 = arith.addi %1, %2 : i32
    %c0_i32 = arith.constant 0 : i32
    %c0_i32_1 = arith.constant 0 : i32
    %c0_i32_2 = arith.constant 0 : i32
    %c0_i32_3 = arith.constant 0 : i32
    return %3, %c0_i32, %c0_i32_1, %c0_i32_2 : i32, i32, i32, i32
  }
  func.func @transform_2(%arg0: i32, %arg1: i32) -> (i32, i32) {
    %c0_i32 = arith.constant 0 : i32
    %c0_i32_0 = arith.constant 0 : i32
    %c0_i32_1 = arith.constant 0 : i32
    return %c0_i32, %c0_i32_0 : i32, i32
  }
  func.func @transform_3(%arg0: i32, %arg1: i32) -> (i32, i32) {
    %c0_i32 = arith.constant 0 : i32
    %c0_i32_0 = arith.constant 0 : i32
    %c0_i32_1 = arith.constant 0 : i32
    return %c0_i32, %c0_i32_0 : i32, i32
  }
  func.func @transform_4(%arg0: i32, %arg1: i32) -> (i32, i32) {
    %c0_i32 = arith.constant 0 : i32
    %c0_i32_0 = arith.constant 0 : i32
    %c0_i32_1 = arith.constant 0 : i32
    return %c0_i32, %c0_i32_0 : i32, i32
  }
  func.func @transform_5(%arg0: i32, %arg1: i32) -> i32 {
    %c0_i32 = arith.constant 0 : i32
    %c0_i32_0 = arith.constant 0 : i32
    return %c0_i32 : i32
  }
  func.func @transform_6(%arg0: i32, %arg1: i32) -> (i32, i32) {
    %c0_i32 = arith.constant 0 : i32
    %c0_i32_0 = arith.constant 0 : i32
    %c0_i32_1 = arith.constant 0 : i32
    return %c0_i32, %c0_i32_0 : i32, i32
  }
  func.func @transform_7(%arg0: i32, %arg1: i32) -> (i32, i32) {
    %c0_i32 = arith.constant 0 : i32
    %c0_i32_0 = arith.constant 0 : i32
    %c0_i32_1 = arith.constant 0 : i32
    return %c0_i32, %c0_i32_0 : i32, i32
  }
  func.func @transform_8(%arg0: i32, %arg1: i32) -> (i32, i32) {
    %c0_i32 = arith.constant 0 : i32
    %c0_i32_0 = arith.constant 0 : i32
    %c0_i32_1 = arith.constant 0 : i32
    return %c0_i32, %c0_i32_0 : i32, i32
  }
  func.func @transform_9(%arg0: i32, %arg1: i32) -> (i32, i32) {
    %c0_i32 = arith.constant 0 : i32
    %c0_i32_0 = arith.constant 0 : i32
    %c0_i32_1 = arith.constant 0 : i32
    return %c0_i32, %c0_i32_0 : i32, i32
  }
  func.func @transform_10(%arg0: i32, %arg1: i32) -> (i32, i32) {
    %c0_i32 = arith.constant 0 : i32
    %c0_i32_0 = arith.constant 0 : i32
    %c0_i32_1 = arith.constant 0 : i32
    return %c0_i32, %c0_i32_0 : i32, i32
  }
  func.func @transform_11(%arg0: i32, %arg1: i32) -> (i32, i32) {
    %c0_i32 = arith.constant 0 : i32
    %c0_i32_0 = arith.constant 0 : i32
    %c0_i32_1 = arith.constant 0 : i32
    return %c0_i32, %c0_i32_0 : i32, i32
  }
  func.func @transform_12(%arg0: i32, %arg1: i32) -> (i32, i32) {
    %c0_i32 = arith.constant 0 : i32
    %c0_i32_0 = arith.constant 0 : i32
    %c0_i32_1 = arith.constant 0 : i32
    return %c0_i32, %c0_i32_0 : i32, i32
  }
  func.func @transform_13(%arg0: i32, %arg1: i32) -> (i32, i32) {
    %c0_i32 = arith.constant 0 : i32
    %c0_i32_0 = arith.constant 0 : i32
    %c0_i32_1 = arith.constant 0 : i32
    return %c0_i32, %c0_i32_0 : i32, i32
  }
  func.func @transform_14(%arg0: i32, %arg1: i32) -> (i32, i32) {
    %c0_i32 = arith.constant 0 : i32
    %c0_i32_0 = arith.constant 0 : i32
    %c0_i32_1 = arith.constant 0 : i32
    return %c0_i32, %c0_i32_0 : i32, i32
  }
  func.func @transform_15(%arg0: i32, %arg1: i32) -> (i32, i32) {
    %c0_i32 = arith.constant 0 : i32
    %c0_i32_0 = arith.constant 0 : i32
    %c0_i32_1 = arith.constant 0 : i32
    return %c0_i32, %c0_i32_0 : i32, i32
  }
  func.func @transform_16(%arg0: i32, %arg1: i32) -> (i32, i32) {
    %c0_i32 = arith.constant 0 : i32
    %c0_i32_0 = arith.constant 0 : i32
    %c0_i32_1 = arith.constant 0 : i32
    return %c0_i32, %c0_i32_0 : i32, i32
  }
  func.func @transform_17(%arg0: i32, %arg1: i32) -> (i32, i32) {
    %c0_i32 = arith.constant 0 : i32
    %c0_i32_0 = arith.constant 0 : i32
    %c0_i32_1 = arith.constant 0 : i32
    return %c0_i32, %c0_i32_0 : i32, i32
  }
  func.func @transform_18(%arg0: i32, %arg1: i32) -> (i32, i32) {
    %c0_i32 = arith.constant 0 : i32
    %c0_i32_0 = arith.constant 0 : i32
    %c0_i32_1 = arith.constant 0 : i32
    return %c0_i32, %c0_i32_0 : i32, i32
  }
  func.func @transform_19(%arg0: i32, %arg1: i32) -> (i32, i32, i32) {
    %0 = arith.muli %arg0, %arg1 : i32
    %c0_i32 = arith.constant 0 : i32
    %c0_i32_0 = arith.constant 0 : i32
    %c0_i32_1 = arith.constant 0 : i32
    return %0, %c0_i32, %c0_i32_0 : i32, i32, i32
  }
}

</mosaic_0001>

<bundles_post_ra>
// kernel: degradation_forward.1
= control target key start
LH: loop header
LB: loop body
LE: loop exit
PB: predicated region body
PF: predicated region fallthrough
CT: control target
= control target key end

     0   :  { %s5325_s0 = inlined_call_operand.vmem [shape: f32[2,16,16], index: 0, kind: input, shape index: {}]   ;;  %s5326_s1 = inlined_call_operand.hbm [shape: f32[2,10,16,16], index: 1, kind: input, shape index: {}]   ;;  %s5327_s2 = inlined_call_operand.vmem [shape: f32[2,8], index: 2, kind: input, shape index: {}]   ;;  %s5328_s3 = inlined_call_operand.vmem [shape: f32[2,1], index: 3, kind: input, shape index: {}]   ;;  %s5329_s4 = inlined_call_operand.vmem [shape: f32[15,10], index: 4, kind: input, shape index: {}]   ;;  %s5330_s5 = inlined_call_operand.vmem [shape: f32[6], index: 5, kind: input, shape index: {}]   ;;  %s5331_s6 = inlined_call_operand.vmem [shape: f32[1,8], index: 6, kind: input, shape index: {}]   ;;  %s5332_s7 = inlined_call_operand.vmem [shape: f32[16,16], index: 7, kind: input, shape index: {}]   ;;  %s5333_s8 = inlined_call_operand.vmem [shape: f32[16,32], index: 8, kind: input, shape index: {}]   ;;  %s5334_s9 = inlined_call_operand.vmem [shape: f32[1,32], index: 9, kind: input, shape index: {}]   ;;  %s5335_s10 = inlined_call_operand.vmem [shape: f32[32,16], index: 10, kind: input, shape index: {}]   ;;  %s5336_s11 = inlined_call_operand.vmem [shape: f32[1,16], index: 11, kind: input, shape index: {}]   ;;  %s5337_s12 = inlined_call_operand.vmem [shape: f32[32,16], index: 12, kind: input, shape index: {}]   ;;  %s5338_s13 = inlined_call_operand.vmem [shape: f32[32,1], index: 13, kind: input, shape index: {}]   ;;  %s5339_s14 = inlined_call_operand.vmem [shape: f32[16,32], index: 14, kind: input, shape index: {}]   ;;  %s5340_s15 = inlined_call_operand.vmem [shape: f32[16,1], index: 15, kind: input, shape index: {}]   ;;  %s5341_s16 = inlined_call_operand.vmem [shape: f32[8,16], index: 16, kind: input, shape index: {}]   ;;  %s5342_s17 = inlined_call_operand.vmem [shape: f32[1,16], index: 17, kind: input, shape index: {}]   ;;  %s5343_s18 = inlined_call_operand.vmem [shape: f32[1,16], index: 18, kind: input, shape index: {}]   ;;  %s5344_s19 = inlined_call_operand.hbm [shape: f32[2,16,16], index: 19, kind: output, shape index: {}]  }
   0x1   :  { %5562 = sst [smem:[#allocation109_spill]] %s5325_s0 }
   0x2   :  { %5563 = sst [smem:[#allocation110_spill]] %s5326_s1 }
   0x3   :  { %5564 = sst [smem:[#allocation111_spill]] %s5327_s2 }
   0x4   :  { %5565 = sst [smem:[#allocation112_spill]] %s5328_s3 }
   0x5   :  { %5566 = sst [smem:[#allocation113_spill]] %s5329_s4 }
   0x6   :  { %5567 = sst [smem:[#allocation114_spill]] %s5330_s5 }
   0x7   :  { %5568 = sst [smem:[#allocation115_spill]] %s5331_s6 }
   0x8   :  { %5569 = sst [smem:[#allocation116_spill]] %s5332_s7 }
   0x9   :  { %5570 = sst [smem:[#allocation117_spill]] %s5333_s8 }
   0xa   :  { %5571 = sst [smem:[#allocation118_spill]] %s5334_s9 }
   0xb   :  { %5572 = sst [smem:[#allocation119_spill]] %s5335_s10 }
   0xc   :  { %5573 = sst [smem:[#allocation120_spill]] %s5336_s11 }
   0xd   :  { %5574 = sst [smem:[#allocation121_spill]] %s5337_s12 }
   0xe   :  { %5575 = sst [smem:[#allocation122_spill]] %s5338_s13 }
   0xf   :  { %5576 = sst [smem:[#allocation123_spill]] %s5339_s14 }
  0x10   :  { %5577 = sst [smem:[#allocation124_spill]] %s5340_s15 }
  0x11   :  { %5578 = sst [smem:[#allocation125_spill]] %s5341_s16 }
  0x12   :  { %5579 = sst [smem:[#allocation126_spill]] %s5342_s17 }
  0x13   :  { %5580 = sst [smem:[#allocation127_spill]] %s5343_s18 }
  0x14   :  { %5581 = sst [smem:[#allocation128_spill]] %s5344_s19 }
  0x15   :  { %24 = vsyncpa [#allocation9], 0 }
  0x16   :  { %26 = vsyncpa [#allocation9 + $0x1], 0 }
  0x17   :  { %27 = vsyncpa [#allocation11], 0 }
  0x18   :  { %28 = vsyncpa [#allocation14], 0 }
  0x19   :  { %29 = vsyncpa [#allocation10], 0 }
  0x1a   :  { %31 = vsyncpa [#allocation10 + $0x1], 0  ;;  %s3401_s0 = smov 0   ;;  %s3403_s30 = smov 0  }
  0x1b   :  { %s3405_s20 = smov 0   ;;  %s3407_s21 = smov 0  }
  0x1c   :  { %s3409_s1 = smov 0   ;;  %s3411_s22 = smov 0  }
  0x1d   :  { %s3413_s2 = smov 0   ;;  %s3415_s23 = smov 0  }
  0x1e   :  { %s3417_s24 = smov 0   ;;  %s3419_s25 = smov 0  }
  0x1f   :  { %s3421_s3 = smov 0  }
  0x20 LB: > { %5582 = sst [smem:[#allocation20_spill]] %s3246_s0  ;;  %s2608_s26 = sadd.s32 4294967295, %s3286_s3   ;;  %s3286_s3 = sphi %s3421_s3, %s37_s3   ;;  %s3282_s25 = sphi %s3419_s25, %s5933_s25   ;;  %s3278_s24 = sphi %s3417_s24, %s5932_s24   ;;  %s3274_s23 = sphi %s3415_s23, %s5931_s23   ;;  %s3270_s2 = sphi %s3413_s2, %s5930_s2   ;;  %s3266_s22 = sphi %s3411_s22, %s5929_s22   ;;  %s3262_s1 = sphi %s3409_s1, %s5928_s1   ;;  %s3258_s21 = sphi %s3407_s21, %s5927_s21   ;;  %s3254_s20 = sphi %s3405_s20, %s5926_s20   ;;  %s3250_s30 = sphi %s3403_s30, %s5925_s30   ;;  %s3246_s0 = sphi %s3401_s0, %s5924_s0  }
  0x21   : > { %5583 = sst [smem:[#allocation21_spill]] %s3250_s30  ;;  %s2609_s27 = sadd.s32 4294967294, %s3286_s3  }
  0x22   : > { %5584 = sst [smem:[#allocation22_spill]] %s3254_s20  ;;  %p107_p0 = scmp.ne.s32.totalorder %s3262_s1, %s3258_s21 }
  0x23   : > { %5585 = sst [smem:[#allocation23_spill]] %s3262_s1  ;;  %p3457_p1 = scmp.eq.s32.totalorder %s2608_s26, 0 }
  0x24   : > { %5586 = sst [smem:[#allocation24_spill]] %s3266_s22  ;;  %p489_p2 = scmp.ne.s32.totalorder %s3254_s20, %s3250_s30 }
  0x25   : > { %5587 = sst [smem:[#allocation25_spill]] %s3270_s2  ;;  %p490_p3 = scmp.eq.s32.totalorder %s2608_s26, 3 }
  0x26   : > { %5588 = sst [smem:[#allocation26_spill]] %s3274_s23  ;;  %p3465_p4 = por %p3457_p1, %p107_p0 }
  0x27   : > { %5589 = sst [smem:[#allocation27_spill]] %s3278_s24  ;;  %p495_p5 = scmp.ne.s32.totalorder %s3250_s30, %s3246_s0 }
  0x28   : > { %5590 = sst [smem:[#allocation28_spill]] %s3282_s25  ;;  %p3471_p6 = por %p490_p3, %p489_p2 }
  0x29   : > { %5591 = sst [smem:[#allocation29_spill]] %s3286_s3  ;;  %p496_p7 = scmp.eq.s32.totalorder %s2609_s27, 3 }
  0x2a   : > { %s5592_s28 = scalar_select %p3457_p1, 1, 0 }
  0x2b   : > { %s5593_s29 = scalar_select %p3465_p4, 1, 0 }
  0x2c   : > { %s5594_s19 = scalar_select %p3471_p6, 1, 0 }
  0x2d   : > { %p2610_p8 = scmp.ge.s32.totalorder %s3286_s3, 1  ;;  %p503_p9 = scmp.lt.s32.totalorder %s3286_s3, 5 }
  0x2e   : > { %5595 = sst [smem:[#allocation30_spill]] %s5594_s19  ;;  %p3477_p10 = por %p496_p7, %p495_p5 }
  0x2f   : > { %p3481_p11 = pnand %p2610_p8, %p503_p9  ;;  %s5599_s4 = sld [smem:[#allocation113_spill]] }
  0x30   : > { %s5596_s21 = scalar_select %p3477_p10, 1, 0 }
  0x31   : > { %p2906_p12 = pneg %p3481_p11  ;;  %s5601_s5 = sld [smem:[#allocation114_spill]] }
  0x32   : > { %5597 = sst [smem:[#allocation31_spill]] %s5596_s21 }
  0x33   : > { %p3492_p13 = pnand %p2906_p12, %p3457_p1 }
  0x35   : > { %s521_s0 = sshll.u32 %s5599_s4, 4  ;;  %p3102_p2 = pneg %p3492_p13  ;;  %s522_s0 = int_to_ptr.vmem [resolvable:$true] %s521_s0 }
  0x36   : > { %s3100_s11 = scalar_lea.vmem %s522_s0, 256  ;;  %p3108_p7 = scmp.lt.s32.totalorder %s522_s0, %s522_s0 }
  0x37   : > { %s535_s21 = sshll.u32 %s5601_s5, 4  ;;  %p3101_p0 = scmp.ne.s32.totalorder %s522_s0, %s3100_s11  ;;  %s536_s21 = int_to_ptr.vmem [resolvable:$true] %s535_s21 }
  0x38   : > { %p3109_p8 = scmp.lt.s32.totalorder %s3100_s11, %s3100_s11 }
  0x39   : > { %p3103_p3 = pnand %p3102_p2, %p3101_p0 }
  0x3a   : > { %p3110_p9 = por %p3109_p8, %p3108_p7 }
  0x3b   : > { %p3104_p5 = pneg %p3103_p3 }
  0x3d   : > { %p3111_p12 = pnand %p3110_p9, %p3104_p5 }
  0x3f   : > { %3114 = shalt.err (!%p3111_p12)
}
  0x40   : > { %s3288_s17 = smov [#allocation12]   ;;  %s5352_s16 = smov 128  }
  0x41   : > { %s5353_s19 = smov 8   ;;  %s3115_s26 = scalar_lea.vmem %s536_s21, 16 }
  0x42   : > { %2909 = dma.vmem_to_smem (!%p3492_p13), %s522_s0, 256, %s3288_s17, [#allocation11], %s5352_s16, %s5352_s16, %s5353_s19  }
  0x43   : > { %p3116_p10 = scmp.ne.s32.totalorder %s536_s21, %s3115_s26  ;;  %p3123_p6 = scmp.lt.s32.totalorder %s536_s21, %s536_s21 }
  0x44   : > { %p3124_p7 = scmp.lt.s32.totalorder %s3115_s26, %s3115_s26 }
  0x45   : > { %p3118_p0 = pnand %p3116_p10, %p3102_p2 }
  0x46   : > { %p3125_p5 = por %p3124_p7, %p3123_p6 }
  0x47   : > { %p3119_p3 = pneg %p3118_p0 }
  0x49   : > { %p3126_p8 = pnand %p3125_p5, %p3119_p3 }
  0x4b   : > { %3129 = shalt.err (!%p3126_p8)
}
  0x4c   : > { %s3291_s11 = smov [#allocation13]   ;;  %s46_s0 = sadd.s32 1, %s3278_s24 }
  0x4d   : > { %2912 = dma.vmem_to_smem (!%p3492_p13), %s536_s21, 16, %s3291_s11, [#allocation14]  }
  0x4e   : > { %p47_p6 = scmp.ge.s32.totalorder %s46_s0, 2  ;;  %s49_s17 = sadd.s32 1, %s3282_s25 }
  0x4f   : > { %s85_s26 = ssub.s32 1, %s3282_s25  ;;  %s94_s27 = sadd.s32 1, %s3266_s22 }
  0x50   : > { %s5935_s0 = smov (%p47_p6, %s46_s0), 0  ;;  %s5937_s17 = smov (!%p47_p6, %s49_s17), %s3282_s25 }
  0x51   : > { %5602 = sst [smem:[#allocation32_spill]] %s5935_s0  ;;  %s86_s16 = smul.u32 %s3278_s24, %s85_s26 }
  0x52   : > { %p101_p10 = scmp.ne.s32.totalorder %s3266_s22, %s3262_s1  ;;  %p51_p2 = scmp.ge.s32.totalorder %s5937_s17, 2 }
  0x53   : > { %p102_p9 = scmp.eq.s32.totalorder %s3286_s3, 0  ;;  %s87_s19 = sadd.s32 %s3282_s25, %s86_s16 }
  0x54   : > { %s474_s21 = smul.u32 %s3278_s24, %s3282_s25  ;;  %s5939_s17 = smov (%p51_p2, %s5937_s17), 0 }
  0x55   : > { %5603 = sst [smem:[#allocation33_spill]] %s5939_s17  ;;  %p3530_p13 = por %p102_p9, %p101_p10 }
  0x56   : > { %s479_s4 = sadd.s32 1, %s3254_s20  ;;  %s88_s5 = ssub.s32 1, %s5939_s17 }
  0x57   : > { %s475_s26 = smul.u32 %s5939_s17, %s5935_s0  ;;  %p2923_p12 = scmp.lt.s32.totalorder %s3286_s3, 4 }
  0x58   : > { %s89_s9 = smul.u32 %s88_s5, %s5935_s0  ;;  %s599_s14 = sand.u32 1, %s3266_s22  }
  0x59   : > { %s476_s16 = ssub.s32 %s474_s21, %s475_s26  ;;  %s2887_s10 = smul.u32 160, %s599_s14 }
  0x5a   : > { %s90_s25 = sadd.s32 %s89_s9, %s5939_s17  ;;  %p477_p0 = scmp.eq.s32.totalorder %s476_s16, 0 }
  0x5b   : > { %s91_s24 = ssub.s32 %s87_s19, %s90_s25  ;;  %s2888_s7 = smul.u32 2560, %s87_s19 }
  0x5c   : > { %p92_p3 = scmp.eq.s32.totalorder %s91_s24, 0  ;;  %s603_s12 = scalar_lea.vmem [#allocation8], %s2887_s10 }
  0x5d   : > { %s3543_s15 = scalar_select %p477_p0, %s3254_s20, %s479_s4  }
  0x5e   : > { %s3546_s13 = scalar_select %p92_p3, %s3266_s22, %s94_s27  }
  0x5f   : > { %5605 = sst [smem:[#allocation34_spill]] %s3543_s15  ;;  %s613_s8 = sshll.u32 %s603_s12, 4  ;;  %s614_s8 = int_to_ptr.vmem [resolvable:$true] %s613_s8 }
  0x60   : > { %5606 = sst [smem:[#allocation35_spill]] %s3546_s13  ;;  %p3552_p7 = pnand %p2923_p12, %p3530_p13 }
  0x61   : > { %s5608_s9 = sld [smem:[#allocation110_spill]]  ;;  %s600_s4 = scalar_lea.sflag [#allocation9], %s599_s14 }
  0x62   : > { %p3132_p8 = pneg %p3552_p7 }
  0x67   : > { %s3559_s25 = scalar_lea.hbm %s5608_s9, %s2888_s7  ;;  %s3135_s19 = scalar_lea.hbm %s5608_s9, 5120 }
  0x68   : > { %s3130_s24 = scalar_lea.hbm %s3559_s25, 2560 }
  0x69   : > { %p3131_p5 = scmp.ne.s32.totalorder %s3559_s25, %s3130_s24  ;;  %p3137_p2 = scmp.lt.s32.totalorder %s3135_s19, %s3130_s24 }
  0x6b   : > { %p3133_p6 = pnand %p3132_p8, %p3131_p5 }
  0x6d   : > { %p3134_p10 = pneg %p3133_p6 }
  0x6f   : > { %p3139_p9 = pnand %p3137_p2, %p3134_p10 }
  0x71   : > { %3142 = shalt.err (!%p3139_p9)
}
  0x72   : > { %s3143_s27 = scalar_lea.vmem %s614_s8, 2560  ;;  %s3292_s7 = smov [#allocation8]  }
  0x73   : > { %p3144_p13 = scmp.ne.s32.totalorder %s614_s8, %s3143_s27  ;;  %s3148_s11 = sshll.u32 %s3292_s7, 4  ;;  %s3149_s11 = int_to_ptr.vmem [resolvable:$false] %s3148_s11 }
  0x74   : > { %s3150_s14 = scalar_lea.vmem %s3149_s11, 5120  ;;  %p3151_p3 = scmp.lt.s32.totalorder %s614_s8, %s3149_s11 }
  0x75   : > { %p3146_p12 = pnand %p3144_p13, %p3132_p8  ;;  %p3152_p1 = scmp.lt.s32.totalorder %s3150_s14, %s3143_s27 }
  0x77   : > { %p3147_p0 = pneg %p3146_p12  ;;  %p3153_p4 = por %p3152_p1, %p3151_p3 }
  0x79   : > { %p3154_p5 = pnand %p3153_p4, %p3147_p0 }
  0x7b   : > { %3157 = shalt.err (!%p3154_p5)
}
  0x7c   : > { %s5609_s26 = smov 8   ;;  %s5610_s16 = smov 128  }
  0x7d   : > { %2916 = dma.hbm_to_vmem [thread:$0]  (!%p3552_p7), %s3559_s25, 2560, %s614_s8, %s600_s4, %s5610_s16, %s5610_s16, %s5609_s26  }
  0x7e   : > { %625 = sbr.rel (%p3481_p11) target bundleno = 1578 (0x62a), region = 96 }
  0x83   : > { %s627_s5 = sand.u32 1, %s3262_s1   ;;  %p5611_p1 = scmp.ne.s32.totalorder %s5593_s29, 0 }
  0x84   : > { %s2889_s21 = smul.u32 160, %s627_s5  ;;  %s628_s24 = scalar_lea.sflag [#allocation9], %s627_s5 }
  0x86   : > { %s3577_s10 = scalar_lea.vmem [#allocation8], %s2889_s21 }
  0x87   : > { %3229 = dma.done.wait (%p5611_p1), %s628_s24, 2560  }
  0x88   : > { %3231 = vsyncadd (%p5611_p1), %s628_s24, 4294964736  ;;  %p5612_p4 = scmp.ne.s32.totalorder %s5592_s28, 0 }
  0x8a   : > { %3233 = dma.done.wait (%p5612_p4), [#allocation11], 256  }
  0x8b   : > { %3235 = vsyncadd (%p5612_p4), [#allocation11], 4294967040 }
  0x8c   : > { %3237 = dma.done.wait (%p5612_p4), [#allocation14], 16  }
  0x8d   : > { %3239 = vsyncadd (%p5612_p4), [#allocation14], 4294967280 }
  0x8e   : > { %644 = sfence }
  0x8f   : > { %s5366_s6 = sand.u32 1, %s3250_s30   ;;  %s703_s8 = ssub.s32 1, %s3274_s23 }
  0x90   : > { %s2618_s18 = sshll.u32 %s5366_s6, 4  ;;  %s704_s29 = smul.u32 %s3270_s2, %s703_s8 }
  0x91   : > { %p718_p11 = scmp.eq.s32.totalorder %s3274_s23, 0  ;;  %p719_p7 = scmp.eq.s32.totalorder %s3270_s2, 0 }
  0x92   : > { %s705_s25 = sadd.s32 %s3274_s23, %s704_s29  ;;  %s5613_s19 = sld [smem:[#allocation109_spill]] }
  0x93   : > { %p706_p8 = scmp.lt.s32.totalorder %s705_s25, 1  ;;  %p720_p6 = pnand %p719_p7, %p718_p11 }
  0x94   : > { %s3604_s7 = scalar_lea.vmem [#allocation15], %s2618_s18 }
  0x95   : > { %s5941_s25 = smov (!%p706_p8, %s705_s25), 1  ;;  %5614 = sst [smem:[#allocation36_spill]] %s3604_s7 }
  0x96   : > { %s2817_s28 = sshll.u32 %s5941_s25, 4  ;;  %723 = sbr.rel (%p720_p6) target bundleno = 159 (0x9f), region = 112 }
  0x98   : > { %s3602_s27 = scalar_lea.vmem %s5613_s19, %s2817_s28 }
  0x9b   : > { %vm724_vm0 = vcmask 7168   ;;  %vm729_vm1 = vcmask 122880   ;;  %v3293_v0 = vmov 0.0  }
  0x9c   : > { %725 = vst.msk [vmem:[#allocation4] sm:$0xff] %vm724_vm0, %v3293_v0  ;;  %726 = vst.msk [vmem:[#allocation4 + $0x8] sm:$0xff] %vm724_vm0, %v3293_v0 }
  0x9d   : > { %727 = vst.msk [vmem:[#allocation5] sm:$0xff] %vm724_vm0, %v3293_v0  ;;  %728 = vst.msk [vmem:[#allocation5 + $0x8] sm:$0xff] %vm724_vm0, %v3293_v0 }
  0x9e   : > { %730 = vst.msk [vmem:[#allocation6] sm:$0x1] %vm729_vm1, %v3293_v0  ;;  %731 = vst.msk [vmem:[#allocation7] sm:$0x1] %vm729_vm1, %v3293_v0 }
  0x9f PF: > { %s5615_s26 = sld [smem:[#allocation111_spill]]  ;;  %p2621_p10 = scmp.ne.s32.totalorder %s3274_s23, 0 }
  0xa2   : > { %736 = sbr.rel (%p2621_p10) target bundleno = 1077 (0x435), region = 116 }
  0xa5   : > { %s732_s16 = scalar_lea.vmem %s5615_s26, %s3270_s2 }
  0xa6   : > { %v3610_v1 = vld [vmem:[%s732_s16] sm:$0x1] }
  0xa7   : > { %s5616_s24 = sld [smem:[#allocation115_spill]]  ;;  %vm1720_vm2 = vcmask 57344   ;;  %v3635_v6 = vld [vmem:[%s3577_s10] sm:$0xff]  ;;  %v3639_v8 = vld [vmem:[%s3577_s10 + $0x10] sm:$0xff]  ;;  %v3678_v25 = vld [vmem:[%s3577_s10 + $0x8] sm:$0xff]  ;;  %vm1754_vm3 = vcmask 130048  }
  0xa8   : > { %s3617_s8 = sld [smem:[#allocation12 + $0x80]]  ;;  %v3659_v16 = vld [vmem:[%s3577_s10 + $0x20] sm:$0xff]  ;;  %v3672_v23 = vld [vmem:[%s3577_s10 + $0x30] sm:$0xff]  ;;  %v3681_v26 = vld [vmem:[%s3577_s10 + $0x18] sm:$0xff]  ;;  %vm1849_vm4 = vcmask 261120   ;;  %vm2204_vm5 = vcmask 122880  }
  0xa9   : > { %s3619_s18 = sld [smem:[#allocation12 + $0x100]]  ;;  %v3697_v36 = vld [vmem:[%s3577_s10 + $0x40] sm:$0xff]  ;;  %v3713_v43 = vld [vmem:[%s3577_s10 + $0x28] sm:$0xff]  ;;  %v3726_v50 = vld [vmem:[%s3577_s10 + $0x50] sm:$0xff]  ;;  %vm2176_vm6 = vcmask 7168  }
  0xaa   : > { %s3621_s29 = sld [smem:[#allocation12 + $0x81]]  ;;  %v3739_v57 = vld [vmem:[%s3577_s10 + $0x38] sm:$0xff] }
  0xab   : > { %s3623_s25 = sld [smem:[#allocation12 + $0x101]] }
  0xac   : > { %s3625_s28 = sld [smem:[#allocation12 + $0x82]] }
  0xad   : > { %v1718_v2 = vld [vmem:[%s5616_s24] sm:$0x1]  ;;  %s3627_s4 = sld [smem:[#allocation12 + $0x102]] }
  0xae   : > { %v1719_v3 = vmul.f32 %v1718_v2, %v3610_v1  ;;  %s3629_s12 = sld [smem:[#allocation13]]  ;;  %v746_v5 = vstv %s3617_s8  ;;  %v3754_v2 = vld [vmem:[%s3577_s10 + $0x60] sm:$0xff] }
  0xaf   : > { %s3632_s19 = sld [smem:[#allocation12 + $0x83]]  ;;  %v750_v7 = vstv %s3619_s18  ;;  %v747_v11 = vmul.f32 %v746_v5, %v3635_v6  ;;  %v748_v27 = vmul.f32 %v746_v5, %v3678_v25 }
  0xb0   : > { %v1721_v4 = vsel %vm1720_vm2, %v1719_v3, 0.0  ;;  %v763_v9 = vstv %s3621_s29  ;;  %s3642_s11 = sld [smem:[#allocation12 + $0x103]]  ;;  %v751_v13 = vmul.f32 %v750_v7, %v3635_v6  ;;  %v752_v38 = vmul.f32 %v750_v7, %v3678_v25 }
  0xb1   : > { %1722 = vadd.xlane.f32.xlu0 %v1721_v4  ;;  %v769_v10 = vstv %s3623_s25  ;;  %s3645_s14 = sld [smem:[#allocation12 + $0x84]]  ;;  %v764_v12 = vmul.f32 %v3639_v8, %v763_v9  ;;  %v765_v28 = vmul.f32 %v3681_v26, %v763_v9 }
  0xb2   : > { %s3649_s26 = sld [smem:[#allocation12 + $0x104]]  ;;  %v770_v14 = vmul.f32 %v3639_v8, %v769_v10  ;;  %v784_v15 = vstv %s3625_s28  ;;  %v771_v39 = vmul.f32 %v3681_v26, %v769_v10 }
  0xb3   : > { %s3654_s16 = sld [smem:[#allocation12 + $0x85]]  ;;  %v790_v17 = vstv %s3627_s4  ;;  %v766_v18 = vadd.f32 %v764_v12, %v747_v11  ;;  %v785_v19 = vmul.f32 %v3659_v16, %v784_v15  ;;  %v767_v42 = vadd.f32 %v765_v28, %v748_v27  ;;  %v3770_v12 = vld [vmem:[%s3577_s10 + $0x48] sm:$0xff] }
  0xb4   : > { %5617 = sst [smem:[#allocation37_spill]] %s3629_s12  ;;  %v772_v20 = vadd.f32 %v770_v14, %v751_v13  ;;  %v791_v21 = vmul.f32 %v3659_v16, %v790_v17  ;;  %v786_v47 = vmul.f32 %v3713_v43, %v784_v15  ;;  %v773_v53 = vadd.f32 %v771_v39, %v752_v38 }
  0xb5   : > { %s3656_s5 = sld [smem:[#allocation12]]  ;;  %v805_v22 = vstv %s3632_s19  ;;  %v787_v30 = vadd.f32 %v785_v19, %v766_v18  ;;  %v792_v54 = vmul.f32 %v3713_v43, %v790_v17  ;;  %v3781_v19 = vld [vmem:[%s3577_s10 + $0x70] sm:$0xff] }
  0xb6   : > { %s3662_s21 = sld [smem:[#allocation12 + $0x1]]  ;;  %v811_v24 = vstv %s3642_s11  ;;  %v806_v31 = vmul.f32 %v3672_v23, %v805_v22  ;;  %v793_v33 = vadd.f32 %v791_v21, %v772_v20  ;;  %v788_v60 = vadd.f32 %v786_v47, %v767_v42  ;;  %v3823_v42 = vld [vmem:[%s3577_s10 + $0x80] sm:$0xff] }
  0xb7   : > { %s3664_s24 = sld [smem:[#allocation12 + $0x2]]  ;;  %v812_v34 = vmul.f32 %v3672_v23, %v811_v24  ;;  %v826_v35 = vstv %s3645_s14  ;;  %v807_v0 = vmul.f32 %v3739_v57, %v805_v22  ;;  %v794_v4 = vadd.f32 %v792_v54, %v773_v53 }
  0xb8   : > { %s3669_s8 = sld [smem:[#allocation12 + $0x105]]  ;;  %v832_v37 = vstv %s3649_s26  ;;  %v808_v45 = vadd.f32 %v806_v31, %v787_v30  ;;  %v827_v46 = vmul.f32 %v3697_v36, %v826_v35  ;;  %v813_v5 = vmul.f32 %v3739_v57, %v811_v24 }
  0xb9   : > { %s3675_s18 = sld [smem:[#allocation12 + $0x86]]  ;;  %v814_v48 = vadd.f32 %v812_v34, %v793_v33  ;;  %v833_v49 = vmul.f32 %v3697_v36, %v832_v37  ;;  %v847_v51 = vstv %s3654_s16  ;;  %v809_v17 = vadd.f32 %v807_v0, %v788_v60 }
  0xba   : > { %s3683_s29 = sld [smem:[#allocation12 + $0x3]]  ;;  %v829_v59 = vadd.f32 %v827_v46, %v808_v45  ;;  %v848_v62 = vmul.f32 %v3726_v50, %v847_v51  ;;  %v815_v21 = vadd.f32 %v813_v5, %v794_v4  ;;  %v828_v22 = vmul.f32 %v3770_v12, %v826_v35 }
  0xbb   : > { %v742_v29 = vstv %s3656_s5  ;;  %s3689_s25 = sld [smem:[#allocation12 + $0x106]]  ;;  %v835_v61 = vadd.f32 %v833_v49, %v814_v48  ;;  %v834_v33 = vmul.f32 %v3770_v12, %v832_v37  ;;  %v3817_v37 = vld [vmem:[%s3577_s10 + $0x58] sm:$0xff] }
  0xbc   : > { %v757_v32 = vstv %s3662_s21  ;;  %s3693_s28 = sld [smem:[#allocation12 + $0x4]]  ;;  %v743_v40 = vmul.f32 %v742_v29, %v3635_v6  ;;  %v850_v13 = vadd.f32 %v848_v62, %v829_v59  ;;  %v744_v35 = vmul.f32 %v742_v29, %v3678_v25 }
  0xbd   : > { %s3700_s4 = sld [smem:[#allocation12 + $0x87]]  ;;  %v758_v41 = vmul.f32 %v3639_v8, %v757_v32  ;;  %v778_v44 = vstv %s3664_s24  ;;  %v759_v38 = vmul.f32 %v3681_v26, %v757_v32  ;;  %v3831_v45 = vmul.f32 %v3817_v37, %v847_v51 }
  0xbe   : > { %s3710_s19 = sld [smem:[#allocation12 + $0x5]]  ;;  %v853_v52 = vstv %s3669_s8  ;;  %v779_v56 = vmul.f32 %v3659_v16, %v778_v44  ;;  %v3838_v48 = vadd.f32 %v828_v22, %v809_v17  ;;  %v3840_v49 = vadd.f32 %v834_v33, %v815_v21 }
  0xbf   : > { %s3717_s11 = sld [smem:[#allocation12 + $0x107]]  ;;  %v760_v55 = vadd.f32 %v758_v41, %v743_v40  ;;  %v854_v63 = vmul.f32 %v3726_v50, %v853_v52  ;;  %v868_v10 = vstv %s3675_s18  ;;  %v761_v51 = vadd.f32 %v759_v38, %v744_v35 }
  0xc0   : > { %s3723_s14 = sld [smem:[#allocation12 + $0x6]]  ;;  %v799_v58 = vstv %s3683_s29  ;;  %v869_v18 = vmul.f32 %v3754_v2, %v868_v10 }
  0xc1   : > { %s3730_s6 = sld [smem:[#allocation12 + $0x88]]  ;;  %v874_v3 = vstv %s3689_s25  ;;  %v781_v7 = vadd.f32 %v779_v56, %v760_v55  ;;  %v800_v9 = vmul.f32 %v3672_v23, %v799_v58  ;;  %v856_v14 = vadd.f32 %v854_v63, %v835_v61  ;;  %v3857_v63 = vld [vmem:[%s3577_s10 + $0x90] sm:$0xff] }
  0xc2   : > { %s3736_s9 = sld [smem:[#allocation12 + $0x7]]  ;;  %v820_v11 = vstv %s3693_s28  ;;  %v875_v15 = vmul.f32 %v3754_v2, %v874_v3  ;;  %v871_v41 = vadd.f32 %v869_v18, %v850_v13  ;;  %v780_v55 = vmul.f32 %v3713_v43, %v778_v44 }
  0xc3   : > { %s3742_s17 = sld [smem:[#allocation12 + $0x108]]  ;;  %v802_v28 = vadd.f32 %v800_v9, %v781_v7  ;;  %v821_v30 = vmul.f32 %v3697_v36, %v820_v11  ;;  %v889_v31 = vstv %s3700_s4 }
  0xc4   : > { %s3750_s0 = sld [smem:[#allocation12 + $0x8]]  ;;  %v841_v34 = vstv %s3710_s19  ;;  %v877_v39 = vadd.f32 %v875_v15, %v856_v14  ;;  %v890_v29 = vmul.f32 %v3781_v19, %v889_v31  ;;  %v782_v18 = vadd.f32 %v780_v55, %v761_v51 }
  0xc5   : > { %s3757_s13 = sld [smem:[#allocation12 + $0x89]]  ;;  %v895_v20 = vstv %s3717_s11  ;;  %v823_v46 = vadd.f32 %v821_v30, %v802_v28  ;;  %v842_v47 = vmul.f32 %v3726_v50, %v841_v34 }
  0xc6   : > { %s3764_s22 = sld [smem:[#allocation12 + $0x9]]  ;;  %v896_v40 = vmul.f32 %v3781_v19, %v895_v20  ;;  %v862_v53 = vstv %s3723_s14  ;;  %v892_v62 = vadd.f32 %v890_v29, %v871_v41 }
  0xc7   : > { %s3767_s1 = sld [smem:[#allocation12 + $0x109]]  ;;  %v910_v59 = vstv %s3730_s6  ;;  %v863_v5 = vmul.f32 %v3754_v2, %v862_v53  ;;  %v844_v28 = vadd.f32 %v842_v47, %v823_v46 }
  0xc8   : > { %s3775_s15 = sld [smem:[#allocation12 + $0x200]]  ;;  %v898_v56 = vadd.f32 %v896_v40, %v877_v39  ;;  %v911_v14 = vmul.f32 %v3823_v42, %v910_v59 }
  0xc9   : > { %s3784_s20 = sld [smem:[#allocation12 + $0x280]]  ;;  %v916_v32 = vstv %s3742_s17 }
  0xca   : > { %s5620_s7 = sld [smem:[#allocation117_spill]]  ;;  %v917_v60 = vmul.f32 %v3823_v42, %v916_v32  ;;  %v913_v29 = vadd.f32 %v911_v14, %v892_v62  ;;  %v822_v14 = vmul.f32 %v3770_v12, %v820_v11 }
  0xcb   : > { %s3797_s12 = sld [smem:[#allocation12 + $0x180]]  ;;  %v931_v15 = vstv %s3757_s13 }
  0xcc   : > { %5618 = sst [smem:[#allocation38_spill]] %s3764_s22  ;;  %v919_v21 = vadd.f32 %v917_v60, %v898_v56  ;;  %v932_v46 = vmul.f32 %v3857_v63, %v931_v15 }
  0xcd   : > { %s3803_s30 = sld [smem:[#allocation12 + $0x201]]  ;;  %v937_v0 = vstv %s3767_s1 }
  0xce   : > { %s3814_s2 = sld [smem:[#allocation12 + $0x281]]  ;;  %v963_v54 = vstv %s3775_s15  ;;  %v938_v22 = vmul.f32 %v3857_v63, %v937_v0 }
  0xcf   : > { %5619 = sst [smem:[#allocation39_spill]] %s3784_s20  ;;  %v967_v61 = vstv %s3784_s20  ;;  %v964_v7 = vmul.f32 %v963_v54, %v3635_v6 }
  0xd0   : > { %v1746_v24 = vld [vmem:[%s5620_s7 + $0x8] sm:$0xff]  ;;  %v1745_v27 = vld [vmem:[%s5620_s7] sm:$0xff]  ;;  %s3826_s23 = sld [smem:[#allocation12 + $0x181]]  ;;  %v968_v44 = vmul.f32 %v967_v61, %v3635_v6  ;;  %v940_v51 = vadd.f32 %v938_v22, %v919_v21  ;;  %v855_v22 = vmul.f32 %v3817_v37, %v853_v52  ;;  %v904_v52 = vstv %s3750_s0 }
  0xd1   : > { %2843 = vmatprep.subr.mxu1 %v1746_v24  ;;  %s3836_s3 = sld [smem:[#allocation12 + $0x202]]  ;;  %v959_v30 = vstv %s3797_s12 }
  0xd2   : > { %2844 = vmatpush3.msra.mxu1 %v1746_v24  ;;  %s3844_s26 = sld [smem:[#allocation12 + $0x282]]  ;;  %v960_v62 = vmul.f32 %v959_v30, %v3635_v6 }
  0xd3   : > { %5621 = sst [smem:[#allocation40_spill]] %s3803_s30  ;;  %2845 = vmatprep.subr.mxu1 %v1745_v27  ;;  %v977_v4 = vstv %s3803_s30 }
  0xd4   : > { %5622 = sst [smem:[#allocation41_spill]] %s3814_s2  ;;  %2846 = vmatpush3.msra.mxu1 %v1745_v27  ;;  %v978_v9 = vmul.f32 %v3639_v8, %v977_v4  ;;  %v983_v13 = vstv %s3814_s2  ;;  %v801_v27 = vmul.f32 %v3739_v57, %v799_v58  ;;  %v883_v58 = vstv %s3736_s9 }
  0xd5   : > { %s3854_s16 = sld [smem:[#allocation12 + $0x182]]  ;;  %v984_v17 = vmul.f32 %v3639_v8, %v983_v13 }
  0xd6   : > { %s3864_s5 = sld [smem:[#allocation12 + $0x203]]  ;;  %v971_v38 = vstv %s3826_s23  ;;  %v980_v39 = vadd.f32 %v978_v9, %v964_v7  ;;  %v803_v60 = vadd.f32 %v801_v27, %v782_v18 }
  0xd7   : > { %5623 = sst [smem:[#allocation42_spill]] %s3836_s3  ;;  %v5398_v24 = vstv %s3836_s3  ;;  %v986_v33 = vadd.f32 %v984_v17, %v968_v44  ;;  %v3920_v44 = vld [vmem:[%s3602_s27] sm:$0xff]  ;;  %v972_v7 = vmul.f32 %v3639_v8, %v971_v38  ;;  %v884_v17 = vmul.f32 %v3781_v19, %v883_v58 }
  0xd8   : > { %5624 = sst [smem:[#allocation43_spill]] %s3844_s26  ;;  %v5390_v35 = vstv %s3844_s26  ;;  %v996_v40 = vmul.f32 %v3659_v16, %v5398_v24 }
  0xd9   : > { %s3876_s21 = sld [smem:[#allocation12 + $0x283]]  ;;  %v1002_v41 = vmul.f32 %v3659_v16, %v5390_v35  ;;  %v843_v35 = vmul.f32 %v3817_v37, %v841_v34 }
  0xda   : > { %s3885_s24 = sld [smem:[#allocation12 + $0x183]]  ;;  %v998_v18 = vadd.f32 %v996_v40, %v980_v39  ;;  %v865_v39 = vadd.f32 %v863_v5, %v844_v28  ;;  %v934_v40 = vadd.f32 %v932_v46, %v913_v29 }
  0xdb   : > { %s3891_s7 = sld [smem:[#allocation12 + $0x204]]  ;;  %v1004_v55 = vadd.f32 %v1002_v41, %v986_v33  ;;  %v5399_v27 = vstv %s3854_s16 }
  0xdc   : > { %5625 = sst [smem:[#allocation44_spill]] %s3864_s5  ;;  %v5388_v47 = vstv %s3864_s5  ;;  %v990_v5 = vmul.f32 %v3659_v16, %v5399_v27 }
  0xdd   : > { %s3898_s2 = sld [smem:[#allocation12 + $0x284]]  ;;  %v1014_v21 = vmul.f32 %v3672_v23, %v5388_v47 }
  0xde   : > { %s3907_s29 = sld [smem:[#allocation12 + $0x184]] }
  0xdf   : > { %5626 = sst [smem:[#allocation45_spill]] %s3876_s21  ;;  %v5387_v56 = vstv %s3876_s21  ;;  %v1016_v28 = vadd.f32 %v1014_v21, %v998_v18  ;;  %v942_v18 = vsub.f32 0.0, %v934_v40 }
  0xe0   : > { %5627 = sst [smem:[#allocation46_spill]] %s3885_s24  ;;  %v1020_v9 = vmul.f32 %v3672_v23, %v5387_v56  ;;  %v944_v56 = vsub.f32 %v3920_v44, %v940_v51  ;;  %v1007_v51 = vstv %s3885_s24 }
  0xe1   : > { %5628 = sst [smem:[#allocation47_spill]] %s3891_s7  ;;  %v5396_v41 = vstv %s3891_s7  ;;  %v1008_v40 = vmul.f32 %v3672_v23, %v1007_v51 }
  0xe2   : > { %s3914_s20 = sld [smem:[#allocation12 + $0x205]]  ;;  %v1022_v33 = vadd.f32 %v1020_v9, %v1004_v55  ;;  %v974_v55 = vadd.f32 %v972_v7, %v960_v62  ;;  %v824_v9 = vadd.f32 %v822_v14, %v803_v60  ;;  %v1032_v29 = vmul.f32 %v3697_v36, %v5396_v41 }
  0xe3   : > { %5629 = sst [smem:[#allocation48_spill]] %s3898_s2  ;;  %v5393_v11 = vstv %s3898_s2  ;;  %v886_v7 = vadd.f32 %v884_v17, %v865_v39  ;;  %v905_v14 = vmul.f32 %v3823_v42, %v904_v52  ;;  %v946_v21 = vmul.f32 %v944_v56, %v944_v56 }
  0xe4   : > { %s3917_s26 = sld [smem:[#allocation12 + $0x285]]  ;;  %v1038_v47 = vmul.f32 %v3697_v36, %v5393_v11  ;;  %v992_v39 = vadd.f32 %v990_v5, %v974_v55  ;;  %v1034_v56 = vadd.f32 %v1032_v29, %v1016_v28  ;;  %v1025_v24 = vstv %s3907_s29 }
  0xe5   : > { %s3931_s3 = sld [smem:[#allocation12 + $0x185]]  ;;  %v948_v55 = vmul.f32 %v946_v21, %v942_v18  ;;  %v851_v5 = vadd.f32 %v3831_v45, %v3838_v48  ;;  %v857_v28 = vadd.f32 %v855_v22, %v3840_v49  ;;  %v907_v29 = vadd.f32 %v905_v14, %v886_v7  ;;  %v4042_v14 = vld [vmem:[%s3577_s10 + $0x78] sm:$0xff] }
  0xe6   : > { %s3942_s30 = sld [smem:[#allocation12 + $0x206]]  ;;  %v1040_v62 = vadd.f32 %v1038_v47, %v1022_v33  ;;  %v3986_v47 = vld [vmem:[%s3577_s10 + $0x68] sm:$0xff]  ;;  %v5405_v33 = vstv %s3764_s22  ;;  %v1010_v21 = vadd.f32 %v1008_v40, %v992_v39  ;;  %v1026_v45 = vmul.f32 %v3697_v36, %v1025_v24 }
  0xe7   : > { %s3950_s28 = sld [smem:[#allocation12 + $0x286]]  ;;  %v864_v17 = vmul.f32 %v3986_v47, %v862_v53  ;;  %v876_v18 = vmul.f32 %v3986_v47, %v874_v3  ;;  %v950_v39 = vmul.f32 1.442695, %v948_v55 }
  0xe8   : > { %5630 = sst [smem:[#allocation49_spill]] %s3914_s20  ;;  %v5429_v60 = vstv %s3914_s20  ;;  %v1028_v55 = vadd.f32 %v1026_v45, %v1010_v21 }
  0xe9   : > { %s3956_s8 = sld [smem:[#allocation12 + $0x186]]  ;;  %v1050_v41 = vmul.f32 %v3726_v50, %v5429_v60  ;;  %3028 = vpow2.f32 %v950_v39 }
  0xea   : > { %5631 = sst [smem:[#allocation50_spill]] %s3917_s26  ;;  %v5395_v46 = vstv %s3917_s26 }
  0xeb   : > { %s3959_s21 = sld [smem:[#allocation12 + $0x187]]  ;;  %v1056_v34 = vmul.f32 %v3726_v50, %v5395_v46  ;;  %v845_v46 = vadd.f32 %v843_v35, %v824_v9  ;;  %v1052_v48 = vadd.f32 %v1050_v41, %v1034_v56  ;;  %v1043_v40 = vstv %s3931_s3 }
  0xec   : > { %5632 = sst [smem:[#allocation51_spill]] %s3942_s30  ;;  %v5408_v35 = vstv %s3942_s30 }
  0xed   : > { %5633 = sst [smem:[#allocation52_spill]] %s3950_s28  ;;  %v5419_v11 = vstv %s3950_s28  ;;  %v1058_v27 = vadd.f32 %v1056_v34, %v1040_v62  ;;  %v926_v62 = vmul.f32 %v3857_v63, %v5405_v33  ;;  %v870_v34 = vmul.f32 %v3986_v47, %v868_v10 }
  0xee   : > { %s3971_s2 = sld [smem:[#allocation12 + $0x287]]  ;;  %v1074_v53 = vmul.f32 %v3754_v2, %v5419_v11  ;;  %v1068_v49 = vmul.f32 %v3754_v2, %v5408_v35  ;;  %v866_v3 = vadd.f32 %v864_v17, %v845_v46  ;;  %v1733_v46 = vlaneseq }
  0xef   : > { %s3978_s19 = sld [smem:[#allocation12 + $0x207]]  ;;  %v872_v17 = vadd.f32 %v870_v34, %v851_v5  ;;  %v5426_v21 = vstv %s3956_s8 }
  0xf0   : > { %s3983_s7 = sld [smem:[#allocation12 + $0x188]]  ;;  %v1076_v22 = vadd.f32 %v1074_v53, %v1058_v27  ;;  %v885_v27 = vmul.f32 %v4042_v14, %v883_v58  ;;  %v4052_v53 = vadd.f32 %v926_v62, %v907_v29  ;;  %v1070_v33 = vadd.f32 %v1068_v49, %v1052_v48 }
  0xf1   : > { %5634 = sst [smem:[#allocation53_spill]] %s3959_s21  ;;  %v878_v58 = vadd.f32 %v876_v18, %v857_v28  ;;  %v1044_v29 = vmul.f32 %v3726_v50, %v1043_v40  ;;  %v891_v18 = vmul.f32 %v4042_v14, %v889_v31  ;;  %v4082_v48 = vshrl.u32 %v1733_v46, 7 }
  0xf2   : > { %s3990_s26 = sld [smem:[#allocation12 + $0x288]]  ;;  %v4073_v28 = vadd.f32 %v885_v27, %v866_v3  ;;  %v897_v49 = vmul.f32 %v4042_v14, %v895_v20  ;;  %v4101_v20 = vld [vmem:[%s3577_s10 + $0x88] sm:$0xff]  ;;  %v5436_v60 = vstv %s3959_s21 }
  0xf3   : > { %s4001_s5 = sld [smem:[#allocation12 + $0x208]]  ;;  %v1046_v39 = vadd.f32 %v1044_v29, %v1028_v55  ;;  %v1062_v29 = vmul.f32 %v3754_v2, %v5426_v21  ;;  %v918_v11 = vmul.f32 %v4101_v20, %v916_v32 }
  0xf4   : > { %5635 = sst [smem:[#allocation54_spill]] %s3971_s2  ;;  %v5406_v9 = vstv %s3971_s2  ;;  %v899_v56 = vadd.f32 %v897_v49, %v878_v58 }
  0xf5   : > { %5636 = sst [smem:[#allocation55_spill]] %s3978_s19  ;;  %v5417_v7 = vstv %s3978_s19  ;;  %v1092_v10 = vmul.f32 %v3781_v19, %v5406_v9 }
  0xf6   : > { %5637 = sst [smem:[#allocation56_spill]] %s3983_s7  ;;  %v1086_v9 = vmul.f32 %v3781_v19, %v5417_v7 }
  0xf7   : > { %s4008_s14 = sld [smem:[#allocation12 + $0x209]]  ;;  %v1094_v62 = vadd.f32 %v1092_v10, %v1076_v22 }
  0xf8   : > { %5638 = sst [smem:[#allocation57_spill]] %s3990_s26  ;;  %v5411_v41 = vstv %s3990_s26  ;;  %v1088_v22 = vadd.f32 %v1086_v9, %v1070_v33 }
  0xf9   : > { %5639 = sst [smem:[#allocation58_spill]] %s4001_s5  ;;  %v5412_v35 = vstv %s4001_s5  ;;  %v1110_v5 = vmul.f32 %v3823_v42, %v5411_v41 }
  0xfa   : > { %s4011_s20 = sld [smem:[#allocation12 + $0x289]]  ;;  %v1104_v10 = vmul.f32 %v3823_v42, %v5412_v35 }
  0xfb   : > { %s4019_s28 = sld [smem:[#allocation12 + $0x300]]  ;;  %v1112_v27 = vadd.f32 %v1110_v5, %v1094_v62 }
  0xfc   : > { %s5642_s24 = sld [smem:[#allocation37_spill]] }
  0xfd   : > { %s4033_s22 = sld [smem:[#allocation12 + $0x380]]  ;;  %v5423_v46 = vstv %s4008_s14 }
  0xfe   : > { %s4039_s18 = sld [smem:[#allocation12 + $0x400]] }
  0xff   : > { %s4046_s25 = sld [smem:[#allocation12 + $0x301]] }
 0x100   : > { %5640 = sst [smem:[#allocation59_spill]] %s4011_s20  ;;  %v5416_v34 = vstv %s4011_s20 }
 0x101   : > { %5641 = sst [smem:[#allocation60_spill]] %s4019_s28  ;;  %v5420_v31 = vstv %s4019_s28  ;;  %v1128_v41 = vmul.f32 %v3857_v63, %v5416_v34  ;;  %v1106_v34 = vadd.f32 %v1104_v10, %v1088_v22 }
 0x102   : > { %s4054_s2 = sld [smem:[#allocation12 + $0x381]]  ;;  %v1150_v62 = vmul.f32 %v5420_v31, %v3635_v6  ;;  %v1122_v31 = vmul.f32 %v3857_v63, %v5423_v46 }
 0x103   : > { %s4059_s30 = sld [smem:[#allocation12 + $0x401]]  ;;  %v5425_v33 = vstv %s4033_s22  ;;  %v1130_v58 = vadd.f32 %v1128_v41, %v1112_v27  ;;  %v912_v27 = vmul.f32 %v4101_v20, %v910_v59 }
 0x104   : > { %5643 = sst [smem:[#allocation37_spill]] %s4039_s18  ;;  %v5415_v45 = vstv %s4039_s18 }
 0x105   : > { %5644 = sst [smem:[#allocation61_spill]] %s4046_s25  ;;  %v5421_v3 = vstv %s4046_s25  ;;  %v1158_v9 = vmul.f32 %v5415_v45, %v3635_v6 }
 0x106   : > { %s4068_s9 = sld [smem:[#allocation12 + $0x302]]  ;;  %v1162_v5 = vmul.f32 %v3639_v8, %v5421_v3  ;;  %v1154_v3 = vmul.f32 %v5425_v33, %v3635_v6 }
 0x107   : > { %s4071_s19 = sld [smem:[#allocation12 + $0x382]] }
 0x108   : > { %s4080_s26 = sld [smem:[#allocation12 + $0x402]]  ;;  %v5428_v35 = vstv %s4054_s2  ;;  %v1164_v33 = vadd.f32 %v1162_v5, %v1150_v62  ;;  %v1134_v62 = vsub.f32 %v3920_v44, %v1130_v58 }
 0x109   : > { %s4092_s4 = sld [smem:[#allocation12 + $0x303]]  ;;  %v5424_v55 = vstv %s4059_s30  ;;  %v1168_v22 = vmul.f32 %v3639_v8, %v5428_v35  ;;  %v893_v35 = vadd.f32 %v891_v18, %v872_v17  ;;  %v920_v18 = vadd.f32 %v918_v11, %v899_v56 }
 0x10a   : > { %s4098_s11 = sld [smem:[#allocation12 + $0x383]]  ;;  %v1174_v45 = vmul.f32 %v3639_v8, %v5424_v55  ;;  %v1064_v55 = vadd.f32 %v1062_v29, %v1046_v39  ;;  %v4163_v39 = vld [vmem:[%s3577_s10 + $0x98] sm:$0xff]  ;;  %v1080_v56 = vmul.f32 %v3781_v19, %v5436_v60  ;;  %v1136_v60 = vmul.f32 %v1134_v62, %v1134_v62 }
 0x10b   : > { %s4109_s5 = sld [smem:[#allocation12 + $0x403]]  ;;  %v1170_v29 = vadd.f32 %v1168_v22, %v1154_v3  ;;  %v939_v11 = vmul.f32 %v4163_v39, %v937_v0  ;;  %v933_v0 = vmul.f32 %v4163_v39, %v931_v15 }
 0x10c   : > { %5645 = sst [smem:[#allocation62_spill]] %s4068_s9  ;;  %v5432_v7 = vstv %s4068_s9  ;;  %v1176_v49 = vadd.f32 %v1174_v45, %v1158_v9  ;;  %v1124_v9 = vadd.f32 %v1122_v31, %v1106_v34  ;;  %v4177_v34 = vpop.eup %3028 }
 0x10d   : > { %5646 = sst [smem:[#allocation63_spill]] %s4071_s19  ;;  %v1185_v32 = vstv %s4071_s19  ;;  %v1180_v21 = vmul.f32 %v3659_v16, %v5432_v7  ;;  %v941_v15 = vadd.f32 %v939_v11, %v920_v18 }
 0x10e   : > { %5647 = sst [smem:[#allocation64_spill]] %s4080_s26  ;;  %v5438_v10 = vstv %s4080_s26  ;;  %v1186_v17 = vmul.f32 %v3659_v16, %v1185_v32 }
 0x10f   : > { %5648 = sst [smem:[#allocation65_spill]] %s4092_s4  ;;  %v1192_v46 = vmul.f32 %v3659_v16, %v5438_v10  ;;  %v5435_v41 = vstv %s4092_s4  ;;  %v1182_v31 = vadd.f32 %v1180_v21, %v1164_v33  ;;  %v914_v21 = vadd.f32 %v912_v27, %v893_v35 }
 0x110   : > { %s4114_s20 = sld [smem:[#allocation12 + $0x189]]  ;;  %v1203_v7 = vstv %s4098_s11  ;;  %v1198_v3 = vmul.f32 %v3672_v23, %v5435_v41  ;;  %v1132_v33 = vsub.f32 0.0, %v1124_v9 }
 0x111   : > { %5649 = sst [smem:[#allocation66_spill]] %s4109_s5  ;;  %v5437_v45 = vstv %s4109_s5  ;;  %v1194_v5 = vadd.f32 %v1192_v46, %v1176_v49  ;;  %v5443_v46 = vstv %s3983_s7  ;;  %v1188_v49 = vadd.f32 %v1186_v17, %v1170_v29 }
 0x112   : > { %s4126_s18 = sld [smem:[#allocation12 + $0x304]]  ;;  %v1210_v59 = vmul.f32 %v3672_v23, %v5437_v45  ;;  %v1204_v41 = vmul.f32 %v3672_v23, %v1203_v7  ;;  %v1200_v27 = vadd.f32 %v1198_v3, %v1182_v31  ;;  %v1082_v17 = vadd.f32 %v1080_v56, %v1064_v55  ;;  %v4223_v31 = vld [vmem:[%s3602_s27 + $0x8] sm:$0xff] }
 0x113   : > { %s4141_s25 = sld [smem:[#allocation12 + $0x404]]  ;;  %v1098_v62 = vmul.f32 %v3823_v42, %v5443_v46  ;;  %v935_v55 = vadd.f32 %v933_v0, %v914_v21  ;;  %v1138_v11 = vmul.f32 %v1136_v60, %v1132_v33  ;;  %v945_v60 = vsub.f32 %v4223_v31, %v941_v15 }
 0x114   : > { %s4147_s17 = sld [smem:[#allocation12 + $0x384]]  ;;  %v1212_v45 = vadd.f32 %v1210_v59, %v1194_v5  ;;  %v4253_v0 = vmul.f32 %v4101_v20, %v904_v52  ;;  %v961_v15 = vmul.f32 %v959_v30, %v3678_v25 }
 0x115   : > { %s4152_s28 = sld [smem:[#allocation12 + $0x305]]  ;;  %v1100_v21 = vadd.f32 %v1098_v62, %v1082_v17  ;;  %v1140_v17 = vmul.f32 1.442695, %v1138_v11  ;;  %v979_v11 = vmul.f32 %v3681_v26, %v977_v4 }
 0x116   : > { %5650 = sst [smem:[#allocation67_spill]] %s4114_s20  ;;  %v5450_v3 = vstv %s4114_s20 }
 0x117   : > { %s4157_s26 = sld [smem:[#allocation12 + $0x405]]  ;;  %3030 = vpow2.f32 %v1140_v17 }
 0x118   : > { %5651 = sst [smem:[#allocation68_spill]] %s4126_s18  ;;  %v5441_v58 = vstv %s4126_s18 }
 0x119   : > { %5652 = sst [smem:[#allocation69_spill]] %s4141_s25  ;;  %v5445_v22 = vstv %s4141_s25  ;;  %v1216_v9 = vmul.f32 %v3697_v36, %v5441_v58  ;;  %v1206_v58 = vadd.f32 %v1204_v41, %v1188_v49 }
 0x11a   : > { %s4168_s9 = sld [smem:[#allocation12 + $0x385]]  ;;  %v1221_v10 = vstv %s4147_s17  ;;  %v1228_v35 = vmul.f32 %v3697_v36, %v5445_v22 }
 0x11b   : > { %5653 = sst [smem:[#allocation70_spill]] %s4152_s28  ;;  %v5451_v5 = vstv %s4152_s28  ;;  %v1222_v18 = vmul.f32 %v3697_v36, %v1221_v10  ;;  %v1218_v22 = vadd.f32 %v1216_v9, %v1200_v27  ;;  %v943_v9 = vsub.f32 0.0, %v935_v55 }
 0x11c   : > { %s4175_s6 = sld [smem:[#allocation12 + $0x306]]  ;;  %v1230_v56 = vadd.f32 %v1228_v35, %v1212_v45  ;;  %v1234_v41 = vmul.f32 %v3726_v50, %v5451_v5  ;;  %v1116_v45 = vmul.f32 %v3857_v63, %v5450_v3  ;;  %v947_v55 = vmul.f32 %v945_v60, %v945_v60 }
 0x11d   : > { %5654 = sst [smem:[#allocation71_spill]] %s4157_s26  ;;  %v1245_v29 = vstv %s4157_s26  ;;  %v1224_v35 = vadd.f32 %v1222_v18, %v1206_v58 }
 0x11e   : > { %s4183_s19 = sld [smem:[#allocation12 + $0x406]]  ;;  %v1246_v59 = vmul.f32 %v3726_v50, %v1245_v29  ;;  %v1236_v58 = vadd.f32 %v1234_v41, %v1218_v22  ;;  %v973_v22 = vmul.f32 %v3681_v26, %v971_v38  ;;  %v4291_v41 = vadd.f32 %v1116_v45, %v1100_v21 }
 0x11f   : > { %s4193_s5 = sld [smem:[#allocation12 + $0x386]]  ;;  %v4310_v45 = vmul.f32 %v947_v55, %v943_v9 }
 0x120   : > { %5655 = sst [smem:[#allocation72_spill]] %s4168_s9  ;;  %v1239_v46 = vstv %s4168_s9  ;;  %v1248_v62 = vadd.f32 %v1246_v59, %v1230_v56  ;;  %v965_v59 = vmul.f32 %v963_v54, %v3678_v25  ;;  %v4289_v56 = vmul.f32 %v4177_v34, %v4052_v53 }
 0x121   : > { %s4198_s1 = sld [smem:[#allocation12 + $0x307]]  ;;  %v1240_v27 = vmul.f32 %v3726_v50, %v1239_v46  ;;  %v4318_v17 = vadd.f32 %v973_v22, %v961_v15  ;;  %v5679_v15 = vstv %s3854_s16 }
 0x122   : > { %5656 = sst [smem:[#allocation73_spill]] %s4175_s6  ;;  %v5454_v33 = vstv %s4175_s6  ;;  %v991_v55 = vmul.f32 %v3713_v43, %v5679_v15 }
 0x123   : > { %s4207_s4 = sld [smem:[#allocation12 + $0x387]]  ;;  %v1252_v18 = vmul.f32 %v3754_v2, %v5454_v33  ;;  %v1242_v60 = vadd.f32 %v1240_v27, %v1224_v35  ;;  %v969_v27 = vmul.f32 %v967_v61, %v3678_v25 }
 0x124   : > { %s4213_s13 = sld [smem:[#allocation12 + $0x407]]  ;;  %v1263_v49 = vstv %s4183_s19 }
 0x125   : > { %5657 = sst [smem:[#allocation74_spill]] %s4193_s5  ;;  %v1257_v3 = vstv %s4193_s5  ;;  %v1264_v52 = vmul.f32 %v3754_v2, %v1263_v49  ;;  %v1254_v53 = vadd.f32 %v1252_v18, %v1236_v58  ;;  %v985_v18 = vmul.f32 %v3681_v26, %v983_v13 }
 0x126   : > { %s4219_s21 = sld [smem:[#allocation12 + $0x308]]  ;;  %v1258_v33 = vmul.f32 %v3754_v2, %v1257_v3 }
 0x127   : > { %5658 = sst [smem:[#allocation75_spill]] %s4198_s1  ;;  %v5459_v30 = vstv %s4198_s1  ;;  %v1266_v54 = vadd.f32 %v1264_v52, %v1248_v62  ;;  %v4320_v62 = vadd.f32 %v979_v11, %v965_v59 }
 0x128   : > { %s4229_s18 = sld [smem:[#allocation12 + $0x388]]  ;;  %v1270_v34 = vmul.f32 %v3781_v19, %v5459_v30  ;;  %v1260_v52 = vadd.f32 %v1258_v33, %v1242_v60 }
 0x129   : > { %5659 = sst [smem:[#allocation76_spill]] %s4207_s4  ;;  %v5461_v38 = vstv %s4207_s4 }
 0x12a   : > { %5660 = sst [smem:[#allocation77_spill]] %s4213_s13  ;;  %v5462_v5 = vstv %s4213_s13  ;;  %v1276_v9 = vmul.f32 %v3781_v19, %v5461_v38  ;;  %v4342_v59 = vadd.f32 %v1270_v34, %v1254_v53 }
 0x12b   : > { %s4235_s7 = sld [smem:[#allocation12 + $0x408]]  ;;  %v1282_v4 = vmul.f32 %v3781_v19, %v5462_v5 }
 0x12c   : > { %5661 = sst [smem:[#allocation78_spill]] %s4219_s21  ;;  %v5477_v11 = vstv %s4219_s21  ;;  %v1278_v53 = vadd.f32 %v1276_v9, %v1260_v52 }
 0x12d   : > { %s4241_s25 = sld [smem:[#allocation12 + $0x389]]  ;;  %v1284_v25 = vadd.f32 %v1282_v4, %v1266_v54 }
 0x12e   : > { %5662 = sst [smem:[#allocation79_spill]] %s4229_s18  ;;  %v5468_v22 = vstv %s4229_s18 }
 0x12f   : > { %s4248_s26 = sld [smem:[#allocation12 + $0x409]] }
 0x130   : > { %s4258_s28 = sld [smem:[#allocation12 + $0x480]] }
 0x131   : > { %5663 = sst [smem:[#allocation80_spill]] %s4235_s7  ;;  %v5460_v21 = vstv %s4235_s7 }
 0x132   : > { %s4267_s0 = sld [smem:[#allocation12 + $0x500]]  ;;  %v1300_v61 = vmul.f32 %v3823_v42, %v5460_v21  ;;  %v1294_v21 = vmul.f32 %v3823_v42, %v5468_v22 }
 0x133   : > { %5664 = sst [smem:[#allocation81_spill]] %s4241_s25  ;;  %v5485_v22 = vstv %s4241_s25 }
 0x134   : > { %s4273_s9 = sld [smem:[#allocation12 + $0x580]]  ;;  %v1302_v38 = vadd.f32 %v1300_v61, %v1284_v25 }
 0x135   : > { %5665 = sst [smem:[#allocation82_spill]] %s4248_s26  ;;  %v5471_v60 = vstv %s4248_s26 }
 0x136   : > { %5666 = sst [smem:[#allocation83_spill]] %s4258_s28  ;;  %v5473_v34 = vstv %s4258_s28  ;;  %v1318_v52 = vmul.f32 %v3857_v63, %v5471_v60  ;;  %v4397_v60 = vadd.f32 %v985_v18, %v969_v27 }
 0x137   : > { %s4276_s12 = sld [smem:[#allocation12 + $0x481]]  ;;  %v1340_v25 = vmul.f32 %v5473_v34, %v3635_v6 }
 0x138   : > { %5668 = sst [smem:[#allocation40_spill]] %s4267_s0  ;;  %v1343_v35 = vstv %s4267_s0  ;;  %v1320_v27 = vadd.f32 %v1318_v52, %v1302_v38 }
 0x139   : > { %s4296_s15 = sld [smem:[#allocation12 + $0x501]]  ;;  %v1344_v33 = vmul.f32 %v1343_v35, %v3635_v6 }
 0x13a   : > { %5669 = sst [smem:[#allocation84_spill]] %s4273_s9  ;;  %v5465_v58 = vstv %s4273_s9 }
 0x13b   : > { %s4302_s23 = sld [smem:[#allocation12 + $0x581]]  ;;  %v1348_v26 = vmul.f32 %v5465_v58, %v3635_v6  ;;  %v1288_v6 = vmul.f32 %v3823_v42, %v5477_v11 }
 0x13c   : > { %s4308_s5 = sld [smem:[#allocation12 + $0x482]] }
 0x13d   : > { %5670 = sst [smem:[#allocation85_spill]] %s4276_s12  ;;  %v5472_v15 = vstv %s4276_s12 }
 0x13e   : > { %s4313_s13 = sld [smem:[#allocation12 + $0x502]]  ;;  %v1352_v61 = vmul.f32 %v3639_v8, %v5472_v15 }
 0x13f   : > { %5672 = sst [smem:[#allocation39_spill]] %s4296_s15  ;;  %v5463_v13 = vstv %s4296_s15 }
 0x140   : > { %s4326_s1 = sld [smem:[#allocation12 + $0x582]]  ;;  %v1358_v54 = vmul.f32 %v3639_v8, %v5463_v13 }
 0x141   : > { %5674 = sst [smem:[#allocation41_spill]] %s4302_s23  ;;  %v5466_v4 = vstv %s4302_s23 }
 0x142   : > { %5675 = sst [smem:[#allocation86_spill]] %s4308_s5  ;;  %v1364_v30 = vmul.f32 %v3639_v8, %v5466_v4  ;;  %v1360_v5 = vadd.f32 %v1358_v54, %v1344_v33 }
 0x143   : > { %s4337_s6 = sld [smem:[#allocation12 + $0x483]] }
 0x144   : > { %5676 = sst [smem:[#allocation87_spill]] %s4313_s13  ;;  %v1375_v13 = vstv %s4313_s13  ;;  %v1366_v9 = vadd.f32 %v1364_v30, %v1348_v26  ;;  %v5483_v30 = vstv %s4308_s5 }
 0x145   : > { %s4349_s20 = sld [smem:[#allocation12 + $0x503]]  ;;  %v1376_v58 = vmul.f32 %v3659_v16, %v1375_v13 }
 0x146   : > { %5677 = sst [smem:[#allocation88_spill]] %s4326_s1  ;;  %v5475_v4 = vstv %s4326_s1 }
 0x147   : > { %s4357_s16 = sld [smem:[#allocation12 + $0x583]]  ;;  %v1382_v33 = vmul.f32 %v3659_v16, %v5475_v4  ;;  %v1378_v26 = vadd.f32 %v1376_v58, %v1360_v5  ;;  %v3031_v5 = vpop.eup %3030  ;;  %v1296_v58 = vadd.f32 %v1294_v21, %v1278_v53  ;;  %v1312_v4 = vmul.f32 %v3857_v63, %v5485_v22 }
 0x148   : > { %s4359_s7 = sld [smem:[#allocation12 + $0x309]] }
 0x149   : > { %5678 = sst [smem:[#allocation89_spill]] %s4337_s6  ;;  %v1384_v8 = vadd.f32 %v1382_v33, %v1366_v9  ;;  %v1354_v9 = vadd.f32 %v1352_v61, %v1340_v25  ;;  %v1370_v33 = vmul.f32 %v3659_v16, %v5483_v30  ;;  %v5524_v11 = vstv %s4337_s6 }
 0x14a   : > { %s4370_s4 = sld [smem:[#allocation12 + $0x504]]  ;;  %v1144_v25 = vmul.f32 %v3031_v5, %v4291_v41 }
 0x14b   : > { %5680 = sst [smem:[#allocation90_spill]] %s4349_s20  ;;  %v5478_v54 = vstv %s4349_s20  ;;  %v1372_v22 = vadd.f32 %v1370_v33, %v1354_v9 }
 0x14c   : > { %s4379_s18 = sld [smem:[#allocation12 + $0x584]]  ;;  %v1394_v15 = vmul.f32 %v3672_v23, %v5478_v54 }
 0x14d   : > { %5681 = sst [smem:[#allocation91_spill]] %s4357_s16  ;;  %v1399_v34 = vstv %s4357_s16 }
 0x14e   : > { %5682 = sst [smem:[#allocation92_spill]] %s4359_s7  ;;  %v1400_v18 = vmul.f32 %v3672_v23, %v1399_v34  ;;  %v1396_v21 = vadd.f32 %v1394_v15, %v1378_v26  ;;  %v993_v15 = vadd.f32 %v991_v55, %v4318_v17  ;;  %v5500_v9 = vstv %s4359_s7 }
 0x14f   : > { %s4391_s26 = sld [smem:[#allocation12 + $0x484]] }
 0x150   : > { %5683 = sst [smem:[#allocation93_spill]] %s4370_s4  ;;  %v5487_v54 = vstv %s4370_s4  ;;  %v1402_v53 = vadd.f32 %v1400_v18, %v1384_v8  ;;  %v1314_v8 = vadd.f32 %v1312_v4, %v1296_v58  ;;  %v1324_v18 = vsub.f32 %v3920_v44, %v1320_v27 }
 0x151   : > { %s4395_s13 = sld [smem:[#allocation12 + $0x505]]  ;;  %v1412_v38 = vmul.f32 %v3697_v36, %v5487_v54 }
 0x152   : > { %5684 = sst [smem:[#allocation94_spill]] %s4379_s18  ;;  %v5486_v52 = vstv %s4379_s18 }
 0x153   : > { %s4406_s12 = sld [smem:[#allocation12 + $0x585]]  ;;  %v1418_v16 = vmul.f32 %v3697_v36, %v5486_v52  ;;  %v1388_v52 = vmul.f32 %v3672_v23, %v5524_v11  ;;  %v1414_v4 = vadd.f32 %v1412_v38, %v1396_v21  ;;  %v4460_v23 = vadd.f32 %v1144_v25, %v4289_v56  ;;  %v3057_v11 = vld [vmem:[%s3577_s10 + $0x40] sm:$0xff] }
 0x154   : > { %s5688_s21 = sld [smem:[#allocation42_spill]]  ;;  %v1322_v21 = vsub.f32 0.0, %v1314_v8 }
 0x155   : > { %5685 = sst [smem:[#allocation95_spill]] %s4391_s26  ;;  %v1420_v54 = vadd.f32 %v1418_v16, %v1402_v53  ;;  %v5508_v55 = vstv %s4391_s26  ;;  %v1326_v53 = vmul.f32 %v1324_v18, %v1324_v18 }
 0x156   : > { %s5689_s28 = sld [smem:[#allocation43_spill]] }
 0x157   : > { %5686 = sst [smem:[#allocation96_spill]] %s4395_s13  ;;  %v1429_v30 = vstv %s4395_s13 }
 0x158   : > { %s4419_s20 = sld [smem:[#allocation12 + $0x506]]  ;;  %v1430_v58 = vmul.f32 %v3726_v50, %v1429_v30 }
 0x159   : > { %5687 = sst [smem:[#allocation97_spill]] %s4406_s12  ;;  %v1435_v17 = vstv %s4406_s12 }
 0x15a   : > { %s4425_s25 = sld [smem:[#allocation12 + $0x586]]  ;;  %v5691_v61 = vstv %s5688_s21  ;;  %v1436_v27 = vmul.f32 %v3726_v50, %v1435_v17 }
 0x15b   : > { %s4431_s5 = sld [smem:[#allocation12 + $0x485]]  ;;  %v997_v26 = vmul.f32 %v3713_v43, %v5691_v61  ;;  %v1432_v61 = vadd.f32 %v1430_v58, %v1414_v4  ;;  %v1328_v4 = vmul.f32 %v1326_v53, %v1322_v21  ;;  %v1027_v53 = vmul.f32 %v3770_v12, %v1025_v24 }
 0x15c   : > { %s4439_s4 = sld [smem:[#allocation12 + $0x507]]  ;;  %v5692_v41 = vstv %s5689_s28  ;;  %v1438_v38 = vadd.f32 %v1436_v27, %v1420_v54  ;;  %v1009_v54 = vmul.f32 %v3739_v57, %v1007_v51  ;;  %v1306_v27 = vmul.f32 %v3857_v63, %v5500_v9 }
 0x15d   : > { %v1003_v5 = vmul.f32 %v3713_v43, %v5692_v41  ;;  %s4448_s21 = sld [smem:[#allocation12 + $0x587]]  ;;  %v4463_v43 = vadd.f32 %v1288_v6, %v4342_v59  ;;  %v1390_v59 = vadd.f32 %v1388_v52, %v1372_v22  ;;  %v1406_v6 = vmul.f32 %v3697_v36, %v5508_v55  ;;  %v3054_v55 = vld [vmem:[%s3577_s10 + $0x20] sm:$0xff] }
 0x15e   : > { %s4457_s28 = sld [smem:[#allocation12 + $0x486]]  ;;  %v1447_v33 = vstv %s4419_s20  ;;  %v999_v36 = vadd.f32 %v997_v26, %v4320_v62  ;;  %v1011_v21 = vadd.f32 %v1009_v54, %v993_v15 }
 0x15f   : > { %s4467_s13 = sld [smem:[#allocation12 + $0x508]]  ;;  %v1448_v22 = vmul.f32 %v3754_v2, %v1447_v33  ;;  %v1005_v52 = vadd.f32 %v1003_v5, %v4397_v60 }
 0x160   : > { %v1453_v16 = vstv %s4425_s25  ;;  %s4470_s12 = sld [smem:[#allocation12 + $0x588]] }
 0x161   : > { %5690 = sst [smem:[#allocation42_spill]] %s4431_s5  ;;  %v1454_v25 = vmul.f32 %v3754_v2, %v1453_v16  ;;  %v5501_v8 = vstv %s4431_s5 }
 0x162   : > { %s5695_s1 = sld [smem:[#allocation121_spill]]  ;;  %v1465_v51 = vstv %s4439_s4 }
 0x163   : > { %s4481_s23 = sld [smem:[#allocation12 + $0x487]]  ;;  %v1456_v18 = vadd.f32 %v1454_v25, %v1438_v38  ;;  %v1471_v41 = vstv %s4448_s21  ;;  %v1408_v38 = vadd.f32 %v1406_v6, %v1390_v59  ;;  %v1450_v25 = vadd.f32 %v1448_v22, %v1432_v61 }
 0x164   : > { %5693 = sst [smem:[#allocation43_spill]] %s4457_s28  ;;  %v1472_v58 = vmul.f32 %v3781_v19, %v1471_v41  ;;  %v5507_v59 = vstv %s4457_s28 }
 0x165   : > { %s5697_s9 = sld [smem:[#allocation44_spill]]  ;;  %v1483_v6 = vstv %s4467_s13 }
 0x166   : > { %s5698_s0 = sld [smem:[#allocation45_spill]]  ;;  %v1474_v15 = vadd.f32 %v1472_v58, %v1456_v18  ;;  %v1029_v18 = vadd.f32 %v1027_v53, %v1011_v21 }
 0x167   : > { %s4490_s18 = sld [smem:[#allocation12 + $0x509]] }
 0x168   : > { %v1937_v56 = vld [vmem:[%s5695_s1] sm:$0xff]  ;;  %s4497_s1 = sld [smem:[#allocation12 + $0x589]] }
 0x169   : > { %5696 = sst [smem:[#allocation46_spill]] %s4481_s23  ;;  %2865 = vmatprep.mubr.msk.f32.mxu0 %vm1754_vm3, %v1937_v56  ;;  %v1424_v56 = vmul.f32 %v3726_v50, %v5501_v8  ;;  %v1330_v50 = vmul.f32 1.442695, %v1328_v4  ;;  %v1045_v4 = vmul.f32 %v3817_v37, %v1043_v40  ;;  %v4562_v40 = vadd.f32 %v1306_v27, %v4463_v43 }
 0x16a   : > { %s4502_s6 = sld [smem:[#allocation12 + $0x600]] }
 0x16b   : > { %v5700_v62 = vstv %s5697_s9  ;;  %s4513_s16 = sld [smem:[#allocation12 + $0x680]]  ;;  %v1426_v8 = vadd.f32 %v1424_v56, %v1408_v38  ;;  %3032 = vpow2.f32 %v1330_v50  ;;  %v3052_v38 = vld [vmem:[%s3577_s10] sm:$0xff] }
 0x16c   : > { %v1015_v60 = vmul.f32 %v3739_v57, %v5700_v62  ;;  %v5701_v26 = vstv %s5698_s0  ;;  %s5703_s15 = sld [smem:[#allocation47_spill]]  ;;  %v1466_v62 = vmul.f32 %v3781_v19, %v1465_v51 }
 0x16d   : > { %v1021_v5 = vmul.f32 %v3739_v57, %v5701_v26  ;;  %s5704_s9 = sld [smem:[#allocation48_spill]]  ;;  %v1489_v57 = vstv %s4470_s12 }
 0x16e   : > { %5699 = sst [smem:[#allocation44_spill]] %s4497_s1  ;;  %v1490_v24 = vmul.f32 %v3823_v42, %v1489_v57  ;;  %v1017_v19 = vadd.f32 %v1015_v60, %v999_v36  ;;  %v5556_v26 = vstv %s4497_s1  ;;  %v1442_v36 = vmul.f32 %v3754_v2, %v5507_v59 }
 0x16f   : > { %s4525_s0 = sld [smem:[#allocation12 + $0x700]]  ;;  %v1023_v54 = vadd.f32 %v1021_v5, %v1005_v52  ;;  %v1468_v52 = vadd.f32 %v1466_v62, %v1450_v25  ;;  %v1484_v60 = vmul.f32 %v3823_v42, %v1483_v6  ;;  %v4572_v25 = vadd.f32 %v1045_v4, %v1029_v18 }
 0x170   : > { %s4532_s29 = sld [smem:[#allocation12 + $0x601]]  ;;  %v1492_v5 = vadd.f32 %v1490_v24, %v1474_v15 }
 0x171   : > { %5702 = sst [smem:[#allocation45_spill]] %s4513_s16  ;;  %v5554_v21 = vstv %s4513_s16  ;;  %v1486_v62 = vadd.f32 %v1484_v60, %v1468_v52 }
 0x172   : > { %s4534_s7 = sld [smem:[#allocation12 + $0x681]]  ;;  %v5708_v61 = vstv %s5703_s15  ;;  %v1534_v53 = vmul.f32 %v3052_v38, %v5554_v21 }
 0x173   : > { %v1033_v22 = vmul.f32 %v3770_v12, %v5708_v61  ;;  %s4540_s5 = sld [smem:[#allocation12 + $0x701]]  ;;  %v5710_v58 = vstv %s5704_s9  ;;  %v5557_v61 = vstv %s4490_s18 }
 0x174   : > { %v1039_v9 = vmul.f32 %v3770_v12, %v5710_v58  ;;  %s5711_s15 = sld [smem:[#allocation49_spill]]  ;;  %v1508_v12 = vmul.f32 %v3857_v63, %v5556_v26  ;;  %v1502_v15 = vmul.f32 %v3857_v63, %v5557_v61  ;;  %v5516_v58 = vstv %s4481_s23  ;;  %v4796_v26 = vld [vmem:[%s3577_s10 + $0x28] sm:$0xff] }
 0x175   : > { %5705 = sst [smem:[#allocation47_spill]] %s4525_s0  ;;  %v5531_v2 = vstv %s4525_s0  ;;  %v1035_v42 = vadd.f32 %v1033_v22, %v1017_v19  ;;  %v1444_v19 = vadd.f32 %v1442_v36, %v1426_v8  ;;  %v5519_v63 = vstv %s4502_s6 }
 0x176   : > { %5706 = sst [smem:[#allocation48_spill]] %s4532_s29  ;;  %v1041_v56 = vadd.f32 %v1039_v9, %v1023_v54  ;;  %v1538_v24 = vmul.f32 %v3052_v38, %v5531_v2  ;;  %v1510_v9 = vadd.f32 %v1508_v12, %v1492_v5  ;;  %v3053_v54 = vld [vmem:[%s3577_s10 + $0x10] sm:$0xff]  ;;  %v5518_v4 = vstv %s4532_s29 }
 0x177   : > { %s4559_s3 = sld [smem:[#allocation12 + $0x682]] }
 0x178   : > { %5707 = sst [smem:[#allocation98_spill]] %s4534_s7  ;;  %v5521_v50 = vstv %s4534_s7 }
 0x179   : > { %5709 = sst [smem:[#allocation99_spill]] %s4540_s5  ;;  %v1548_v22 = vmul.f32 %v3053_v54, %v5521_v50  ;;  %v5509_v18 = vstv %s4540_s5  ;;  %v1723_v50 = vpop.xlane.xlu0 %1722 }
 0x17a   : > { %s4565_s9 = sld [smem:[#allocation12 + $0x702]]  ;;  %v5715_v43 = vstv %s5711_s15  ;;  %v1554_v52 = vmul.f32 %v3053_v54, %v5509_v18 }
 0x17b   : > { %s4570_s28 = sld [smem:[#allocation12 + $0x602]]  ;;  %v1051_v27 = vmul.f32 %v3817_v37, %v5715_v43  ;;  %v1550_v8 = vadd.f32 %v1548_v22, %v1534_v53  ;;  %v1504_v43 = vadd.f32 %v1502_v15, %v1486_v62  ;;  %v4622_v15 = vld [vmem:[%s3577_s10 + $0x70] sm:$0xff] }
 0x17c   : > { %s4583_s26 = sld [smem:[#allocation12 + $0x683]]  ;;  %v1556_v59 = vadd.f32 %v1554_v52, %v1538_v24  ;;  %v1460_v24 = vmul.f32 %v4622_v15, %v5516_v58 }
 0x17d   : > { %5712 = sst [smem:[#allocation49_spill]] %s4559_s3  ;;  %v5514_v36 = vstv %s4559_s3  ;;  %v4601_v60 = vadd.f32 %v1051_v27, %v1035_v42  ;;  %v1514_v42 = vsub.f32 %v3920_v44, %v1510_v9  ;;  %v1530_v27 = vmul.f32 %v3052_v38, %v5519_v63 }
 0x17e   : > { %s5717_s16 = sld [smem:[#allocation50_spill]]  ;;  %v1566_v18 = vmul.f32 %v3054_v55, %v5514_v36 }
 0x17f   : > { %s4589_s15 = sld [smem:[#allocation12 + $0x703]] }
 0x180   : > { %5713 = sst [smem:[#allocation100_spill]] %s4565_s9  ;;  %v5513_v53 = vstv %s4565_s9  ;;  %v1568_v22 = vadd.f32 %v1566_v18, %v1550_v8  ;;  %v1512_v18 = vsub.f32 0.0, %v1504_v43 }
 0x181   : > { %5714 = sst [smem:[#allocation101_spill]] %s4570_s28  ;;  %v1572_v62 = vmul.f32 %v3054_v55, %v5513_v53  ;;  %v5528_v38 = vstv %s4570_s28 }
 0x182   : > { %5716 = sst [smem:[#allocation102_spill]] %s4583_s26  ;;  %v5517_v52 = vstv %s4583_s26  ;;  %v1560_v43 = vmul.f32 %v3054_v55, %v5528_v38 }
 0x183   : > { %s4596_s0 = sld [smem:[#allocation12 + $0x603]]  ;;  %v1574_v9 = vadd.f32 %v1572_v62, %v1556_v59  ;;  %v1516_v62 = vmul.f32 %v1514_v42, %v1514_v42 }
 0x184   : > { %s4599_s7 = sld [smem:[#allocation12 + $0x684]]  ;;  %v5721_v5 = vstv %s5717_s16 }
 0x185   : > { %5718 = sst [smem:[#allocation50_spill]] %s4589_s15  ;;  %v1057_v12 = vmul.f32 %v3817_v37, %v5721_v5  ;;  %v1542_v37 = vmul.f32 %v3053_v54, %v5518_v4  ;;  %v5725_v5 = vstv %s3956_s8  ;;  %v3056_v54 = vld [vmem:[%s3577_s10 + $0x30] sm:$0xff]  ;;  %v5523_v36 = vstv %s4589_s15 }
 0x186   : > { %s4610_s5 = sld [smem:[#allocation12 + $0x704]]  ;;  %v4633_v44 = vmul.f32 %v3986_v47, %v5725_v5  ;;  %v1584_v53 = vmul.f32 %v3056_v54, %v5517_v52  ;;  %v1590_v8 = vmul.f32 %v3056_v54, %v5523_v36 }
 0x187   : > { %s4612_s1 = sld [smem:[#allocation12 + $0x488]]  ;;  %v1059_v5 = vadd.f32 %v1057_v12, %v1041_v56  ;;  %v1544_v52 = vadd.f32 %v1542_v37, %v1530_v27  ;;  %v4664_v27 = vadd.f32 %v1460_v24, %v1444_v19  ;;  %v3058_v24 = vld [vmem:[%s3577_s10 + $0x50] sm:$0xff] }
 0x188   : > { %s5723_s16 = sld [smem:[#allocation52_spill]]  ;;  %v1586_v4 = vadd.f32 %v1584_v53, %v1568_v22  ;;  %v1592_v36 = vadd.f32 %v1590_v8, %v1574_v9  ;;  %v5732_v53 = vstv %s5642_s24 }
 0x189   : > { %5719 = sst [smem:[#allocation103_spill]] %s4596_s0  ;;  %v1726_v42 = vadd.f32 %v5732_v53, %v1723_v50  ;;  %v5536_v37 = vstv %s4596_s0 }
 0x18a   : > { %5720 = sst [smem:[#allocation104_spill]] %s4599_s7  ;;  %v5527_v63 = vstv %s4599_s7  ;;  %v1578_v2 = vmul.f32 %v3056_v54, %v5536_v37 }
 0x18b   : > { %s4628_s3 = sld [smem:[#allocation12 + $0x685]]  ;;  %v1602_v56 = vmul.f32 %v3057_v11, %v5527_v63  ;;  %v2789_v50 = vmul.f32 -1.442695, %v1726_v42 }
 0x18c   : > { %5722 = sst [smem:[#allocation105_spill]] %s4610_s5  ;;  %v5529_v12 = vstv %s4610_s5 }
 0x18d   : > { %s4640_s23 = sld [smem:[#allocation12 + $0x705]]  ;;  %v1608_v55 = vmul.f32 %v3057_v11, %v5529_v12  ;;  %v1604_v22 = vadd.f32 %v1602_v56, %v1586_v4  ;;  %v1518_v4 = vmul.f32 %v1516_v62, %v1512_v18  ;;  %v1562_v56 = vadd.f32 %v1560_v43, %v1544_v52  ;;  %v3059_v62 = vld [vmem:[%s3577_s10 + $0x60] sm:$0xff] }
 0x18e   : > { %s4644_s8 = sld [smem:[#allocation12 + $0x604]]  ;;  %v5728_v58 = vstv %s5723_s16  ;;  %3034 = vpow2.f32 %v2789_v50 }
 0x18f   : > { %v1075_v59 = vmul.f32 %v3986_v47, %v5728_v58  ;;  %s4650_s26 = sld [smem:[#allocation12 + $0x686]]  ;;  %v4660_v58 = vpop.eup %3032  ;;  %v1610_v19 = vadd.f32 %v1608_v55, %v1592_v36  ;;  %v5546_v55 = vstv %s4612_s1 }
 0x190   : > { %s5730_s15 = sld [smem:[#allocation51_spill]] }
 0x191   : > { %5724 = sst [smem:[#allocation52_spill]] %s4628_s3  ;;  %v5552_v9 = vstv %s4628_s3  ;;  %v1077_v38 = vadd.f32 %v1075_v59, %v1059_v5 }
 0x192   : > { %s4658_s16 = sld [smem:[#allocation12 + $0x706]]  ;;  %v1620_v53 = vmul.f32 %v3058_v24, %v5552_v9 }
 0x193   : > { %5726 = sst [smem:[#allocation106_spill]] %s4640_s23  ;;  %v5539_v12 = vstv %s4640_s23 }
 0x194   : > { %5727 = sst [smem:[#allocation107_spill]] %s4644_s8  ;;  %v1622_v36 = vadd.f32 %v1620_v53, %v1604_v22  ;;  %v5542_v18 = vstv %s4644_s8  ;;  %v1520_v53 = vmul.f32 1.442695, %v1518_v4 }
 0x195   : > { %5729 = sst [smem:[#allocation108_spill]] %s4650_s26  ;;  %v5538_v5 = vstv %s4650_s26 }
 0x196   : > { %s4669_s28 = sld [smem:[#allocation12 + $0x605]]  ;;  %v5733_v8 = vstv %s5730_s15  ;;  %v1638_v54 = vmul.f32 %v3059_v62, %v5538_v5  ;;  %v1596_v5 = vmul.f32 %v3057_v11, %v5542_v18  ;;  %3036 = vpow2.f32 %v1520_v53 }
 0x197   : > { %s4672_s7 = sld [smem:[#allocation12 + $0x687]]  ;;  %v1069_v63 = vmul.f32 %v3986_v47, %v5733_v8  ;;  %v1626_v47 = vmul.f32 %v3058_v24, %v5539_v12 }
 0x198   : > { %5731 = sst [smem:[#allocation51_spill]] %s4658_s16  ;;  %v5551_v43 = vstv %s4658_s16 }
 0x199   : > { %s5734_s24 = sld [smem:[#allocation54_spill]]  ;;  %v1628_v52 = vadd.f32 %v1626_v47, %v1610_v19  ;;  %v1644_v22 = vmul.f32 %v3059_v62, %v5551_v43  ;;  %v1071_v8 = vadd.f32 %v1069_v63, %v4601_v60  ;;  %v1580_v47 = vadd.f32 %v1578_v2, %v1562_v56 }
 0x19a   : > { %s4681_s5 = sld [smem:[#allocation12 + $0x707]] }
 0x19b   : > { %s4687_s15 = sld [smem:[#allocation12 + $0x606]]  ;;  %v1646_v12 = vadd.f32 %v1644_v22, %v1628_v52  ;;  %v3035_v43 = vpop.eup %3034 }
 0x19c   : > { %s5735_s9 = sld [smem:[#allocation55_spill]] }
 0x19d   : > { %s4690_s3 = sld [smem:[#allocation12 + $0x688]]  ;;  %v5545_v37 = vstv %s4672_s7 }
 0x19e   : > { %s4700_s0 = sld [smem:[#allocation12 + $0x708]]  ;;  %v1656_v63 = vmul.f32 %v4622_v15, %v5545_v37  ;;  %v1598_v37 = vadd.f32 %v1596_v5, %v1580_v47 }
 0x19f   : > { %v5736_v59 = vstv %s5734_s24  ;;  %s4703_s23 = sld [smem:[#allocation12 + $0x489]] }
 0x1a0   : > { %v1093_v42 = vmul.f32 %v4042_v14, %v5736_v59  ;;  %s5739_s24 = sld [smem:[#allocation57_spill]]  ;;  %v1640_v59 = vadd.f32 %v1638_v54, %v1622_v36  ;;  %v5544_v60 = vstv %s4681_s5  ;;  %v4732_v36 = vld [vmem:[%s3577_s10 + $0x80] sm:$0xff] }
 0x1a1   : > { %s4712_s26 = sld [smem:[#allocation12 + $0x689]]  ;;  %v1662_v2 = vmul.f32 %v4622_v15, %v5544_v60  ;;  %v1478_v52 = vmul.f32 %v4732_v36, %v5546_v55 }
 0x1a2   : > { %v5738_v50 = vstv %s5735_s9  ;;  %s5740_s9 = sld [smem:[#allocation58_spill]]  ;;  %v1095_v11 = vadd.f32 %v1093_v42, %v1077_v38  ;;  %v1658_v54 = vadd.f32 %v1656_v63, %v1640_v59 }
 0x1a3   : > { %v1087_v19 = vmul.f32 %v4042_v14, %v5738_v50  ;;  %s4720_s16 = sld [smem:[#allocation12 + $0x709]]  ;;  %v5548_v14 = vstv %s4669_s28  ;;  %v5547_v22 = vstv %s4690_s3  ;;  %v1664_v18 = vadd.f32 %v1662_v2, %v1646_v12 }
 0x1a4   : > { %s4723_s29 = sld [smem:[#allocation12 + $0x607]]  ;;  %v1674_v38 = vmul.f32 %v4732_v36, %v5547_v22  ;;  %v5550_v42 = vstv %s4700_s0  ;;  %v1614_v59 = vmul.f32 %v3058_v24, %v5548_v14  ;;  %v5555_v12 = vstv %s4687_s15  ;;  %v4753_v22 = vld [vmem:[%s3577_s10 + $0x90] sm:$0xff] }
 0x1a5   : > { %5737 = sst [smem:[#allocation54_spill]] %s4703_s23  ;;  %v1089_v50 = vadd.f32 %v1087_v19, %v1071_v8  ;;  %v1680_v8 = vmul.f32 %v4732_v36, %v5550_v42  ;;  %v1632_v14 = vmul.f32 %v3059_v62, %v5555_v12  ;;  %v1730_v62 = vadd.f32 1.0, %v3035_v43 }
 0x1a6   : > { %v5742_v4 = vstv %s5739_s24  ;;  %s5743_s8 = sld [smem:[#allocation59_spill]]  ;;  %v1676_v19 = vadd.f32 %v1674_v38, %v1658_v54  ;;  %v5748_v54 = vstv %s4033_s22  ;;  %v1187_v43 = vmul.f32 %v4796_v26, %v1185_v32 }
 0x1a7   : > { %v1111_v56 = vmul.f32 %v4101_v20, %v5742_v4  ;;  %v5549_v63 = vstv %s4712_s26  ;;  %s5745_s24 = sld [smem:[#allocation37_spill]]  ;;  %v1682_v55 = vadd.f32 %v1680_v8, %v1664_v18  ;;  %v1616_v8 = vadd.f32 %v1614_v59, %v1598_v37 }
 0x1a8   : > { %v5744_v4 = vstv %s5740_s9  ;;  %v1692_v5 = vmul.f32 %v4753_v22, %v5549_v63  ;;  %s4763_s9 = sld [smem:[#allocation12 + $0x608]]  ;;  %3038 = vrcp.f32 %v1730_v62 }
 0x1a9   : > { %v1105_v60 = vmul.f32 %v4101_v20, %v5744_v4  ;;  %v1113_v2 = vadd.f32 %v1111_v56, %v1095_v11  ;;  %v5553_v53 = vstv %s4720_s16  ;;  %v1495_v4 = vstv %s4703_s23  ;;  %v4769_v56 = vld [vmem:[%s3577_s10 + $0x8] sm:$0xff]  ;;  %s5753_s22 = sld [smem:[#allocation64_spill]] }
 0x1aa   : > { %5741 = sst [smem:[#allocation55_spill]] %s4723_s29  ;;  %v1698_v11 = vmul.f32 %v4753_v22, %v5553_v53  ;;  %v1155_v38 = vmul.f32 %v4769_v56, %v5748_v54  ;;  %v1694_v63 = vadd.f32 %v1692_v5, %v1676_v19  ;;  %v1649_v9 = vstv %s4723_s29 }
 0x1ab   : > { %v1107_v18 = vadd.f32 %v1105_v60, %v1089_v50  ;;  %v4781_v60 = vld [vmem:[%s3577_s10 + $0x18] sm:$0xff]  ;;  %v5751_v50 = vstv %s4054_s2  ;;  %v5752_v54 = vstv %s4059_s30  ;;  %v5755_v19 = vstv %s4008_s14  ;;  %s5756_s2 = sld [smem:[#allocation66_spill]] }
 0x1ac   : > { %v5746_v24 = vstv %s5743_s8  ;;  %v1700_v53 = vadd.f32 %v1698_v11, %v1682_v55  ;;  %v1169_v21 = vmul.f32 %v4781_v60, %v5751_v50  ;;  %v1175_v37 = vmul.f32 %v4781_v60, %v5752_v54  ;;  %v3064_v11 = vld [vmem:[%s3602_s27] sm:$0xff]  ;;  %s5758_s30 = sld [smem:[#allocation69_spill]] }
 0x1ad   : > { %v1129_v47 = vmul.f32 %v4163_v39, %v5746_v24  ;;  %v5749_v24 = vstv %s5745_s24  ;;  %s4789_s24 = sld [smem:[#allocation12 + $0x609]]  ;;  %v1702_v59 = vsub.f32 0.0, %v1694_v63  ;;  %v1123_v5 = vmul.f32 %v4163_v39, %v5755_v19 }
 0x1ae   : > { %5747 = sst [smem:[#allocation57_spill]] %s4763_s9  ;;  %v1159_v42 = vmul.f32 %v4769_v56, %v5749_v24  ;;  %v1704_v24 = vsub.f32 %v3064_v11, %v1700_v53  ;;  %v1171_v12 = vadd.f32 %v1169_v21, %v1155_v38  ;;  %v1480_v54 = vadd.f32 %v1478_v52, %v4664_v27 }
 0x1af   : > { %v1131_v55 = vadd.f32 %v1129_v47, %v1113_v2  ;;  %v1496_v63 = vmul.f32 %v4753_v22, %v1495_v4  ;;  %v1634_v61 = vadd.f32 %v1632_v14, %v1616_v8  ;;  %v5757_v19 = vstv %s5753_s22  ;;  %v4812_v47 = vld [vmem:[%s3577_s10 + $0x38] sm:$0xff]  ;;  %s5761_s11 = sld [smem:[#allocation60_spill]] }
 0x1b0   : > { %v1177_v50 = vadd.f32 %v1175_v37, %v1159_v42  ;;  %v1193_v2 = vmul.f32 %v4796_v26, %v5757_v19  ;;  %v1650_v21 = vmul.f32 %v4622_v15, %v1649_v9  ;;  %v1706_v42 = vmul.f32 %v1704_v24, %v1704_v24  ;;  %s5763_s8 = sld [smem:[#allocation61_spill]] }
 0x1b1   : > { %v1189_v53 = vadd.f32 %v1187_v43, %v1171_v12  ;;  %v1205_v32 = vmul.f32 %v4812_v47, %v1203_v7  ;;  %v1334_v27 = vmul.f32 %v4660_v58, %v4562_v40  ;;  %v1125_v14 = vadd.f32 %v1123_v5, %v1107_v18  ;;  %v4825_v7 = vld [vmem:[%s3577_s10 + $0x48] sm:$0xff]  ;;  %v3037_v5 = vpop.eup %3036  ;;  %s5765_s29 = sld [smem:[#allocation116_spill]] }
 0x1b2   : > { %v1195_v52 = vadd.f32 %v1193_v2, %v1177_v50  ;;  %v5759_v38 = vstv %s5756_s2  ;;  %v1667_v15 = vstv %s4763_s9  ;;  %v1708_v12 = vmul.f32 %v1706_v42, %v1702_v59  ;;  %s5767_s17 = sld [smem:[#allocation53_spill]] }
 0x1b3   : > { %5754 = sst [smem:[#allocation58_spill]] %s4789_s24  ;;  %v1211_v8 = vmul.f32 %v4812_v47, %v5759_v38  ;;  %v1135_v37 = vsub.f32 %v4223_v31, %v1131_v55  ;;  %v1207_v24 = vadd.f32 %v1205_v32, %v1189_v53  ;;  %v1223_v40 = vmul.f32 %v4825_v7, %v1221_v10  ;;  %v4837_v55 = vld [vmem:[%s3577_s10 + $0x58] sm:$0xff] }
 0x1b4   : > { %v5762_v58 = vstv %s5758_s30  ;;  %v1498_v62 = vadd.f32 %v1496_v63, %v1480_v54  ;;  %v1652_v50 = vadd.f32 %v1650_v21, %v1634_v61  ;;  %v1710_v19 = vmul.f32 1.442695, %v1708_v12  ;;  %s5769_s23 = sld [smem:[#allocation62_spill]] }
 0x1b5   : > { %v1213_v43 = vadd.f32 %v1211_v8, %v1195_v52  ;;  %v1229_v18 = vmul.f32 %v4825_v7, %v5762_v58  ;;  %v1247_v2 = vmul.f32 %v4837_v55, %v1245_v29  ;;  %v1668_v10 = vmul.f32 %v4732_v36, %v1667_v15  ;;  %s5774_s2 = sld [smem:[#allocation77_spill]] }
 0x1b6   : > { %v1685_v42 = vstv %s4789_s24  ;;  %v1133_v53 = vsub.f32 0.0, %v1125_v14  ;;  %3040 = vpow2.f32 %v1710_v19  ;;  %v1137_v61 = vmul.f32 %v1135_v37, %v1135_v37  ;;  %s5777_s22 = sld [smem:[#allocation56_spill]] }
 0x1b7   : > { %v1739_v59 = vld [vmem:[%s5765_s29] sm:$0xff]  ;;  %v1231_v54 = vadd.f32 %v1229_v18, %v1213_v43  ;;  %v5766_v63 = vstv %s5761_s11  ;;  %v5768_v32 = vstv %s5763_s8  ;;  %v952_v36 = vmul.f32 1.442695, %v4310_v45  ;;  %s5772_s11 = sld [smem:[#allocation84_spill]]  ;;  %v4862_v43 = vld [vmem:[%s3577_s10 + $0x68] sm:$0xff] }
 0x1b8   : > { %v1151_v21 = vmul.f32 %v4769_v56, %v5766_v63  ;;  %v1163_v52 = vmul.f32 %v4781_v60, %v5768_v32  ;;  %v4852_v29 = vmul.f32 %v3064_v11, %v1739_v59  ;;  %v1225_v38 = vadd.f32 %v1223_v40, %v1207_v24  ;;  %s5773_s8 = sld [smem:[#allocation39_spill]]  ;;  %v4871_v40 = vld [vmem:[%s3577_s10 + $0x78] sm:$0xff] }
 0x1b9   : > { %v1241_v14 = vmul.f32 %v4837_v55, %v1239_v46  ;;  %v1336_v8 = vadd.f32 %v1334_v27, %v4460_v23  ;;  %v1065_v12 = vadd.f32 %v4633_v44, %v4572_v25  ;;  %v1249_v37 = vadd.f32 %v1247_v2, %v1231_v54  ;;  %s5775_s29 = sld [smem:[#allocation41_spill]] }
 0x1ba   : > { %v1265_v11 = vmul.f32 %v4862_v43, %v1263_v49  ;;  %v1524_v45 = vmul.f32 %v3037_v5, %v1498_v62  ;;  %v1670_v24 = vadd.f32 %v1668_v10, %v1652_v50  ;;  %v1686_v46 = vmul.f32 %v4753_v22, %v1685_v42  ;;  %s5783_s24 = sld [smem:[#allocation88_spill]] }
 0x1bb   : > { %v5776_v23 = vstv %s5767_s17  ;;  %v1139_v44 = vmul.f32 %v1137_v61, %v1133_v53  ;;  %v1165_v27 = vadd.f32 %v1163_v52, %v1151_v21  ;;  %v5778_v58 = vstv %s5769_s23  ;;  %s5782_s17 = sld [smem:[#allocation76_spill]] }
 0x1bc   : > { %v1081_v25 = vmul.f32 %v4871_v40, %v5776_v23  ;;  %v1181_v18 = vmul.f32 %v4796_v26, %v5778_v58  ;;  %v1345_v49 = vmul.f32 %v4769_v56, %v1343_v35  ;;  %v1243_v5 = vadd.f32 %v1241_v14, %v1225_v38  ;;  %s5786_s23 = sld [smem:[#allocation80_spill]] }
 0x1bd   : > { %v1259_v62 = vmul.f32 %v4862_v43, %v1257_v3  ;;  %v5780_v22 = vstv %s5772_s11  ;;  %3042 = vpow2.f32 %v952_v36  ;;  %v1267_v2 = vadd.f32 %v1265_v11, %v1249_v37  ;;  %s5788_s30 = sld [smem:[#allocation90_spill]] }
 0x1be   : > { %v1349_v50 = vmul.f32 %v4769_v56, %v5780_v22  ;;  %v5781_v19 = vstv %s5773_s8  ;;  %v5784_v10 = vstv %s5774_s2  ;;  %v1526_v61 = vadd.f32 %v1524_v45, %v1336_v8  ;;  %s5789_s14 = sld [smem:[#allocation65_spill]]  ;;  %v3039_v8 = vpop.eup %3038 }
 0x1bf   : > { %v1359_v59 = vmul.f32 %v4781_v60, %v5781_v19  ;;  %v1283_v53 = vmul.f32 %v4871_v40, %v5784_v10  ;;  %v5785_v54 = vstv %s5775_s29  ;;  %v4897_v3 = vadd.f32 %v1081_v25, %v1065_v12  ;;  %s5790_s11 = sld [smem:[#allocation68_spill]] }
 0x1c0   : > { %v1365_v35 = vmul.f32 %v4781_v60, %v5785_v54  ;;  %v5787_v63 = vstv %s5777_s22  ;;  %v1688_v52 = vadd.f32 %v1686_v46, %v1670_v24  ;;  %v1142_v36 = vmul.f32 1.442695, %v1139_v44  ;;  %s5792_s29 = sld [smem:[#allocation79_spill]]  ;;  %v4914_v24 = vld [vmem:[%s3577_s10 + $0x88] sm:$0xff] }
 0x1c1   : > { %v4902_v21 = vmul.f32 %v4101_v20, %v5787_v63  ;;  %v1361_v32 = vadd.f32 %v1359_v59, %v1345_v49  ;;  %v1377_v14 = vmul.f32 %v4796_v26, %v1375_v13  ;;  %s5793_s2 = sld [smem:[#allocation82_spill]]  ;;  %v1183_v12 = vadd.f32 %v1181_v18, %v1165_v27 }
 0x1c2   : > { %v1367_v38 = vadd.f32 %v1365_v35, %v1349_v50  ;;  %s5794_s9 = sld [smem:[#allocation93_spill]]  ;;  %v1261_v37 = vadd.f32 %v1259_v62, %v1243_v5  ;;  %v5795_v11 = vstv %s5782_s17  ;;  %v5796_v45 = vstv %s5783_s24 }
 0x1c3   : > { %v1277_v20 = vmul.f32 %v4871_v40, %v5795_v11  ;;  %v1383_v23 = vmul.f32 %v4796_v26, %v5796_v45  ;;  %v1285_v25 = vadd.f32 %v1283_v53, %v1267_v2  ;;  %v5797_v46 = vstv %s5786_s23  ;;  %s5798_s22 = sld [smem:[#allocation94_spill]]  ;;  %v3041_v63 = vpop.eup %3040 }
 0x1c4   : > { %v1301_v44 = vmul.f32 %v4914_v24, %v5797_v46  ;;  %v1379_v58 = vadd.f32 %v1377_v14, %v1361_v32  ;;  %v5799_v13 = vstv %s5788_s30  ;;  %v5800_v27 = vstv %s5789_s14  ;;  %s5803_s24 = sld [smem:[#allocation83_spill]] }
 0x1c5   : > { %v1395_v49 = vmul.f32 %v4812_v47, %v5799_v13  ;;  %v1199_v18 = vmul.f32 %v4812_v47, %v5800_v27  ;;  %v5801_v5 = vstv %s5790_s11  ;;  %v1385_v22 = vadd.f32 %v1383_v23, %v1367_v38  ;;  %s5808_s23 = sld [smem:[#allocation85_spill]] }
 0x1c6   : > { %v1217_v62 = vmul.f32 %v4825_v7, %v5801_v5  ;;  %v1401_v50 = vmul.f32 %v4812_v47, %v1399_v34  ;;  %v5804_v19 = vstv %s5792_s29  ;;  %v5809_v32 = vsub.s32 0, %v4082_v48  ;;  %s5811_s30 = sld [smem:[#allocation81_spill]] }
 0x1c7   : > { %v1295_v59 = vmul.f32 %v4914_v24, %v5804_v19  ;;  %v5805_v2 = vstv %s5793_s2  ;;  %v1397_v53 = vadd.f32 %v1395_v49, %v1379_v58  ;;  %v1279_v14 = vadd.f32 %v1277_v20, %v1261_v37  ;;  %s5816_s14 = sld [smem:[#allocation70_spill]] }
 0x1c8   : > { %v1319_v10 = vmul.f32 %v4163_v39, %v5805_v2  ;;  %v5807_v54 = vstv %s5794_s9  ;;  %v4942_v38 = vrot.slane %v3039_v8, %v5809_v32  ;;  %v1403_v34 = vadd.f32 %v1401_v50, %v1385_v22  ;;  %s5813_s9 = sld [smem:[#allocation86_spill]] }
 0x1c9   : > { %v1413_v35 = vmul.f32 %v4825_v7, %v5807_v54  ;;  %v5810_v11 = vstv %s5798_s22  ;;  %v1714_v23 = vmul.f32 %v3041_v63, %v1688_v52  ;;  %v1303_v39 = vadd.f32 %v1301_v44, %v1285_v25  ;;  %s5819_s25 = sld [smem:[#allocation45_spill]] }
 0x1ca   : > { %v1419_v45 = vmul.f32 %v4825_v7, %v5810_v11  ;;  %v1431_v58 = vmul.f32 %v4837_v55, %v1429_v30  ;;  %v1201_v13 = vadd.f32 %v1199_v18, %v1183_v12  ;;  %v5812_v49 = vstv %s5803_s24  ;;  %v4963_v12 = vld [vmem:[%s3577_s10 + $0x98] sm:$0xff]  ;;  %s5818_s10 = sld [smem:[#allocation44_spill]] }
 0x1cb   : > { %v1415_v46 = vadd.f32 %v1413_v35, %v1397_v53  ;;  %v1341_v48 = vmul.f32 %v4769_v56, %v5812_v49  ;;  %v1437_v37 = vmul.f32 %v4837_v55, %v1435_v17  ;;  %v1716_v20 = vadd.f32 %v1714_v23, %v1526_v61  ;;  %s5820_s20 = sld [smem:[#allocation47_spill]] }
 0x1cc   : > { %v1421_v8 = vadd.f32 %v1419_v45, %v1403_v34  ;;  %v5814_v27 = vstv %s5808_s23  ;;  %v1449_v44 = vmul.f32 %v4862_v43, %v1447_v33  ;;  %v1297_v30 = vadd.f32 %v1295_v59, %v1279_v14  ;;  %v4975_v59 = vpop.eup %3042  ;;  %s5821_s4 = sld [smem:[#allocation89_spill]] }
 0x1cd   : > { %v1353_v52 = vmul.f32 %v4781_v60, %v5814_v27  ;;  %v1433_v25 = vadd.f32 %v1431_v58, %v1415_v46  ;;  %v5815_v18 = vstv %s5811_s30  ;;  %v1455_v17 = vmul.f32 %v4862_v43, %v1453_v16  ;;  %s5822_s11 = sld [smem:[#allocation98_spill]] }
 0x1ce   : > { %v1313_v5 = vmul.f32 %v4963_v12, %v5815_v18  ;;  %v1439_v22 = vadd.f32 %v1437_v37, %v1421_v8  ;;  %v1737_v61 = vmul.f32 %v4942_v38, %v1716_v20  ;;  %v1321_v50 = vadd.f32 %v1319_v10, %v1303_v39  ;;  %s5824_s8 = sld [smem:[#allocation99_spill]] }
 0x1cf   : > { %v1451_v19 = vadd.f32 %v1449_v44, %v1433_v25  ;;  %v1467_v33 = vmul.f32 %v4871_v40, %v1465_v51  ;;  %3044 = vpow2.f32 %v1142_v36  ;;  %v5817_v2 = vstv %s5813_s9  ;;  %s5825_s21 = sld [smem:[#allocation48_spill]] }
 0x1d0   : > { %v1371_v53 = vmul.f32 %v4796_v26, %v5817_v2  ;;  %v1457_v54 = vadd.f32 %v1455_v17, %v1439_v22  ;;  %v1473_v16 = vmul.f32 %v4871_v40, %v1471_v41  ;;  %v4984_v35 = vadd.f32 %v4852_v29, %v1737_v61  ;;  %s5826_s29 = sld [smem:[#allocation49_spill]] }
 0x1d1   : > { %v1355_v10 = vadd.f32 %v1353_v52, %v1341_v48  ;;  %v1469_v63 = vadd.f32 %v1467_v33, %v1451_v19  ;;  %v1485_v51 = vmul.f32 %v4914_v24, %v1483_v6  ;;  %v1219_v36 = vadd.f32 %v1217_v62, %v1201_v13  ;;  %s5829_s13 = sld [smem:[#allocation100_spill]] }
 0x1d2   : > { %v5823_v32 = vstv %s5816_s14  ;;  %v1475_v34 = vadd.f32 %v1473_v16, %v1457_v54  ;;  %v1491_v41 = vmul.f32 %v4914_v24, %v1489_v57  ;;  %2847 = vmatprep.mubr.msk.f32.mxu1 %vm1754_vm3, %v4984_v35  ;;  %v1315_v29 = vadd.f32 %v1313_v5, %v1297_v30  ;;  %s5833_s12 = sld [smem:[#allocation102_spill]] }
 0x1d3   : > { %v1235_v14 = vmul.f32 %v4837_v55, %v5823_v32  ;;  %v1325_v11 = vsub.f32 %v4223_v31, %v1321_v50  ;;  %v5827_v6 = vstv %s4490_s18  ;;  %v5828_v45 = vstv %s5818_s10  ;;  %s5837_s18 = sld [smem:[#allocation50_spill]] }
 0x1d4   : > { %v1503_v62 = vmul.f32 %v4963_v12, %v5827_v6  ;;  %v1509_v23 = vmul.f32 %v4963_v12, %v5828_v45  ;;  %v1487_v39 = vadd.f32 %v1485_v51, %v1469_v63  ;;  %v1493_v46 = vadd.f32 %v1491_v41, %v1475_v34  ;;  %s5840_s2 = sld [smem:[#allocation101_spill]] }
 0x1d5   : > { %v5830_v58 = vstv %s5819_s25  ;;  %v5831_v13 = vstv %s5820_s20  ;;  %v1373_v48 = vadd.f32 %v1371_v53, %v1355_v10  ;;  %v5832_v8 = vstv %s5821_s4  ;;  %s5841_s22 = sld [smem:[#allocation104_spill]] }
 0x1d6   : > { %v1535_v57 = vmul.f32 %v4769_v56, %v5830_v58  ;;  %v1539_v49 = vmul.f32 %v4769_v56, %v5831_v13  ;;  %v1389_v31 = vmul.f32 %v4812_v47, %v5832_v8  ;;  %v5834_v37 = vstv %s5822_s11  ;;  %s5842_s19 = sld [smem:[#allocation105_spill]] }
 0x1d7   : > { %v1549_v20 = vmul.f32 %v4781_v60, %v5834_v37  ;;  %v5835_v27 = vstv %s5824_s8  ;;  %v1511_v25 = vadd.f32 %v1509_v23, %v1493_v46  ;;  %v5836_v44 = vstv %s4502_s6  ;;  %s5843_s24 = sld [smem:[#allocation95_spill]] }
 0x1d8   : > { %v1555_v52 = vmul.f32 %v4781_v60, %v5835_v27  ;;  %v1531_v30 = vmul.f32 %v4769_v56, %v5836_v44  ;;  %v5838_v18 = vstv %s5825_s21  ;;  %v5839_v22 = vstv %s5826_s29  ;;  %s5845_s6 = sld [smem:[#allocation52_spill]]  ;;  %v5032_v56 = vld [vmem:[%s3602_s27 + $0x8] sm:$0xff] }
 0x1d9   : > { %v1543_v5 = vmul.f32 %v4781_v60, %v5838_v18  ;;  %v1567_v17 = vmul.f32 %v4796_v26, %v5839_v22  ;;  %v1323_v61 = vsub.f32 0.0, %v1315_v29  ;;  %v1551_v50 = vadd.f32 %v1549_v20, %v1535_v57  ;;  %s5847_s17 = sld [smem:[#allocation106_spill]] }
 0x1da   : > { %v1557_v19 = vadd.f32 %v1555_v52, %v1539_v49  ;;  %v5844_v33 = vstv %s5829_s13  ;;  %v1327_v53 = vmul.f32 %v1325_v11, %v1325_v11  ;;  %v1505_v54 = vadd.f32 %v1503_v62, %v1487_v39  ;;  %s5849_s23 = sld [smem:[#allocation108_spill]] }
 0x1db   : > { %v1573_v2 = vmul.f32 %v4796_v26, %v5844_v33  ;;  %v1515_v60 = vsub.f32 %v5032_v56, %v1511_v25  ;;  %v5846_v16 = vstv %s5833_s12  ;;  %v1391_v63 = vadd.f32 %v1389_v31, %v1373_v48  ;;  %s5851_s30 = sld [smem:[#allocation51_spill]] }
 0x1dc   : > { %v1585_v10 = vmul.f32 %v4812_v47, %v5846_v16  ;;  %v1569_v51 = vadd.f32 %v1567_v17, %v1551_v50  ;;  %v5848_v34 = vstv %s5837_s18  ;;  %v1545_v29 = vadd.f32 %v1543_v5, %v1531_v30  ;;  %s5854_s27 = sld [smem:[#allocation73_spill]]  ;;  %v5059_v27 = vpop.eup %3044 }
 0x1dd   : > { %v1575_v32 = vadd.f32 %v1573_v2, %v1557_v19  ;;  %v1591_v41 = vmul.f32 %v4812_v47, %v5848_v34  ;;  %v5850_v6 = vstv %s5840_s2  ;;  %v5852_v62 = vstv %s5841_s22  ;;  %s5856_s9 = sld [smem:[#allocation103_spill]] }
 0x1de   : > { %v1561_v11 = vmul.f32 %v4796_v26, %v5850_v6  ;;  %v1603_v45 = vmul.f32 %v4825_v7, %v5852_v62  ;;  %v5853_v23 = vstv %s5842_s19  ;;  %v5855_v46 = vstv %s5843_s24  ;;  %s5859_s14 = sld [smem:[#allocation42_spill]] }
 0x1df   : > { %v1609_v39 = vmul.f32 %v4825_v7, %v5853_v23  ;;  %v1407_v58 = vmul.f32 %v4825_v7, %v5855_v46  ;;  %v1587_v57 = vadd.f32 %v1585_v10, %v1569_v51  ;;  %v1593_v13 = vadd.f32 %v1591_v41, %v1575_v32  ;;  %s5863_s10 = sld [smem:[#allocation75_spill]] }
 0x1e0   : > { %v5857_v49 = vstv %s5845_s6  ;;  %v1329_v8 = vmul.f32 %v1327_v53, %v1323_v61  ;;  %v1513_v26 = vsub.f32 0.0, %v1505_v54  ;;  %v1517_v31 = vmul.f32 %v1515_v60, %v1515_v60  ;;  %s5865_s25 = sld [smem:[#allocation107_spill]] }
 0x1e1   : > { %v1621_v48 = vmul.f32 %v4837_v55, %v5857_v49  ;;  %v5858_v37 = vstv %s5847_s17  ;;  %v1605_v52 = vadd.f32 %v1603_v45, %v1587_v57  ;;  %v1611_v25 = vadd.f32 %v1609_v39, %v1593_v13  ;;  %s5869_s20 = sld [smem:[#allocation43_spill]] }
 0x1e2   : > { %v1627_v20 = vmul.f32 %v4837_v55, %v5858_v37  ;;  %v5860_v44 = vstv %s5849_s23  ;;  %v5861_v18 = vstv %s5851_s30  ;;  %v1237_v22 = vadd.f32 %v1235_v14, %v1219_v36  ;;  %s5875_s4 = sld [smem:[#allocation122_spill]] }
 0x1e3   : > { %v1639_v30 = vmul.f32 %v4862_v43, %v5860_v44  ;;  %v1645_v5 = vmul.f32 %v4862_v43, %v5861_v18  ;;  %v5862_v17 = vstv %s5854_s27  ;;  %v1563_v50 = vadd.f32 %v1561_v11, %v1545_v29  ;;  %s5880_s8 = sld [smem:[#allocation78_spill]] }
 0x1e4   : > { %v1253_v61 = vmul.f32 %v4862_v43, %v5862_v17  ;;  %v5864_v19 = vstv %s5856_s9  ;;  %v1623_v2 = vadd.f32 %v1621_v48, %v1605_v52  ;;  %v1629_v53 = vadd.f32 %v1627_v20, %v1611_v25  ;;  %s5881_s21 = sld [smem:[#allocation46_spill]] }
 0x1e5   : > { %v1579_v33 = vmul.f32 %v4812_v47, %v5864_v19  ;;  %v5866_v54 = vstv %s4672_s7  ;;  %v5867_v16 = vstv %s4681_s5  ;;  %v1332_v51 = vmul.f32 1.442695, %v1329_v8  ;;  %s5885_s13 = sld [smem:[#allocation92_spill]] }
 0x1e6   : > { %v1657_v60 = vmul.f32 %v4871_v40, %v5866_v54  ;;  %v1663_v10 = vmul.f32 %v4871_v40, %v5867_v16  ;;  %v1409_v36 = vadd.f32 %v1407_v58, %v1391_v63  ;;  %v5868_v14 = vstv %s5859_s14  ;;  %s5896_s27 = sld [smem:[#allocation116_spill]] }
 0x1e7   : > { %v1425_v32 = vmul.f32 %v4837_v55, %v5868_v14  ;;  %v1519_v34 = vmul.f32 %v1517_v31, %v1513_v26  ;;  %v1641_v41 = vadd.f32 %v1639_v30, %v1623_v2  ;;  %v1647_v29 = vadd.f32 %v1645_v5, %v1629_v53  ;;  %s5900_s2 = sld [smem:[#allocation123_spill]] }
 0x1e8   : > { %v5870_v47 = vstv %s4690_s3  ;;  %v5871_v11 = vstv %s4700_s0  ;;  %v5872_v45 = vstv %s5863_s10  ;;  %v1581_v39 = vadd.f32 %v1579_v33, %v1563_v50  ;;  %v1943_v13 = vld [vmem:[%s5875_s4 + $0x10] sm:$0xff]  ;;  %s5876_s0 = sld [smem:[#allocation38_spill]] }
 0x1e9   : > { %v1675_v6 = vmul.f32 %v4914_v24, %v5870_v47  ;;  %v1681_v62 = vmul.f32 %v4914_v24, %v5871_v11  ;;  %v1271_v23 = vmul.f32 %v4871_v40, %v5872_v45  ;;  %v5873_v46 = vstv %s5865_s25  ;;  %v1944_v49 = vld [vmem:[%s5875_s4 + $0x18] sm:$0xff]  ;;  %v1942_v50 = vld [vmem:[%s5875_s4 + $0x8] sm:$0xff]  ;;  %s5897_s10 = sld [smem:[#allocation121_spill]] }
 0x1ea   : > { %v1597_v63 = vmul.f32 %v4825_v7, %v5873_v46  ;;  %v5874_v58 = vstv %s4712_s26  ;;  %v1659_v48 = vadd.f32 %v1657_v60, %v1641_v41  ;;  %v1665_v8 = vadd.f32 %v1663_v10, %v1647_v29  ;;  %s5879_s26 = sld [smem:[#allocation67_spill]] }
 0x1eb   : > { %v1693_v57 = vmul.f32 %v4963_v12, %v5874_v58  ;;  %v5877_v26 = vstv %s4720_s16  ;;  %v1255_v37 = vadd.f32 %v1253_v61, %v1237_v22  ;;  %v1427_v20 = vadd.f32 %v1425_v32, %v1409_v36  ;;  %s5902_s6 = sld [smem:[#allocation118_spill]] }
 0x1ec   : > { %v1699_v31 = vmul.f32 %v4963_v12, %v5877_v26  ;;  %v5878_v7 = vstv %s5869_s20  ;;  %v3294_v25 = vmov 0   ;;  %3046 = vpow2.f32 %v1332_v51  ;;  %s5904_s9 = sld [smem:[#allocation120_spill]] }
 0x1ed   : > { %v1443_v52 = vmul.f32 %v4862_v43, %v5878_v7  ;;  %3027 = vset.pattern.permute.xlu1 %v3294_v25  ;;  %3026 = vset.pattern.permute.xlu0 %v3294_v25  ;;  %v1522_v44 = vmul.f32 1.442695, %v1519_v34  ;;  %v1677_v30 = vadd.f32 %v1675_v6, %v1659_v48  ;;  %v1683_v18 = vadd.f32 %v1681_v62, %v1665_v8  ;;  %s5901_s19 = smov %s5900_s2 }
 0x1ee   : > { %1957 = vperm.xlu1 %3027, %v1943_v13   ;;  %1962 = vperm.xlu0 %3026, %v1944_v49   ;;  %v908_v5 = vadd.f32 %v4253_v0, %v4073_v28  ;;  %v5882_v22 = vstv %s5876_s0  ;;  %v1101_v61 = vadd.f32 %v4902_v21, %v4897_v3  ;;  %v1599_v19 = vadd.f32 %v1597_v63, %v1581_v39  ;;  %s5898_s0 = sld [smem:[#allocation119_spill]] }
 0x1ef   : > { %v927_v17 = vmul.f32 %v4963_v12, %v5882_v22  ;;  %v5883_v33 = vstv %s4669_s28  ;;  %v1695_v53 = vadd.f32 %v1693_v57, %v1677_v30  ;;  %v1701_v54 = vadd.f32 %v1699_v31, %v1683_v18 }
 0x1f0   : > { %v1615_v2 = vmul.f32 %v4837_v55, %v5883_v33  ;;  %v5884_v60 = vstv %s5879_s26  ;;  %v1273_v0 = vadd.f32 %v1271_v23, %v1255_v37  ;;  %v5886_v16 = vstv %s5880_s8  ;;  %v1941_v55 = vld [vmem:[%s5875_s4] sm:$0xff] }
 0x1f1   : > { %v1117_v28 = vmul.f32 %v4963_v12, %v5884_v60  ;;  %v1289_v10 = vmul.f32 %v4914_v24, %v5886_v16  ;;  %v5887_v3 = vstv %s5881_s21  ;;  %v1445_v51 = vadd.f32 %v1443_v52, %v1427_v20 }
 0x1f2   : > { %v1461_v21 = vmul.f32 %v4871_v40, %v5887_v3  ;;  %3048 = vpow2.f32 %v1522_v44  ;;  %v1703_v36 = vsub.f32 0.0, %v1695_v53  ;;  %v1705_v14 = vsub.f32 %v5032_v56, %v1701_v54  ;;  %1952 = vperm.xlu1 %3027, %v1942_v50   ;;  %v2066_v54 = vld [vmem:[%s5900_s2] sm:$0xff] }
 0x1f3   : > { %v1617_v32 = vadd.f32 %v1615_v2, %v1599_v19  ;;  %v5889_v34 = vstv %s4687_s15  ;;  %v929_v47 = vadd.f32 %v927_v17, %v908_v5  ;;  %v1291_v6 = vadd.f32 %v1289_v10, %v1273_v0  ;;  %s5894_s15 = sld [smem:[#allocation124_spill]]  ;;  %v1740_v17 = vld [vmem:[%s5896_s27 + $0x8] sm:$0xff] }
 0x1f4   : > { %v1633_v41 = vmul.f32 %v4862_v43, %v5889_v34  ;;  %v1707_v29 = vmul.f32 %v1705_v14, %v1705_v14  ;;  %v5891_v11 = vstv %s5885_s13  ;;  %v1119_v45 = vadd.f32 %v1117_v28, %v1101_v61  ;;  %s5899_s26 = smov %s5898_s0  ;;  %v2790_v28 = vld [vmem:[%s5902_s6] ss:$0 sm:$0xff] }
 0x1f5   : > { %v1307_v62 = vmul.f32 %v4963_v12, %v5891_v11  ;;  %v1463_v23 = vadd.f32 %v1461_v21, %v1445_v51  ;;  %v5892_v39 = vstv %s4612_s1  ;;  %v1651_v57 = vmul.f32 %v4871_v40, %v1649_v9  ;;  %v1840_v33 = vld [vmem:[%s5899_s26 + $0x10] sm:$0xff]  ;;  %v1839_v2 = vld [vmem:[%s5899_s26 + $0x8] sm:$0xff]  ;;  %v1838_v53 = vld [vmem:[%s5899_s26] sm:$0xff]  ;;  %s5903_s1 = sld [smem:[#allocation25_spill]] }
 0x1f6   : > { %v1479_v46 = vmul.f32 %v4914_v24, %v5892_v39  ;;  %v1709_v63 = vmul.f32 %v1707_v29, %v1703_v36  ;;  %1947 = vperm.xlu1 %3027, %v1941_v55   ;;  %v1635_v43 = vadd.f32 %v1633_v41, %v1617_v32  ;;  %v955_v49 = vmul.f32 %v4975_v59, %v929_v47 }
 0x1f7   : > { %v1309_v48 = vadd.f32 %v1307_v62, %v1291_v6  ;;  %v1145_v8 = vmul.f32 %v5059_v27, %v1119_v45  ;;  %v1497_v31 = vmul.f32 %v4963_v12, %v1495_v4  ;;  %v1669_v9 = vmul.f32 %v4914_v24, %v1667_v15 }
 0x1f8   : > { %v1712_v13 = vmul.f32 1.442695, %v1709_v63  ;;  %v1481_v26 = vadd.f32 %v1479_v46, %v1463_v23  ;;  %v1653_v7 = vadd.f32 %v1651_v57, %v1635_v43  ;;  %v1687_v4 = vmul.f32 %v4963_v12, %v1685_v42  ;;  %v1938_v42 = vld [vmem:[%s5897_s10 + $0x8] sm:$0xff]  ;;  %v1939_v12 = vld [vmem:[%s5897_s10 + $0x10] sm:$0xff] }
 0x1f9   : > { %v2068_v58 = vld [vmem:[%s5894_s15] sm:$0xff]  ;;  %v3047_v37 = vpop.eup %3046  ;;  %v2069_v20 = vld [vmem:[%s5894_s15 + $0x8] sm:$0xff]  ;;  %v1147_v40 = vadd.f32 %v1145_v8, %v955_v49  ;;  %v1742_v24 = vmul.f32 %v5032_v56, %v1740_v17  ;;  %v1841_v56 = vld [vmem:[%s5898_s0 + $0x18] sm:$0xff] }
 0x1fa   : > { %3050 = vpow2.f32 %v1712_v13  ;;  %2072 = vperm.xlu1 %3027, %v2068_v58   ;;  %v1335_v59 = vmul.f32 %v3047_v37, %v1309_v48  ;;  %v1499_v52 = vadd.f32 %v1497_v31, %v1481_v26  ;;  %v1671_v25 = vadd.f32 %v1669_v9, %v1653_v7  ;;  %2850 = vmatprep.subr.mxu1 %v1841_v56  ;;  %v2067_v63 = vld [vmem:[%s5901_s19 + $0x8] sm:$0xff]  ;;  %v2793_v58 = vld [vmem:[%s5904_s9] ss:$0 sm:$0xff] }
 0x1fb   : > { %s2796_s14 = sshll.u32 %s5903_s1, 4 }
 0x1fc   : > { %v1337_v44 = vadd.f32 %v1335_v59, %v1147_v40  ;;  %v1689_v18 = vadd.f32 %v1687_v4, %v1671_v25  ;;  %s1934_s25 = scalar_lea.vmem [#allocation2], %s2796_s14  ;;  %s2163_s20 = scalar_lea.vmem [#allocation3], %s2796_s14 }
 0x1fe   : > { %2077 = vperm.xlu1 %3027, %v2069_v20  }
 0x1ff   : > { %v3049_v27 = vpop.eup %3048 }
 0x200   : > { %v1525_v30 = vmul.f32 %v3049_v27, %v1499_v52 }
 0x202   : > { %v1527_v5 = vadd.f32 %v1525_v30, %v1337_v44 }
 0x207   : > { %v3051_v22 = vpop.eup %3050 }
 0x208   : > { %v1715_v61 = vmul.f32 %v3051_v22, %v1689_v18 }
 0x20a   : > { %v1717_v15 = vadd.f32 %v1715_v61, %v1527_v5 }
 0x20c   : > { %v1738_v50 = vmul.f32 %v4942_v38, %v1717_v15  ;;  %v1940_v38 = vld [vmem:[%s5897_s10 + $0x18] sm:$0xff] }
 0x20e   : > { %v5169_v19 = vadd.f32 %v1742_v24, %v1738_v50 }
 0x210   : > { %2861 = vmatprep.subr.mxu0 %v5169_v19  ;;  %2848 = vmatmul.mubr.msk.f32.vlgmr.msra.gmra.mxu1 %vm1754_vm3, %v5169_v19 }
 0x211   : > { %2862 = vmatpush3.msra.mxu0 %v5169_v19  ;;  %2851 = vmatpush3.msra.mxu1 %v1841_v56 }
 0x212   : > { %2863 = vmatprep.subr.mxu0 %v4984_v35  ;;  %2852 = vmatprep.subr.mxu1 %v1840_v33 }
 0x213   : > { %2864 = vmatpush3.msra.mxu0 %v4984_v35  ;;  %2853 = vmatpush3.msra.mxu1 %v1840_v33 }
 0x214   : > { %2866 = vmatmul.mubr.msk.f32.vlgmr.msra.gmra.mxu0 %vm1754_vm3, %v1938_v42  ;;  %2854 = vmatprep.subr.mxu1 %v1839_v2 }
 0x215   : > { %2868 = vmatprep.mubr.msk.f32.mxu0 %vm1754_vm3, %v1939_v12  ;;  %2855 = vmatpush3.msra.mxu1 %v1839_v2 }
 0x216   : > { %2856 = vmatprep.subr.mxu1 %v1838_v53 }
 0x217   : > { %2857 = vmatpush3.msra.mxu1 %v1838_v53 }
 0x218   : > { %2869 = vmatmul.mubr.msk.f32.gmra.mxu0 %vm1754_vm3, %v1940_v38 }
 0x219   : > { %2879 = vmatprep.mubr.msk.f32.mxu0 %vm1849_vm4, %v2066_v54  ;;  %v2193_v54 = vld [vmem:[#allocation6] sm:$0x1] }
 0x269   : > { %v1958_v60 = vpop.permute.xlu1 %1957  ;;  %v1963_v32 = vpop.permute.xlu0 %1962 }
 0x26d   : > { %v1953_v3 = vpop.permute.xlu1 %1952 }
 0x271   : > { %v1948_v41 = vpop.permute.xlu1 %1947 }
 0x275   : > { %v2073_v31 = vpop.permute.xlu1 %2072 }
 0x279   : > { %v2078_v40 = vpop.permute.xlu1 %2077 }
 0x2d0   : > { %v2849_v0 = vpop.f32.mrf.mxu1 }
 0x2d1   : > { %v1833_v16 = vadd.f32 %v2849_v0, %v2790_v28  ;;  %v2206_v0 = vld [vmem:[#allocation7] sm:$0x1] }
 0x2d2   : > { %v1827_v10 = vpop.f32.mrf.mxu1 }
 0x2d3   : > { %v1828_v21 = vadd.f32 %v2790_v28, %v1827_v10  ;;  %v1837_v14 = vmax.f32 %v1833_v16, 0.0 }
 0x2d4   : > { %v2867_v51 = vpop.f32.mrf.mxu0 }
 0x2d5   : > { %v1836_v36 = vmax.f32 %v1828_v21, 0.0  ;;  %v2049_v47 = vadd.f32 %v2867_v51, %v1953_v3  ;;  %v2167_v21 = vld [vmem:[#allocation4 + $0x8] sm:$0xff] }
 0x2d6   : > { %v2043_v55 = vpop.f32.mrf.mxu0 }
 0x2d7   : > { %2858 = vmatprep.mubr.msk.f32.mxu1 %vm1849_vm4, %v1836_v36  ;;  %v2044_v45 = vadd.f32 %v2043_v55, %v1948_v41  ;;  %v2063_v23 = vmax.f32 %v2049_v47, 0.0  ;;  %v2166_v36 = vld [vmem:[#allocation4] sm:$0xff]  ;;  %v2180_v47 = vld [vmem:[#allocation5 + $0x8] sm:$0xff] }
 0x2d8   : > { %v2870_v34 = vpop.f32.mrf.mxu0  ;;  %2859 = vmatmul.mubr.msk.f32.vlgmr.msra.gmra.mxu1 %vm1849_vm4, %v1837_v14 }
 0x2d9   : > { %v2059_v29 = vadd.f32 %v2870_v34, %v1963_v32  ;;  %v2062_v46 = vmax.f32 %v2044_v45, 0.0  ;;  %v2179_v34 = vld [vmem:[#allocation5] sm:$0xff] }
 0x2da   : > { %v2053_v6 = vpop.f32.mrf.mxu0 }
 0x2db   : > { %v2065_v11 = vmax.f32 %v2059_v29, 0.0  ;;  %v2054_v62 = vadd.f32 %v2053_v6, %v1958_v60 }
 0x2dd   : > { %v2064_v39 = vmax.f32 %v2054_v62, 0.0  ;;  %2871 = vmatprep.subr.mxu0 %v2065_v11 }
 0x2de   : > { %2872 = vmatpush3.msra.mxu0 %v2065_v11 }
 0x2df   : > { %2873 = vmatprep.subr.mxu0 %v2064_v39 }
 0x2e0   : > { %2874 = vmatpush3.msra.mxu0 %v2064_v39 }
 0x2e1   : > { %2875 = vmatprep.subr.mxu0 %v2063_v23 }
 0x2e2   : > { %2876 = vmatpush3.msra.mxu0 %v2063_v23 }
 0x2e3   : > { %2877 = vmatprep.subr.mxu0 %v2062_v46 }
 0x2e4   : > { %2878 = vmatpush3.msra.mxu0 %v2062_v46 }
 0x2e5   : > { %2880 = vmatmul.mubr.msk.f32.vlgmr.msra.gmra.mxu0 %vm1849_vm4, %v2067_v63 }
 0x398   : > { %v2860_v43 = vpop.f32.mrf.mxu1 }
 0x399   : > { %v1928_v57 = vadd.f32 %v2860_v43, %v2793_v58 }
 0x39a   : > { %v1922_v13 = vpop.f32.mrf.mxu1 }
 0x39b   : > { %v1932_v49 = vadd.f32 %v1928_v57, %v5169_v19  ;;  %v1923_v48 = vadd.f32 %v2793_v58, %v1922_v13 }
 0x39d   : > { %1936 = vst.msk [vmem:[%s1934_s25 + $0x8] sm:$0xff] %vm1754_vm3, %v1932_v49  ;;  %v1931_v8 = vadd.f32 %v1923_v48, %v4984_v35  ;;  %v2171_v26 = vsel %vm1754_vm3, %v1932_v49, 0.0  ;;  %v2182_v9 = vmul.f32 %v1932_v49, %v1932_v49 }
 0x39e   : > { %2172 = vadd.xlane.f32.xlu0 %v2171_v26 }
 0x39f   : > { %1935 = vst.msk [vmem:[%s1934_s25] sm:$0xff] %vm1754_vm3, %v1931_v8  ;;  %v2168_v37 = vsel %vm1754_vm3, %v1931_v8, 0.0  ;;  %v2181_v20 = vmul.f32 %v1931_v8, %v1931_v8  ;;  %v2186_v25 = vsel %vm1754_vm3, %v2182_v9, 0.0 }
 0x3a0   : > { %2169 = vadd.xlane.f32.xlu1 %v2168_v37 }
 0x3a1   : > { %v2183_v7 = vsel %vm1754_vm3, %v2181_v20, 0.0 }
 0x3a4   : > { %2184 = vadd.xlane.f32.xlu1 %v2183_v7 }
 0x3a5   : > { %v2881_v59 = vpop.f32.mrf.mxu0 }
 0x3a6   : > { %v2158_v52 = vadd.f32 %v2881_v59, %v2078_v40 }
 0x3a7   : > { %v2152_v27 = vpop.f32.mrf.mxu0 }
 0x3a8   : > { %v2162_v4 = vadd.f32 %v2158_v52, %v5169_v19  ;;  %v2153_v44 = vadd.f32 %v2152_v27, %v2073_v31  ;;  %2187 = vadd.xlane.f32.xlu1 %v2186_v25 }
 0x3aa   : > { %2165 = vst.msk [vmem:[%s2163_s20 + $0x8] sm:$0xff] %vm1754_vm3, %v2162_v4  ;;  %v2208_v30 = vmul.f32 %v2162_v4, %v2162_v4  ;;  %v2161_v18 = vadd.f32 %v2153_v44, %v4984_v35  ;;  %v2195_v5 = vsel %vm1754_vm3, %v2162_v4, 0.0 }
 0x3ac   : > { %2164 = vst.msk [vmem:[%s2163_s20] sm:$0xff] %vm1754_vm3, %v2161_v18  ;;  %v2194_v22 = vsel %vm1754_vm3, %v2161_v18, 0.0  ;;  %v2207_v17 = vmul.f32 %v2161_v18, %v2161_v18  ;;  %v2210_v15 = vsel %vm1754_vm3, %v2208_v30, 0.0 }
 0x3ad   : > { %v2196_v61 = vadd.f32 %v2195_v5, %v2194_v22 }
 0x3ae   : > { %v2209_v24 = vsel %vm1754_vm3, %v2207_v17, 0.0 }
 0x3af   : > { %v2197_v50 = vrot.slane %v2196_v61, 4  ;;  %v2211_v19 = vadd.f32 %v2210_v15, %v2209_v24 }
 0x3b1   : > { %v2198_v42 = vadd.f32 %v2197_v50, %v2196_v61  ;;  %v2212_v12 = vrot.slane %v2211_v19, 4 }
 0x3b3   : > { %v2199_v38 = vrot.slane %v2198_v42, 2  ;;  %v2213_v56 = vadd.f32 %v2212_v12, %v2211_v19 }
 0x3b5   : > { %v2200_v33 = vadd.f32 %v2199_v38, %v2198_v42  ;;  %v2214_v35 = vrot.slane %v2213_v56, 2 }
 0x3b7   : > { %v2201_v2 = vrot.slane %v2200_v33, 1  ;;  %v2215_v53 = vadd.f32 %v2214_v35, %v2213_v56 }
 0x3b9   : > { %v2202_v60 = vadd.f32 %v2201_v2, %v2200_v33  ;;  %v2216_v28 = vrot.slane %v2215_v53, 1 }
 0x3bb   : > { %v2203_v16 = vadd.f32 %v2202_v60, %v2193_v54  ;;  %v2217_v10 = vadd.f32 %v2216_v28, %v2215_v53 }
 0x3bd   : > { %2205 = vst.msk [vmem:[#allocation6] sm:$0x1] %vm2204_vm5, %v2203_v16  ;;  %v2218_v3 = vadd.f32 %v2217_v10, %v2206_v0 }
 0x3bf   : > { %2219 = vst.msk [vmem:[#allocation7] sm:$0x1] %vm2204_vm5, %v2218_v3 }
 0x427   : > { %v2173_v51 = vpop.xlane.xlu0 %2172 }
 0x428   : > { %v2175_v14 = vadd.f32 %v2173_v51, %v2167_v21 }
 0x429   : > { %v2170_v55 = vpop.xlane.xlu1 %2169 }
 0x42a   : > { %2178 = vst.msk [vmem:[#allocation4 + $0x8] sm:$0xff] %vm2176_vm6, %v2175_v14  ;;  %v2174_v32 = vadd.f32 %v2170_v55, %v2166_v36 }
 0x42c   : > { %2177 = vst.msk [vmem:[#allocation4] sm:$0xff] %vm2176_vm6, %v2174_v32 }
 0x42d   : > { %v2185_v41 = vpop.xlane.xlu1 %2184 }
 0x42e   : > { %v2189_v29 = vadd.f32 %v2185_v41, %v2179_v34 }
 0x430   : > { %2191 = vst.msk [vmem:[#allocation5] sm:$0xff] %vm2176_vm6, %v2189_v29 }
 0x431   : > { %v2188_v6 = vpop.xlane.xlu1 %2187 }
 0x432   : > { %v2190_v11 = vadd.f32 %v2188_v6, %v2180_v47 }
 0x434   : > { %2192 = vst.msk [vmem:[#allocation5 + $0x8] sm:$0xff] %vm2176_vm6, %v2190_v11 }
 0x435 PF: > { %s5905_s7 = sld [smem:[#allocation26_spill]] }
 0x43b   : > { %p2803_p2 = scmp.ne.s32.totalorder %s5905_s7, 1 }
 0x43c   : > { %s5906_s11 = sld [smem:[#allocation125_spill]] (!%p2803_p2) }
 0x43d   : > { %2223 = sbr.rel (%p2803_p2) target bundleno = 1545 (0x609), region = 120  ;;  %s5907_s0 = sld [smem:[#allocation25_spill]] (!%p2803_p2) }
 0x43e   : > { %s2810_s8 = sld [smem:[#allocation13 + $0x4]] (!%p2803_p2) }
 0x43f   : > { %s5908_s29 = sld [smem:[#allocation112_spill]] (!%p2803_p2) }
 0x440   : > { %s2811_s28 = sld [smem:[#allocation13 + $0x5]] (!%p2803_p2) }
 0x441   : > { %s2808_s12 = sld [smem:[#allocation13 + $0x2]] (!%p2803_p2) }
 0x442   : > { %v2297_v62 = vld [vmem:[%s5906_s11] sm:$0xff]  ;;  %vm2299_vm7 = vcmask 64512   ;;  %v3295_v45 = vmov 0.0   ;;  %vm3296_vm8 = vmmov 0   ;;  %v2225_v23 = vld [vmem:[#allocation4 + $0x8] sm:$0xff]  ;;  %v2229_v39 = vld [vmem:[#allocation5 + $0x8] sm:$0xff]  ;;  %v2280_v14 = vlaneseq }
 0x443   : > { %2882 = vmatprep.subr.mxu0 %v3295_v45  ;;  %2884 = vmatprep.mubr.msk.f32.mxu0 %vm3296_vm8, %v3295_v45  ;;  %v2224_v46 = vld [vmem:[#allocation4] sm:$0xff]  ;;  %v3297_v63 = vmov 0   ;;  %v2227_v58 = vmul.f32 0.03125, %v2225_v23  ;;  %v2231_v43 = vmul.f32 0.03125, %v2229_v39  ;;  %v2228_v13 = vld [vmem:[#allocation5] sm:$0xff]  ;;  %s2809_s18 = sld [smem:[#allocation13 + $0x3]] }
 0x444   : > { %2883 = vmatpush3.msra.mxu0 %v2297_v62  ;;  %3075 = vset.pattern.permute.xlu1 %v3297_v63  ;;  %v2226_v57 = vmul.f32 0.03125, %v2224_v46  ;;  %v2230_v49 = vmul.f32 0.03125, %v2228_v13  ;;  %v2418_v59 = vstv %s2810_s8  ;;  %s5909_s24 = sld [smem:[#allocation126_spill]]  ;;  %vm2381_vm9 = vcmask 122880   ;;  %v2240_v35 = vld [vmem:[#allocation6] sm:$0x1] }
 0x445   : > { %2885 = vmatmul.mubr.msk.f32.vlgmr.msra.gmra.mxu0 %vm2299_vm7, %v3610_v1  ;;  %3074 = vset.pattern.permute.xlu0 %v3297_v63  ;;  %v2233_v48 = vmul.f32 %v2227_v58, %v2227_v58  ;;  %s2407_s13 = scalar_lea.vmem %s5908_s29, %s5907_s0  ;;  %v2419_v52 = vmul.f32 %v2418_v59, %v3610_v1  ;;  %s5910_s17 = sld [smem:[#allocation127_spill]]  ;;  %v2241_v53 = vmul.f32 0.03125, %v2240_v35  ;;  %v2242_v54 = vld [vmem:[#allocation7] sm:$0x1]  ;;  %v2281_v55 = vshrl.u32 %v2280_v14, 7 }
 0x446   : > { %2262 = vperm.xlu1 %3075, %v2227_v58   ;;  %v2232_v8 = vmul.f32 %v2226_v57, %v2226_v57  ;;  %v2408_v9 = vld [vmem:[%s2407_s13] sm:$0x1]  ;;  %v2421_v27 = vstv %s2811_s28  ;;  %s2807_s23 = sld [smem:[#allocation13 + $0x1]]  ;;  %v2243_v0 = vmul.f32 0.03125, %v2242_v54  ;;  %s2804_s30 = sshll.u32 %s5907_s0, 4  ;;  %vm2461_vm14 = vcmask 130048  }
 0x447   : > { %v2235_v26 = vsub.f32 %v2231_v43, %v2233_v48  ;;  %v2422_v25 = vadd.f32 %v2421_v27, %v2419_v52  ;;  %v2412_v44 = vstv %s2808_s12  ;;  %v2244_v16 = vmul.f32 %v2241_v53, %v2241_v53  ;;  %s2252_s27 = scalar_lea.vmem [#allocation3], %s2804_s30  ;;  %s2249_s9 = scalar_lea.vmem [#allocation2], %s2804_s30 }
 0x448   : > { %v2234_v31 = vsub.f32 %v2230_v49, %v2232_v8  ;;  %v2282_v34 = vsub.s32 0, %v2281_v55  ;;  %v2253_v11 = vld [vmem:[%s2252_s27] sm:$0xff]  ;;  %v2251_v45 = vld [vmem:[%s2249_s9 + $0x8] sm:$0xff]  ;;  %s5911_s20 = sld [smem:[#allocation36_spill]] }
 0x449   : > { %v2237_v20 = vadd.f32 1e-05, %v2235_v26  ;;  %v2415_v5 = vstv %s2809_s18  ;;  %v2245_v21 = vsub.f32 %v2243_v0, %v2244_v16  ;;  %v2254_v23 = vld [vmem:[%s2252_s27 + $0x8] sm:$0xff]  ;;  %v2250_v39 = vld [vmem:[%s2249_s9] sm:$0xff] }
 0x44a   : > { %v2236_v37 = vadd.f32 1e-05, %v2234_v31  ;;  %v2298_v61 = vld [vmem:[%s5909_s24] sm:$0x1]  ;;  %v2283_v47 = vrot.slane %v2241_v53, %v2282_v34 }
 0x44b   : > { %v2379_v12 = vld [vmem:[%s5910_s17] sm:$0x1]  ;;  %v2246_v36 = vadd.f32 1e-05, %v2245_v21 }
 0x44c   : > { %3076 = vrsqrt.f32 %v2236_v37  ;;  %v2386_v2 = vstv %s2807_s23  ;;  %v2285_v63 = vsub.f32 %v2253_v11, %v2283_v47 }
 0x44d   : > { %3078 = vrsqrt.f32 %v2237_v20 }
 0x44e   : > { %3080 = vlog2.f32 %v2408_v9 }
 0x44f   : > { %3082 = vrcp.f32 %v2422_v25 }
 0x459   : > { %v3077_v7 = vpop.eup %3076 }
 0x45a   : > { %2269 = vperm.xlu1 %3075, %v3077_v7   ;;  %v3079_v40 = vpop.eup %3078 }
 0x45b   : > { %v3081_v4 = vpop.eup %3080 }
 0x45c   : > { %v2410_v30 = vmul.f32 0.6931472, %v3081_v4  ;;  %v3083_v17 = vpop.eup %3082 }
 0x45d   : > { %2890 = vpush %v3083_v17 }
 0x45e   : > { %2274 = vperm.xlu1 %3075, %v3079_v40   ;;  %v2413_v18 = vmul.f32 %v2412_v44, %v2410_v30 }
 0x460   : > { %v2416_v22 = vadd.f32 %v2415_v5, %v2413_v18 }
 0x462   : > { %2892 = vpush %v2416_v22 }
 0x48e   : > { %s2891_s14 = spop %2890 }
 0x48f   : > { %v2429_v25 = vstv %s2891_s14 }
 0x493   : > { %s2893_s25 = spop %2892 }
 0x494   : > { %v2435_v22 = vstv %s2893_s25 }
 0x4c1   : > { %v2263_v32 = vpop.permute.xlu1 %2262 }
 0x4c2   : > { %v2266_v58 = vsub.f32 %v2251_v45, %v2263_v32 }
 0x4d5   : > { %v2270_v6 = vpop.permute.xlu1 %2269 }
 0x4d9   : > { %v2275_v48 = vpop.permute.xlu1 %2274 }
 0x4da   : > { %v2278_v31 = vmul.f32 %v2275_v48, %v2266_v58 }
 0x505   : > { %v2369_v15 = vpop.f32.mrf.mxu0 }
 0x506   : > { %v2370_v1 = vadd.f32 %v2369_v15, %v2298_v61 }
 0x507   : > { %v2886_v24 = vpop.f32.mrf.mxu0 }
 0x508   : > { %v2806_v50 = vmul.f32 -1.442695, %v2370_v1 }
 0x50a   : > { %3084 = vpow2.f32 %v2806_v50 }
 0x517   : > { %v3085_v19 = vpop.eup %3084 }
 0x518   : > { %v2376_v42 = vadd.f32 1.0, %v3085_v19 }
 0x51a   : > { %3086 = vrcp.f32 %v2376_v42 }
 0x527   : > { %v3087_v38 = vpop.eup %3086 }
 0x528   : > { %v2380_v56 = vmul.f32 %v3087_v38, %v2379_v12 }
 0x52a   : > { %v2382_v33 = vsel %vm2381_vm9, %v2380_v56, 0.0 }
 0x52b   : > { %2383 = vadd.xlane.f32.xlu0 %v2382_v33 }
 0x541   : > { %2257 = vperm.xlu0 %3074, %v2226_v57   ;;  %v2286_v57 = vsub.f32 %v2254_v23, %v2283_v47 }
 0x5b4   : > { %v2384_v60 = vpop.xlane.xlu0 %2383 }
 0x5b5   : > { %v2387_v28 = vadd.f32 %v2386_v2, %v2384_v60 }
 0x5b7   : > { %v2391_v10 = vand.u32 2147483647, %v2387_v28  ;;  %v2388_v4 = vmax.f32 %v2387_v28, 0.0  ;;  %vm2389_vm11 = vcmp.ne.f32.partialorder %v2387_v28, %v2387_v28 }
 0x5b9   : > { %v2392_v3 = vsub.f32 0.0, %v2391_v10 }
 0x5bb   : > { %v2393_v51 = vmul.f32 1.442695, %v2392_v3 }
 0x5bc   : > { %v2258_v46 = vpop.permute.xlu0 %2257 }
 0x5bd   : > { %3088 = vpow2.f32 %v2393_v51  ;;  %v2265_v43 = vsub.f32 %v2250_v39, %v2258_v46 }
 0x5be   : > { %3090 = vrsqrt.f32 %v2246_v36 }
 0x5bf   : > { %v2277_v8 = vmul.f32 %v2270_v6, %v2265_v43 }
 0x5ca   : > { %v3089_v41 = vpop.eup %3088 }
 0x5cb   : > { %v2395_v29 = vadd.f32 1.0, %v3089_v41  ;;  %v3091_v62 = vpop.eup %3090  ;;  %v2398_v49 = vmul.f32 -0.5, %v3089_v41  ;;  %v2401_v7 = vand.u32 2147483647, %v3089_v41 }
 0x5cc   : > { %v2291_v13 = vrot.slane %v3091_v62, %v2282_v34 }
 0x5cd   : > { %3092 = vlog2.f32 %v2395_v29  ;;  %v2399_v20 = vadd.f32 1.0, %v2398_v49  ;;  %vm2402_vm10 = vcmp.lt.f32.partialorder %v2401_v7, 0.0004427343 }
 0x5ce   : > { %v2294_v26 = vmul.f32 %v2291_v13, %v2286_v57  ;;  %v2293_v37 = vmul.f32 %v2291_v13, %v2285_v63 }
 0x5cf   : > { %v2400_v27 = vmul.f32 %v3089_v41, %v2399_v20 }
 0x5d0   : > { %v2296_v40 = vadd.f32 %v2294_v26, %v2278_v31  ;;  %v2295_v59 = vadd.f32 %v2293_v37, %v2277_v8 }
 0x5d2   : > { %v2431_v18 = vmul.f32 %v2429_v25, %v2295_v59  ;;  %v2432_v5 = vmul.f32 %v2429_v25, %v2296_v40 }
 0x5d4   : > { %v2437_v15 = vsub.f32 %v2435_v22, %v2431_v18  ;;  %v2438_v1 = vsub.f32 %v2435_v22, %v2432_v5 }
 0x5d6   : > { %v2439_v24 = vmul.f32 0.5, %v2437_v15  ;;  %v2440_v50 = vmul.f32 0.5, %v2438_v1  ;;  %vm2445_vm12 = vcmp.ge.f32.partialorder %v2437_v15, 0.0  ;;  %vm2446_vm13 = vcmp.ge.f32.partialorder %v2438_v1, 0.0 }
 0x5d8   : > { %v2441_v19 = vmul.f32 %v2439_v24, %v2437_v15  ;;  %v2442_v42 = vmul.f32 %v2440_v50, %v2438_v1 }
 0x5da   : > { %v3093_v9 = vpop.eup %3092  ;;  %v2443_v12 = vsub.f32 -0.22579135, %v2441_v19  ;;  %v2444_v38 = vsub.f32 -0.22579135, %v2442_v42 }
 0x5db   : > { %v2397_v52 = vmul.f32 0.6931472, %v3093_v9 }
 0x5dc   : > { %v2447_v35 = vsel %vm2445_vm12, %v2443_v12, -inf  ;;  %v2448_v2 = vsel %vm2446_vm13, %v2444_v38, -inf }
 0x5dd   : > { %v2403_v44 = vsel %vm2402_vm10, %v2400_v27, %v2397_v52 }
 0x5de   : > { %v2404_v30 = vadd.f32 %v2403_v44, %v2388_v4 }
 0x5e0   : > { %v2405_v17 = vsel %vm2389_vm11, %v2387_v28, %v2404_v30 }
 0x5e1   : > { %v2406_v61 = vmul.f32 10.0, %v2405_v17 }
 0x5e3   : > { %3094 = vrcp.f32 %v2406_v61 }
 0x5f0   : > { %v3095_v56 = vpop.eup %3094 }
 0x5f1   : > { %v2452_v33 = vrot.slane %v3095_v56, %v2282_v34 }
 0x5f3   : > { %v2453_v53 = vmul.f32 %v2452_v33, %v2447_v35  ;;  %v2454_v54 = vmul.f32 %v2452_v33, %v2448_v2 }
 0x5f5   : > { %v2455_v60 = vmul.f32 1.442695, %v2453_v53  ;;  %v2457_v28 = vmul.f32 1.442695, %v2454_v54 }
 0x5f7   : > { %3096 = vpow2.f32 %v2455_v60 }
 0x5f8   : > { %3098 = vpow2.f32 %v2457_v28 }
 0x604   : > { %v3097_v0 = vpop.eup %3096 }
 0x605   : > { %v3099_v16 = vpop.eup %3098  ;;  %v2459_v10 = vsub.f32 1.0, %v3097_v0 }
 0x606   : > { %v2460_v3 = vsub.f32 1.0, %v3099_v16 }
 0x607   : > { %2462 = vst.msk [vmem:[%s5911_s20] sm:$0xff] %vm2461_vm14, %v2459_v10 }
 0x608   : > { %2463 = vst.msk [vmem:[%s5911_s20 + $0x8] sm:$0xff] %vm2461_vm14, %v2460_v3 }
 0x609 PF: > { %s5912_s7 = sld [smem:[#allocation26_spill]]  ;;  %s3298_s24 = smov [#allocation15]  }
 0x60a   : > { %s5913_s5 = sld [smem:[#allocation25_spill]]  ;;  %s3162_s6 = sshll.u32 %s3298_s24, 4  ;;  %s3163_s6 = int_to_ptr.vmem [resolvable:$false] %s3162_s6 }
 0x60b   : > { %s5914_s3 = sld [smem:[#allocation36_spill]]  ;;  %s3164_s1 = scalar_lea.vmem %s3163_s6, 512 }
 0x60c   : > { %s5915_s11 = sld [smem:[#allocation21_spill]] }
 0x60d   : > { %s5916_s0 = sld [smem:[#allocation30_spill]] }
 0x60e   : > { %s5917_s28 = sld [smem:[#allocation128_spill]] }
 0x610   : > { %s2472_s8 = smul.u32 %s5913_s5, %s5912_s7 }
 0x611   : > { %s2479_s21 = sshll.u32 %s5914_s3, 4  ;;  %s5256_s21 = int_to_ptr.vmem [resolvable:$true] %s2479_s21 }
 0x612   : > { %s2818_s16 = sshll.u32 %s2472_s8, 8  ;;  %s5918_s18 = sand.u32 1, %s5915_s11  }
 0x613   : > { %s5265_s2 = scalar_lea.sflag [#allocation10], %s5918_s18  ;;  %s3158_s22 = scalar_lea.vmem %s5256_s21, 256 }
 0x614   : > { %s5261_s12 = scalar_lea.hbm %s5917_s28, %s2818_s16  ;;  %p3159_p9 = scmp.ne.s32.totalorder %s5256_s21, %s3158_s22 }
 0x615   : > { %p5919_p13 = scmp.ne.s32.totalorder %s5916_s0, 0  ;;  %p3165_p3 = scmp.lt.s32.totalorder %s5256_s21, %s3163_s6 }
 0x616   : > { %p3166_p5 = scmp.lt.s32.totalorder %s3164_s1, %s3158_s22 }
 0x617   : > { %p3160_p12 = pnand %p3159_p9, %p5919_p13 }
 0x618   : > { %p3167_p1 = por %p3166_p5, %p3165_p3 }
 0x619   : > { %p3161_p0 = pneg %p3160_p12 }
 0x61b   : > { %p3168_p4 = pnand %p3167_p1, %p3161_p0 }
 0x61d   : > { %3171 = shalt.err (!%p3168_p4)
}
 0x61e   : > { %s3172_s17 = scalar_lea.hbm %s5261_s12, 256  ;;  %s3176_s27 = scalar_lea.hbm %s5917_s28, 512 }
 0x61f   : > { %p3173_p11 = scmp.ne.s32.totalorder %s5261_s12, %s3172_s17  ;;  %p3177_p6 = scmp.lt.s32.totalorder %s5261_s12, %s5917_s28 }
 0x620   : > { %p3178_p10 = scmp.lt.s32.totalorder %s3176_s27, %s3172_s17 }
 0x621   : > { %p3174_p7 = pnand %p3173_p11, %p5919_p13 }
 0x622   : > { %p3179_p2 = por %p3178_p10, %p3177_p6 }
 0x623   : > { %p3175_p8 = pneg %p3174_p7 }
 0x625   : > { %p3180_p9 = pnand %p3179_p2, %p3175_p8 }
 0x627   : > { %3183 = shalt.err (!%p3180_p9)
}
 0x628   : > { %s3299_s25 = smov 128   ;;  %s3300_s20 = smov 8  }
 0x629   : > { %2904 = dma.vmem_to_hbm [thread:$0]  (%p5919_p13), %s5256_s21, 256, %s5261_s12, %s5265_s2, %s3299_s25, %s3299_s25, %s3300_s20  }
 0x62a PF: > { %s5920_s7 = sld [smem:[#allocation29_spill]] }
 0x62b   : > { %s5921_s5 = sld [smem:[#allocation20_spill]] }
 0x62c   : > { %s5922_s3 = sld [smem:[#allocation31_spill]] }
 0x630   : > { %p2926_p12 = scmp.ge.s32.totalorder %s5920_s7, 2 }
 0x631   : > { %s2494_s11 = sand.u32 1, %s5921_s5  }
 0x632   : > { %p5923_p0 = scmp.ne.s32.totalorder %s5922_s3, 0  ;;  %s2495_s8 = scalar_lea.sflag [#allocation10], %s2494_s11 }
 0x634   : > { %p2918_p3 = pnand %p2926_p12, %p5923_p0 }
 0x636   : > { %p2919_p5 = pneg %p2918_p3 }
 0x638   : > { %3241 = dma.done.wait (%p2919_p5), %s2495_s8, 256  }
 0x639   : > { %3243 = vsyncadd (%p2919_p5), %s2495_s8, 4294967040  ;;  %s37_s3 = sadd.s32 1, %s5920_s7   ;;  %s5924_s0 = sld [smem:[#allocation21_spill]] }
 0x63a   : > { %p34_p1 = scmp.ge.s32.totalorder %s37_s3, 6   ;;  %s5925_s30 = sld [smem:[#allocation22_spill]] }
 0x63b   : > { %s5926_s20 = sld [smem:[#allocation34_spill]] }
 0x63c   : > { %s5927_s21 = sld [smem:[#allocation23_spill]] }
 0x63d   : > { %s5928_s1 = sld [smem:[#allocation24_spill]] }
 0x63e   : > { %s5929_s22 = sld [smem:[#allocation35_spill]]  ;;  %36 = sbr.rel (!%p34_p1) target bundleno = 32 (0x20), region = 180 }
 0x63f   : > { %s5930_s2 = sld [smem:[#allocation27_spill]] }
 0x640   : > { %s5931_s23 = sld [smem:[#allocation28_spill]] }
 0x641   : > { %s5932_s24 = sld [smem:[#allocation32_spill]] }
 0x642   : > { %s5933_s25 = sld [smem:[#allocation33_spill]] }
 0x643   :  { %2500 = vsyncpa [#allocation9], 1 }
 0x644   :  { %2502 = vsyncpa [#allocation9 + $0x1], 1 }
 0x645   :  { %2503 = vsyncpa [#allocation10], 1 }
 0x646   :  { %2505 = vsyncpa [#allocation10 + $0x1], 1 }
 0x647   :  { %2506 = vsyncpa [#allocation11], 1 }
 0x648   :  { %2508 = vsyncpa [#allocation11 + $0x1], 1 }
 0x649   :  { %2509 = vsyncpa [#allocation14], 1 }

</bundles_post_ra>
